<compile_context>
chip_gen: v5e
topology: v5e:2x2
jax: 0.10.0
libtpu: 0.0.40
codegen_flags: <defaults>
</compile_context>

<pallas_src>
import jax
import jax.numpy as jnp
from jax.experimental import pallas as pl
from jax.experimental.pallas import tpu as pltpu

# ----------------------------- model constants ------------------------------
OUT_CH = 8              # out_channel of the module
B = 4                   # batch
L_IN = 506              # minimal input length s.t. net1 output is (B, 128, 1)
K1 = 100                # conv kernel size (both convs)
STRIDE = 2
C1 = 64                 # conv1 out channels
C2 = 128                # conv2 out channels
K1_PAD = 128            # conv1 im2col K padded to a full lane tile
BN_EPS = 1e-5

GRID_SIZE = 5           # efficient-kan defaults
SPLINE_ORDER = 3
GRID_RANGE = (-1.0, 1.0)
GRID_PTS = GRID_SIZE + 2 * SPLINE_ORDER + 1          # 12 extended grid points
N_BASIS = GRID_SIZE + SPLINE_ORDER                   # 8 spline basis functions
GRID_H = (GRID_RANGE[1] - GRID_RANGE[0]) / GRID_SIZE
# Uniform extended grid folded to compile-time scalars (no grid operand in the kernel).
GRID_KNOTS = tuple(GRID_RANGE[0] + (m - SPLINE_ORDER) * GRID_H for m in range(GRID_PTS))


# ------------------------------ Pallas kernels ------------------------------
def conv1_block_kernel(p_ref, wT_ref, b_ref, scale_ref, shift_ref, o_ref):
    """Conv1d(1,64,k=100,s=2) as ONE im2col matmul on (even|odd)-stacked rows,
    then MaxPool1d(2) (= even/odd max) -> ReLU -> BatchNorm1d (eval affine)."""
    c = jnp.dot(p_ref[...], wT_ref[...], preferred_element_type=jnp.float32) + b_ref[...]
    half = c.shape[0] // 2                                   # 408 (tile-aligned split)
    pooled = jnp.maximum(c[:half, :], c[half:, :])           # MaxPool1d(kernel_size=2)
    act = jnp.maximum(pooled, 0.0)                           # ReLU
    o_ref[...] = (act * scale_ref[...] + shift_ref[...]).astype(o_ref.dtype)  # BN(eval)


def _kan_linear(x, base_wT, spline_w3):
    """efficient-kan KANLinear forward on a value x of shape (rows, in_features).
    Uniform grid -> knots and Cox-de Boor denominators are compile-time scalars."""
    silu = x * (1.0 / (1.0 + jnp.exp(-x)))                   # SiLU base branch (EUP)
    out = jnp.dot(silu, base_wT, preferred_element_type=jnp.float32)

    g = GRID_KNOTS
    # degree-0 bases, then Cox-de Boor recursion (static unroll, no divides).
    bases = [((x >= g[m]) & (x < g[m + 1])).astype(jnp.float32)
             for m in range(GRID_PTS - 1)]
    for k in range(1, SPLINE_ORDER + 1):
        inv = 1.0 / (k * GRID_H)                             # g[m+k]-g[m] == k*h (uniform)
        bases = [((x - g[m]) * inv) * bases[m]
                 + ((g[m + k + 1] - x) * inv) * bases[m + 1]
                 for m in range(len(bases) - 1)]             # len -> N_BASIS

    # Single batched contraction replaces 8 tiny matmuls:
    stacked = jnp.stack(bases, axis=0)                       # (N_BASIS, rows, in)
    per_basis = jnp.einsum('jbi,jio->jbo', stacked, spline_w3,
                           preferred_element_type=jnp.float32)
    return out + jnp.sum(per_basis, axis=0)


def tail_kernel(p2_ref, w2T_ref, b2_ref, bn2s_ref, bn2b_ref,
                fcT_ref, fcb_ref,
                k1_baseT_ref, k1_spline_ref, k2_baseT_ref, k2_spline_ref,
                fc_ref, probas_ref):
    """Conv1d(64,128,k=100,s=2) (one bf16 matmul on even|odd-stacked im2col rows)
    -> MaxPool(2) -> ReLU -> BN(128) -> flatten -> Linear(128,64)+ReLU
    -> KAN([64,32,OUT_CH]) -> softmax.  All fused; two outputs (fc, probas)."""
    c = jnp.dot(p2_ref[...], w2T_ref[...], preferred_element_type=jnp.float32) + b2_ref[...]
    half = c.shape[0] // 2                                   # B
    pooled = jnp.maximum(c[:half, :], c[half:, :])           # MaxPool1d(2) over L=2
    act = jnp.maximum(pooled, 0.0)                           # ReLU
    flat = act * bn2s_ref[...] + bn2b_ref[...]               # BN(eval); == view(-1, C*L), L=1

    # feature_layer: Linear(128,64) + ReLU
    # TODO(synk): Dropout(0.2) omitted (inference-mode identity; train-mode RNG not reproduced).
    h = jnp.dot(flat, fcT_ref[...], preferred_element_type=jnp.float32) + fcb_ref[...]
    h = jnp.maximum(h, 0.0)

    # feature_layer_2: KAN([64, 32, OUT_CH])
    h = _kan_linear(h, k1_baseT_ref[...], k1_spline_ref[...])
    fc = _kan_linear(h, k2_baseT_ref[...], k2_spline_ref[...])
    fc_ref[...] = fc

    # probas = softmax(fc, dim=1)  (exact reciprocal: sum-to-one within 1e-5)
    m = jnp.max(fc, axis=1, keepdims=True)
    e = jnp.exp(fc - m)
    probas_ref[...] = e / jnp.sum(e, axis=1, keepdims=True)


# ------------------------------ pallas_call glue -----------------------------
def _full_spec(shape):
    nd = len(shape)
    return pl.BlockSpec(shape, lambda i, _nd=nd: (0,) * _nd)


def _single_block_call(kernel, out_shape, *args):
    """Whole-problem-in-VMEM call: grid=(1,), full-array blocks for every operand."""
    out_specs = jax.tree.map(lambda s: _full_spec(s.shape), out_shape)
    return pl.pallas_call(
        kernel,
        grid=(1,),
        in_specs=[_full_spec(a.shape) for a in args],
        out_specs=out_specs,
        out_shape=out_shape,
        compiler_params=pltpu.CompilerParams(dimension_semantics=("arbitrary",)),
    )(*args)


# --------------------------------- forward ----------------------------------
@jax.jit
def cnn_forward(x, p):
    b, n = x.shape

    # ---- conv block 1: Conv1d(1,64,k=100,s=2) -> MaxPool(2) -> ReLU -> BN(64) ----
    # im2col via strided slices (no XLA gather): p1[b, s, j] = x[b, 2*s + j]
    t_conv1 = (n - K1) // STRIDE + 1                                   # 204
    cols = [x[:, j: j + STRIDE * (t_conv1 - 1) + 1: STRIDE] for j in range(K1)]
    p1 = jnp.stack(cols, axis=2)                                       # (B, 204, 100)
    t_pool1 = t_conv1 // 2                                             # 102
    pe1 = p1[:, 0::2].reshape(b * t_pool1, K1)                         # even conv positions
    po1 = p1[:, 1::2].reshape(b * t_pool1, K1)                         # odd  conv positions
    patches1 = jnp.concatenate([pe1, po1], axis=0)                     # (816, 100)
    patches1 = jnp.pad(patches1, ((0, 0), (0, K1_PAD - K1)))           # lane-align K -> 128

    o1 = _single_block_call(
        conv1_block_kernel,
        jax.ShapeDtypeStruct((b * t_pool1, C1), jnp.bfloat16),
        patches1, p["w1T"], p["b1"], p["bn1_scale"], p["bn1_shift"])   # (408, 64) bf16

    # ---- conv block 2 + Linear + KAN + KAN + softmax: fully fused tail ----
    # conv2 im2col is pure static slicing of the (B, 102, 64) channels-last activation.
    o1_btc = o1.reshape(b, t_pool1, C1)
    pe2 = o1_btc[:, 0:K1, :].reshape(b, K1 * C1)                       # conv2 position 0
    po2 = o1_btc[:, 2:2 + K1, :].reshape(b, K1 * C1)                   # conv2 position 1
    p2 = jnp.concatenate([pe2, po2], axis=0)                           # (2B, 6400) bf16

    fc, probas = _single_block_call(
        tail_kernel,
        (jax.ShapeDtypeStruct((b, OUT_CH), jnp.float32),
         jax.ShapeDtypeStruct((b, OUT_CH), jnp.float32)),
        p2, p["w2T"], p["b2"], p["bn2_scale"], p["bn2_shift"],
        p["fcT"], p["fc_b"],
        p["kan1_baseT"], p["kan1_splineT"], p["kan2_baseT"], p["kan2_splineT"])
    return fc, probas


# ------------------------------ parameter init -------------------------------
def bn_eval_affine(gamma, beta, mean, var, eps=BN_EPS):
    scale = gamma / jnp.sqrt(var + eps)
    shift = beta - mean * scale
    return scale.reshape(1, -1), shift.reshape(1, -1)


def conv_weight_to_matmul(w, k_pad=None):
    """(C_out, C_in, K) -> (K*C_in, C_out), (tap, channel) row order (matches im2col)."""
    c_out, c_in, k = w.shape
    wT = jnp.transpose(w, (2, 1, 0)).reshape(k * c_in, c_out)
    if k_pad is not None and k_pad > k * c_in:
        wT = jnp.pad(wT, ((0, k_pad - k * c_in), (0, 0)))
    return wT


def kan_layer_tensors(base_w, spline_w, spline_scaler):
    base_wT = base_w.T                                     # (in, out)
    scaled = spline_w * spline_scaler[..., None]           # (out, in, n_basis)
    spline_w3 = jnp.transpose(scaled, (2, 1, 0))           # (n_basis, in, out)
    return base_wT, spline_w3


def make_params(key):
    ks = jax.random.split(key, 8)
    f32 = jnp.float32

    w1 = 0.05 * jax.random.normal(ks[0], (C1, 1, K1), f32)
    b1 = 0.05 * jax.random.normal(ks[1], (C1,), f32)
    w2 = 0.01 * jax.random.normal(ks[2], (C2, C1, K1), f32)
    b2 = 0.05 * jax.random.normal(ks[3], (C2,), f32)

    # BatchNorm1d eval-mode stats/affine == freshly initialized PyTorch module.
    bn1_scale, bn1_shift = bn_eval_affine(jnp.ones(C1, f32), jnp.zeros(C1, f32),
                                          jnp.zeros(C1, f32), jnp.ones(C1, f32))
    bn2_scale, bn2_shift = bn_eval_affine(jnp.ones(C2, f32), jnp.zeros(C2, f32),
                                          jnp.zeros(C2, f32), jnp.ones(C2, f32))

    fc_w = 0.05 * jax.random.normal(ks[4], (64, 128), f32)   # PyTorch Linear: (out, in)
    fc_b = 0.05 * jax.random.normal(ks[5], (64,), f32)

    def kan_init(k, in_f, out_f):
        ka, kb, kc = jax.random.split(k, 3)
        base_w = jax.random.normal(ka, (out_f, in_f), f32) / jnp.sqrt(in_f)
        spline_w = 0.1 * jax.random.normal(kb, (out_f, in_f, N_BASIS), f32)
        spline_scaler = jax.random.normal(kc, (out_f, in_f), f32) / jnp.sqrt(in_f)
        return base_w, spline_w, spline_scaler

    k1b, k1s, k1c = kan_init(ks[6], 64, 32)
    k2b, k2s, k2c = kan_init(ks[7], 32, OUT_CH)
    kan1_baseT, kan1_splineT = kan_layer_tensors(k1b, k1s, k1c)
    kan2_baseT, kan2_splineT = kan_layer_tensors(k2b, k2s, k2c)

    return dict(
        w1T=conv_weight_to_matmul(w1, k_pad=K1_PAD),               # (128, 64) f32
        b1=b1.reshape(1, C1), bn1_scale=bn1_scale, bn1_shift=bn1_shift,
        w2T=conv_weight_to_matmul(w2).astype(jnp.bfloat16),        # (6400, 128) bf16
        b2=b2.reshape(1, C2), bn2_scale=bn2_scale, bn2_shift=bn2_shift,
        fcT=fc_w.T, fc_b=fc_b.reshape(1, 64),
        kan1_baseT=kan1_baseT, kan1_splineT=kan1_splineT,
        kan2_baseT=kan2_baseT, kan2_splineT=kan2_splineT,
    )


if __name__ == "__main__":
    key = jax.random.PRNGKey(0)
    kx, kp = jax.random.split(key)
    x = jax.random.normal(kx, (B, L_IN), jnp.float32)   # PyTorch input: (batch, signal_len)
    params = make_params(kp)

    fc, probas = cnn_forward(x, params)
    fc, probas = jax.block_until_ready((fc, probas))

    assert fc.shape == (B, OUT_CH) and probas.shape == (B, OUT_CH)
    assert bool(jnp.all(jnp.isfinite(fc))) and bool(jnp.all(jnp.isfinite(probas)))
    assert bool(jnp.allclose(jnp.sum(probas, axis=1), 1.0, atol=1e-5))
    print("KERNEL_OK")
</pallas_src>

<mosaic_0001>
module attributes {stable_mosaic.version = 11 : i64} {
  func.func @conv1_block_kernel(%arg0: i32, %arg1: memref<816x128xf32, #tpu.memory_space<vmem>>, %arg2: memref<128x64xf32, #tpu.memory_space<vmem>>, %arg3: memref<1x64xf32, #tpu.memory_space<vmem>>, %arg4: memref<1x64xf32, #tpu.memory_space<vmem>>, %arg5: memref<1x64xf32, #tpu.memory_space<vmem>>, %arg6: memref<408x64xbf16, #tpu.memory_space<vmem>>) attributes {dimension_semantics = [#tpu.dimension_semantics<arbitrary>], iteration_bounds = array<i64: 1>, scalar_prefetch = 0 : i64, scratch_operands = 0 : i64, tpu.core_type = #tpu.core_type<tc>, window_params = [{pipeline_mode = #tpu.pipeline_mode<synchronous>, transform_indices = @transform_0, window_bounds = array<i64: 816, 128>}, {pipeline_mode = #tpu.pipeline_mode<synchronous>, transform_indices = @transform_1, window_bounds = array<i64: 128, 64>}, {pipeline_mode = #tpu.pipeline_mode<synchronous>, transform_indices = @transform_2, window_bounds = array<i64: 1, 64>}, {pipeline_mode = #tpu.pipeline_mode<synchronous>, transform_indices = @transform_3, window_bounds = array<i64: 1, 64>}, {pipeline_mode = #tpu.pipeline_mode<synchronous>, transform_indices = @transform_4, window_bounds = array<i64: 1, 64>}, {pipeline_mode = #tpu.pipeline_mode<synchronous>, transform_indices = @transform_5, window_bounds = array<i64: 408, 64>}]} {
    %c0 = arith.constant 0 : index
    %c0_0 = arith.constant 0 : index
    %0 = vector.load %arg1[%c0, %c0_0] : memref<816x128xf32, #tpu.memory_space<vmem>>, vector<816x128xf32>
    %c0_1 = arith.constant 0 : index
    %c0_2 = arith.constant 0 : index
    %1 = vector.load %arg2[%c0_1, %c0_2] : memref<128x64xf32, #tpu.memory_space<vmem>>, vector<128x64xf32>
    %cst = arith.constant dense<0.000000e+00> : vector<816x64xf32>
    %2 = tpu.matmul %0, %1, %cst {dimension_numbers = #tpu.dot_dimension_numbers<[1], [0], [0], [1], [0, 0, 1, 1], [], []>} : vector<816x128xf32>, vector<128x64xf32>, vector<816x64xf32> -> vector<816x64xf32>
    %c0_3 = arith.constant 0 : index
    %c0_4 = arith.constant 0 : index
    %3 = vector.load %arg3[%c0_3, %c0_4] : memref<1x64xf32, #tpu.memory_space<vmem>>, vector<1x64xf32>
    %4 = vector.broadcast %3 : vector<1x64xf32> to vector<816x64xf32>
    %5 = arith.addf %2, %4 : vector<816x64xf32>
    %6 = vector.extract_strided_slice %5 {offsets = [0, 0], sizes = [408, 64], strides = [1, 1]} : vector<816x64xf32> to vector<408x64xf32>
    %7 = vector.extract_strided_slice %5 {offsets = [408, 0], sizes = [408, 64], strides = [1, 1]} : vector<816x64xf32> to vector<408x64xf32>
    %8 = arith.maximumf %6, %7 : vector<408x64xf32>
    %cst_5 = arith.constant 0.000000e+00 : f32
    %9 = vector.broadcast %cst_5 : f32 to vector<408x64xf32>
    %10 = arith.maximumf %8, %9 : vector<408x64xf32>
    %c0_6 = arith.constant 0 : index
    %c0_7 = arith.constant 0 : index
    %11 = vector.load %arg4[%c0_6, %c0_7] : memref<1x64xf32, #tpu.memory_space<vmem>>, vector<1x64xf32>
    %12 = vector.broadcast %11 : vector<1x64xf32> to vector<408x64xf32>
    %13 = arith.mulf %10, %12 : vector<408x64xf32>
    %c0_8 = arith.constant 0 : index
    %c0_9 = arith.constant 0 : index
    %14 = vector.load %arg5[%c0_8, %c0_9] : memref<1x64xf32, #tpu.memory_space<vmem>>, vector<1x64xf32>
    %15 = vector.broadcast %14 : vector<1x64xf32> to vector<408x64xf32>
    %16 = arith.addf %13, %15 : vector<408x64xf32>
    %17 = arith.truncf %16 : vector<408x64xf32> to vector<408x64xbf16>
    %c0_10 = arith.constant 0 : index
    %c0_11 = arith.constant 0 : index
    %18 = vector.load %arg6[%c0_10, %c0_11] : memref<408x64xbf16, #tpu.memory_space<vmem>>, vector<408x64xbf16>
    tpu.vector_store %arg6[%c0_10, %c0_11], %17 {strides = array<i32>} : memref<408x64xbf16, #tpu.memory_space<vmem>>, vector<408x64xbf16>,
    return
  }
  func.func @transform_0(%arg0: i32) -> (i32, i32) {
    %c0_i32 = arith.constant 0 : i32
    %c0_i32_0 = arith.constant 0 : i32
    %c0_i32_1 = arith.constant 0 : i32
    return %c0_i32, %c0_i32_0 : i32, i32
  }
  func.func @transform_1(%arg0: i32) -> (i32, i32) {
    %c0_i32 = arith.constant 0 : i32
    %c0_i32_0 = arith.constant 0 : i32
    %c0_i32_1 = arith.constant 0 : i32
    return %c0_i32, %c0_i32_0 : i32, i32
  }
  func.func @transform_2(%arg0: i32) -> (i32, i32) {
    %c0_i32 = arith.constant 0 : i32
    %c0_i32_0 = arith.constant 0 : i32
    %c0_i32_1 = arith.constant 0 : i32
    return %c0_i32, %c0_i32_0 : i32, i32
  }
  func.func @transform_3(%arg0: i32) -> (i32, i32) {
    %c0_i32 = arith.constant 0 : i32
    %c0_i32_0 = arith.constant 0 : i32
    %c0_i32_1 = arith.constant 0 : i32
    return %c0_i32, %c0_i32_0 : i32, i32
  }
  func.func @transform_4(%arg0: i32) -> (i32, i32) {
    %c0_i32 = arith.constant 0 : i32
    %c0_i32_0 = arith.constant 0 : i32
    %c0_i32_1 = arith.constant 0 : i32
    return %c0_i32, %c0_i32_0 : i32, i32
  }
  func.func @transform_5(%arg0: i32) -> (i32, i32) {
    %c0_i32 = arith.constant 0 : i32
    %c0_i32_0 = arith.constant 0 : i32
    %c0_i32_1 = arith.constant 0 : i32
    return %c0_i32, %c0_i32_0 : i32, i32
  }
}

module attributes {stable_mosaic.version = 11 : i64} {
  func.func @tail_kernel(%arg0: i32, %arg1: memref<8x6400xbf16, #tpu.memory_space<vmem>>, %arg2: memref<6400x128xbf16, #tpu.memory_space<vmem>>, %arg3: memref<1x128xf32, #tpu.memory_space<vmem>>, %arg4: memref<1x128xf32, #tpu.memory_space<vmem>>, %arg5: memref<1x128xf32, #tpu.memory_space<vmem>>, %arg6: memref<128x64xf32, #tpu.memory_space<vmem>>, %arg7: memref<1x64xf32, #tpu.memory_space<vmem>>, %arg8: memref<64x32xf32, #tpu.memory_space<vmem>>, %arg9: memref<8x64x32xf32, #tpu.memory_space<vmem>>, %arg10: memref<32x8xf32, #tpu.memory_space<vmem>>, %arg11: memref<8x32x8xf32, #tpu.memory_space<vmem>>, %arg12: memref<4x8xf32, #tpu.memory_space<vmem>>, %arg13: memref<4x8xf32, #tpu.memory_space<vmem>>) attributes {dimension_semantics = [#tpu.dimension_semantics<arbitrary>], iteration_bounds = array<i64: 1>, scalar_prefetch = 0 : i64, scratch_operands = 0 : i64, tpu.core_type = #tpu.core_type<tc>, window_params = [{pipeline_mode = #tpu.pipeline_mode<synchronous>, transform_indices = @transform_0, window_bounds = array<i64: 8, 6400>}, {pipeline_mode = #tpu.pipeline_mode<synchronous>, transform_indices = @transform_1, window_bounds = array<i64: 6400, 128>}, {pipeline_mode = #tpu.pipeline_mode<synchronous>, transform_indices = @transform_2, window_bounds = array<i64: 1, 128>}, {pipeline_mode = #tpu.pipeline_mode<synchronous>, transform_indices = @transform_3, window_bounds = array<i64: 1, 128>}, {pipeline_mode = #tpu.pipeline_mode<synchronous>, transform_indices = @transform_4, window_bounds = array<i64: 1, 128>}, {pipeline_mode = #tpu.pipeline_mode<synchronous>, transform_indices = @transform_5, window_bounds = array<i64: 128, 64>}, {pipeline_mode = #tpu.pipeline_mode<synchronous>, transform_indices = @transform_6, window_bounds = array<i64: 1, 64>}, {pipeline_mode = #tpu.pipeline_mode<synchronous>, transform_indices = @transform_7, window_bounds = array<i64: 64, 32>}, {pipeline_mode = #tpu.pipeline_mode<synchronous>, transform_indices = @transform_8, window_bounds = array<i64: 8, 64, 32>}, {pipeline_mode = #tpu.pipeline_mode<synchronous>, transform_indices = @transform_9, window_bounds = array<i64: 32, 8>}, {pipeline_mode = #tpu.pipeline_mode<synchronous>, transform_indices = @transform_10, window_bounds = array<i64: 8, 32, 8>}, {pipeline_mode = #tpu.pipeline_mode<synchronous>, transform_indices = @transform_11, window_bounds = array<i64: 4, 8>}, {pipeline_mode = #tpu.pipeline_mode<synchronous>, transform_indices = @transform_12, window_bounds = array<i64: 4, 8>}]} {
    %c0 = arith.constant 0 : index
    %c0_0 = arith.constant 0 : index
    %0 = vector.load %arg1[%c0, %c0_0] : memref<8x6400xbf16, #tpu.memory_space<vmem>>, vector<8x6400xbf16>
    %c0_1 = arith.constant 0 : index
    %c0_2 = arith.constant 0 : index
    %1 = vector.load %arg2[%c0_1, %c0_2] : memref<6400x128xbf16, #tpu.memory_space<vmem>>, vector<6400x128xbf16>
    %cst = arith.constant dense<0.000000e+00> : vector<8x128xf32>
    %2 = tpu.matmul %0, %1, %cst {dimension_numbers = #tpu.dot_dimension_numbers<[1], [0], [0], [1], [0, 0, 1, 1], [], []>} : vector<8x6400xbf16>, vector<6400x128xbf16>, vector<8x128xf32> -> vector<8x128xf32>
    %c0_3 = arith.constant 0 : index
    %c0_4 = arith.constant 0 : index
    %3 = vector.load %arg3[%c0_3, %c0_4] : memref<1x128xf32, #tpu.memory_space<vmem>>, vector<1x128xf32>
    %4 = vector.broadcast %3 : vector<1x128xf32> to vector<8x128xf32>
    %5 = arith.addf %2, %4 : vector<8x128xf32>
    %6 = vector.extract_strided_slice %5 {offsets = [0, 0], sizes = [4, 128], strides = [1, 1]} : vector<8x128xf32> to vector<4x128xf32>
    %7 = vector.extract_strided_slice %5 {offsets = [4, 0], sizes = [4, 128], strides = [1, 1]} : vector<8x128xf32> to vector<4x128xf32>
    %8 = arith.maximumf %6, %7 : vector<4x128xf32>
    %cst_5 = arith.constant 0.000000e+00 : f32
    %9 = vector.broadcast %cst_5 : f32 to vector<4x128xf32>
    %10 = arith.maximumf %8, %9 : vector<4x128xf32>
    %c0_6 = arith.constant 0 : index
    %c0_7 = arith.constant 0 : index
    %11 = vector.load %arg4[%c0_6, %c0_7] : memref<1x128xf32, #tpu.memory_space<vmem>>, vector<1x128xf32>
    %12 = vector.broadcast %11 : vector<1x128xf32> to vector<4x128xf32>
    %13 = arith.mulf %10, %12 : vector<4x128xf32>
    %c0_8 = arith.constant 0 : index
    %c0_9 = arith.constant 0 : index
    %14 = vector.load %arg5[%c0_8, %c0_9] : memref<1x128xf32, #tpu.memory_space<vmem>>, vector<1x128xf32>
    %15 = vector.broadcast %14 : vector<1x128xf32> to vector<4x128xf32>
    %16 = arith.addf %13, %15 : vector<4x128xf32>
    %c0_10 = arith.constant 0 : index
    %c0_11 = arith.constant 0 : index
    %17 = vector.load %arg6[%c0_10, %c0_11] : memref<128x64xf32, #tpu.memory_space<vmem>>, vector<128x64xf32>
    %cst_12 = arith.constant dense<0.000000e+00> : vector<4x64xf32>
    %18 = tpu.matmul %16, %17, %cst_12 {dimension_numbers = #tpu.dot_dimension_numbers<[1], [0], [0], [1], [0, 0, 1, 1], [], []>} : vector<4x128xf32>, vector<128x64xf32>, vector<4x64xf32> -> vector<4x64xf32>
    %c0_13 = arith.constant 0 : index
    %c0_14 = arith.constant 0 : index
    %19 = vector.load %arg7[%c0_13, %c0_14] : memref<1x64xf32, #tpu.memory_space<vmem>>, vector<1x64xf32>
    %20 = vector.broadcast %19 : vector<1x64xf32> to vector<4x64xf32>
    %21 = arith.addf %18, %20 : vector<4x64xf32>
    %cst_15 = arith.constant 0.000000e+00 : f32
    %22 = vector.broadcast %cst_15 : f32 to vector<4x64xf32>
    %23 = arith.maximumf %21, %22 : vector<4x64xf32>
    %c0_16 = arith.constant 0 : index
    %c0_17 = arith.constant 0 : index
    %24 = vector.load %arg8[%c0_16, %c0_17] : memref<64x32xf32, #tpu.memory_space<vmem>>, vector<64x32xf32>
    %c0_18 = arith.constant 0 : index
    %c0_19 = arith.constant 0 : index
    %c0_20 = arith.constant 0 : index
    %25 = vector.load %arg9[%c0_18, %c0_19, %c0_20] : memref<8x64x32xf32, #tpu.memory_space<vmem>>, vector<8x64x32xf32>
    %cst_21 = arith.constant 0.000000e+00 : f32
    %26 = vector.broadcast %cst_21 : f32 to vector<4x64xf32>
    %27 = arith.subf %26, %23 : vector<4x64xf32>
    %28 = math.exp %27 : vector<4x64xf32>
    %cst_22 = arith.constant 1.000000e+00 : f32
    %29 = vector.broadcast %cst_22 : f32 to vector<4x64xf32>
    %30 = arith.addf %29, %28 : vector<4x64xf32>
    %cst_23 = arith.constant 1.000000e+00 : f32
    %31 = vector.broadcast %cst_23 : f32 to vector<4x64xf32>
    %32 = arith.divf %31, %30 : vector<4x64xf32>
    %33 = arith.mulf %23, %32 : vector<4x64xf32>
    %cst_24 = arith.constant dense<0.000000e+00> : vector<4x32xf32>
    %34 = tpu.matmul %33, %24, %cst_24 {dimension_numbers = #tpu.dot_dimension_numbers<[1], [0], [0], [1], [0, 0, 1, 1], [], []>} : vector<4x64xf32>, vector<64x32xf32>, vector<4x32xf32> -> vector<4x32xf32>
    %cst_25 = arith.constant -2.200000e+00 : f32
    %35 = vector.broadcast %cst_25 : f32 to vector<4x64xf32>
    %36 = arith.cmpf oge, %23, %35 : vector<4x64xf32>
    %cst_26 = arith.constant -1.800000e+00 : f32
    %37 = vector.broadcast %cst_26 : f32 to vector<4x64xf32>
    %38 = arith.cmpf olt, %23, %37 : vector<4x64xf32>
    %39 = arith.andi %36, %38 : vector<4x64xi1>
    %40 = arith.extui %39 : vector<4x64xi1> to vector<4x64xi32>
    %41 = arith.sitofp %40 : vector<4x64xi32> to vector<4x64xf32>
    %cst_27 = arith.constant -1.800000e+00 : f32
    %42 = vector.broadcast %cst_27 : f32 to vector<4x64xf32>
    %43 = arith.cmpf oge, %23, %42 : vector<4x64xf32>
    %cst_28 = arith.constant -1.400000e+00 : f32
    %44 = vector.broadcast %cst_28 : f32 to vector<4x64xf32>
    %45 = arith.cmpf olt, %23, %44 : vector<4x64xf32>
    %46 = arith.andi %43, %45 : vector<4x64xi1>
    %47 = arith.extui %46 : vector<4x64xi1> to vector<4x64xi32>
    %48 = arith.sitofp %47 : vector<4x64xi32> to vector<4x64xf32>
    %cst_29 = arith.constant -1.400000e+00 : f32
    %49 = vector.broadcast %cst_29 : f32 to vector<4x64xf32>
    %50 = arith.cmpf oge, %23, %49 : vector<4x64xf32>
    %cst_30 = arith.constant -1.000000e+00 : f32
    %51 = vector.broadcast %cst_30 : f32 to vector<4x64xf32>
    %52 = arith.cmpf olt, %23, %51 : vector<4x64xf32>
    %53 = arith.andi %50, %52 : vector<4x64xi1>
    %54 = arith.extui %53 : vector<4x64xi1> to vector<4x64xi32>
    %55 = arith.sitofp %54 : vector<4x64xi32> to vector<4x64xf32>
    %cst_31 = arith.constant -1.000000e+00 : f32
    %56 = vector.broadcast %cst_31 : f32 to vector<4x64xf32>
    %57 = arith.cmpf oge, %23, %56 : vector<4x64xf32>
    %cst_32 = arith.constant -6.000000e-01 : f32
    %58 = vector.broadcast %cst_32 : f32 to vector<4x64xf32>
    %59 = arith.cmpf olt, %23, %58 : vector<4x64xf32>
    %60 = arith.andi %57, %59 : vector<4x64xi1>
    %61 = arith.extui %60 : vector<4x64xi1> to vector<4x64xi32>
    %62 = arith.sitofp %61 : vector<4x64xi32> to vector<4x64xf32>
    %cst_33 = arith.constant -6.000000e-01 : f32
    %63 = vector.broadcast %cst_33 : f32 to vector<4x64xf32>
    %64 = arith.cmpf oge, %23, %63 : vector<4x64xf32>
    %cst_34 = arith.constant -2.000000e-01 : f32
    %65 = vector.broadcast %cst_34 : f32 to vector<4x64xf32>
    %66 = arith.cmpf olt, %23, %65 : vector<4x64xf32>
    %67 = arith.andi %64, %66 : vector<4x64xi1>
    %68 = arith.extui %67 : vector<4x64xi1> to vector<4x64xi32>
    %69 = arith.sitofp %68 : vector<4x64xi32> to vector<4x64xf32>
    %cst_35 = arith.constant -2.000000e-01 : f32
    %70 = vector.broadcast %cst_35 : f32 to vector<4x64xf32>
    %71 = arith.cmpf oge, %23, %70 : vector<4x64xf32>
    %cst_36 = arith.constant 2.000000e-01 : f32
    %72 = vector.broadcast %cst_36 : f32 to vector<4x64xf32>
    %73 = arith.cmpf olt, %23, %72 : vector<4x64xf32>
    %74 = arith.andi %71, %73 : vector<4x64xi1>
    %75 = arith.extui %74 : vector<4x64xi1> to vector<4x64xi32>
    %76 = arith.sitofp %75 : vector<4x64xi32> to vector<4x64xf32>
    %cst_37 = arith.constant 2.000000e-01 : f32
    %77 = vector.broadcast %cst_37 : f32 to vector<4x64xf32>
    %78 = arith.cmpf oge, %23, %77 : vector<4x64xf32>
    %cst_38 = arith.constant 6.000000e-01 : f32
    %79 = vector.broadcast %cst_38 : f32 to vector<4x64xf32>
    %80 = arith.cmpf olt, %23, %79 : vector<4x64xf32>
    %81 = arith.andi %78, %80 : vector<4x64xi1>
    %82 = arith.extui %81 : vector<4x64xi1> to vector<4x64xi32>
    %83 = arith.sitofp %82 : vector<4x64xi32> to vector<4x64xf32>
    %cst_39 = arith.constant 6.000000e-01 : f32
    %84 = vector.broadcast %cst_39 : f32 to vector<4x64xf32>
    %85 = arith.cmpf oge, %23, %84 : vector<4x64xf32>
    %cst_40 = arith.constant 1.000000e+00 : f32
    %86 = vector.broadcast %cst_40 : f32 to vector<4x64xf32>
    %87 = arith.cmpf olt, %23, %86 : vector<4x64xf32>
    %88 = arith.andi %85, %87 : vector<4x64xi1>
    %89 = arith.extui %88 : vector<4x64xi1> to vector<4x64xi32>
    %90 = arith.sitofp %89 : vector<4x64xi32> to vector<4x64xf32>
    %cst_41 = arith.constant 1.000000e+00 : f32
    %91 = vector.broadcast %cst_41 : f32 to vector<4x64xf32>
    %92 = arith.cmpf oge, %23, %91 : vector<4x64xf32>
    %cst_42 = arith.constant 1.400000e+00 : f32
    %93 = vector.broadcast %cst_42 : f32 to vector<4x64xf32>
    %94 = arith.cmpf olt, %23, %93 : vector<4x64xf32>
    %95 = arith.andi %92, %94 : vector<4x64xi1>
    %96 = arith.extui %95 : vector<4x64xi1> to vector<4x64xi32>
    %97 = arith.sitofp %96 : vector<4x64xi32> to vector<4x64xf32>
    %cst_43 = arith.constant 1.400000e+00 : f32
    %98 = vector.broadcast %cst_43 : f32 to vector<4x64xf32>
    %99 = arith.cmpf oge, %23, %98 : vector<4x64xf32>
    %cst_44 = arith.constant 1.800000e+00 : f32
    %100 = vector.broadcast %cst_44 : f32 to vector<4x64xf32>
    %101 = arith.cmpf olt, %23, %100 : vector<4x64xf32>
    %102 = arith.andi %99, %101 : vector<4x64xi1>
    %103 = arith.extui %102 : vector<4x64xi1> to vector<4x64xi32>
    %104 = arith.sitofp %103 : vector<4x64xi32> to vector<4x64xf32>
    %cst_45 = arith.constant 1.800000e+00 : f32
    %105 = vector.broadcast %cst_45 : f32 to vector<4x64xf32>
    %106 = arith.cmpf oge, %23, %105 : vector<4x64xf32>
    %cst_46 = arith.constant 2.200000e+00 : f32
    %107 = vector.broadcast %cst_46 : f32 to vector<4x64xf32>
    %108 = arith.cmpf olt, %23, %107 : vector<4x64xf32>
    %109 = arith.andi %106, %108 : vector<4x64xi1>
    %110 = arith.extui %109 : vector<4x64xi1> to vector<4x64xi32>
    %111 = arith.sitofp %110 : vector<4x64xi32> to vector<4x64xf32>
    %cst_47 = arith.constant -2.200000e+00 : f32
    %112 = vector.broadcast %cst_47 : f32 to vector<4x64xf32>
    %113 = arith.subf %23, %112 : vector<4x64xf32>
    %cst_48 = arith.constant 2.500000e+00 : f32
    %114 = vector.broadcast %cst_48 : f32 to vector<4x64xf32>
    %115 = arith.mulf %113, %114 : vector<4x64xf32>
    %116 = arith.mulf %115, %41 : vector<4x64xf32>
    %cst_49 = arith.constant -1.400000e+00 : f32
    %117 = vector.broadcast %cst_49 : f32 to vector<4x64xf32>
    %118 = arith.subf %117, %23 : vector<4x64xf32>
    %cst_50 = arith.constant 2.500000e+00 : f32
    %119 = vector.broadcast %cst_50 : f32 to vector<4x64xf32>
    %120 = arith.mulf %118, %119 : vector<4x64xf32>
    %121 = arith.mulf %120, %48 : vector<4x64xf32>
    %122 = arith.addf %116, %121 : vector<4x64xf32>
    %cst_51 = arith.constant -1.800000e+00 : f32
    %123 = vector.broadcast %cst_51 : f32 to vector<4x64xf32>
    %124 = arith.subf %23, %123 : vector<4x64xf32>
    %cst_52 = arith.constant 2.500000e+00 : f32
    %125 = vector.broadcast %cst_52 : f32 to vector<4x64xf32>
    %126 = arith.mulf %124, %125 : vector<4x64xf32>
    %127 = arith.mulf %126, %48 : vector<4x64xf32>
    %cst_53 = arith.constant -1.000000e+00 : f32
    %128 = vector.broadcast %cst_53 : f32 to vector<4x64xf32>
    %129 = arith.subf %128, %23 : vector<4x64xf32>
    %cst_54 = arith.constant 2.500000e+00 : f32
    %130 = vector.broadcast %cst_54 : f32 to vector<4x64xf32>
    %131 = arith.mulf %129, %130 : vector<4x64xf32>
    %132 = arith.mulf %131, %55 : vector<4x64xf32>
    %133 = arith.addf %127, %132 : vector<4x64xf32>
    %cst_55 = arith.constant -1.400000e+00 : f32
    %134 = vector.broadcast %cst_55 : f32 to vector<4x64xf32>
    %135 = arith.subf %23, %134 : vector<4x64xf32>
    %cst_56 = arith.constant 2.500000e+00 : f32
    %136 = vector.broadcast %cst_56 : f32 to vector<4x64xf32>
    %137 = arith.mulf %135, %136 : vector<4x64xf32>
    %138 = arith.mulf %137, %55 : vector<4x64xf32>
    %cst_57 = arith.constant -6.000000e-01 : f32
    %139 = vector.broadcast %cst_57 : f32 to vector<4x64xf32>
    %140 = arith.subf %139, %23 : vector<4x64xf32>
    %cst_58 = arith.constant 2.500000e+00 : f32
    %141 = vector.broadcast %cst_58 : f32 to vector<4x64xf32>
    %142 = arith.mulf %140, %141 : vector<4x64xf32>
    %143 = arith.mulf %142, %62 : vector<4x64xf32>
    %144 = arith.addf %138, %143 : vector<4x64xf32>
    %cst_59 = arith.constant -1.000000e+00 : f32
    %145 = vector.broadcast %cst_59 : f32 to vector<4x64xf32>
    %146 = arith.subf %23, %145 : vector<4x64xf32>
    %cst_60 = arith.constant 2.500000e+00 : f32
    %147 = vector.broadcast %cst_60 : f32 to vector<4x64xf32>
    %148 = arith.mulf %146, %147 : vector<4x64xf32>
    %149 = arith.mulf %148, %62 : vector<4x64xf32>
    %cst_61 = arith.constant -2.000000e-01 : f32
    %150 = vector.broadcast %cst_61 : f32 to vector<4x64xf32>
    %151 = arith.subf %150, %23 : vector<4x64xf32>
    %cst_62 = arith.constant 2.500000e+00 : f32
    %152 = vector.broadcast %cst_62 : f32 to vector<4x64xf32>
    %153 = arith.mulf %151, %152 : vector<4x64xf32>
    %154 = arith.mulf %153, %69 : vector<4x64xf32>
    %155 = arith.addf %149, %154 : vector<4x64xf32>
    %cst_63 = arith.constant -6.000000e-01 : f32
    %156 = vector.broadcast %cst_63 : f32 to vector<4x64xf32>
    %157 = arith.subf %23, %156 : vector<4x64xf32>
    %cst_64 = arith.constant 2.500000e+00 : f32
    %158 = vector.broadcast %cst_64 : f32 to vector<4x64xf32>
    %159 = arith.mulf %157, %158 : vector<4x64xf32>
    %160 = arith.mulf %159, %69 : vector<4x64xf32>
    %cst_65 = arith.constant 2.000000e-01 : f32
    %161 = vector.broadcast %cst_65 : f32 to vector<4x64xf32>
    %162 = arith.subf %161, %23 : vector<4x64xf32>
    %cst_66 = arith.constant 2.500000e+00 : f32
    %163 = vector.broadcast %cst_66 : f32 to vector<4x64xf32>
    %164 = arith.mulf %162, %163 : vector<4x64xf32>
    %165 = arith.mulf %164, %76 : vector<4x64xf32>
    %166 = arith.addf %160, %165 : vector<4x64xf32>
    %cst_67 = arith.constant -2.000000e-01 : f32
    %167 = vector.broadcast %cst_67 : f32 to vector<4x64xf32>
    %168 = arith.subf %23, %167 : vector<4x64xf32>
    %cst_68 = arith.constant 2.500000e+00 : f32
    %169 = vector.broadcast %cst_68 : f32 to vector<4x64xf32>
    %170 = arith.mulf %168, %169 : vector<4x64xf32>
    %171 = arith.mulf %170, %76 : vector<4x64xf32>
    %cst_69 = arith.constant 6.000000e-01 : f32
    %172 = vector.broadcast %cst_69 : f32 to vector<4x64xf32>
    %173 = arith.subf %172, %23 : vector<4x64xf32>
    %cst_70 = arith.constant 2.500000e+00 : f32
    %174 = vector.broadcast %cst_70 : f32 to vector<4x64xf32>
    %175 = arith.mulf %173, %174 : vector<4x64xf32>
    %176 = arith.mulf %175, %83 : vector<4x64xf32>
    %177 = arith.addf %171, %176 : vector<4x64xf32>
    %cst_71 = arith.constant 2.000000e-01 : f32
    %178 = vector.broadcast %cst_71 : f32 to vector<4x64xf32>
    %179 = arith.subf %23, %178 : vector<4x64xf32>
    %cst_72 = arith.constant 2.500000e+00 : f32
    %180 = vector.broadcast %cst_72 : f32 to vector<4x64xf32>
    %181 = arith.mulf %179, %180 : vector<4x64xf32>
    %182 = arith.mulf %181, %83 : vector<4x64xf32>
    %cst_73 = arith.constant 1.000000e+00 : f32
    %183 = vector.broadcast %cst_73 : f32 to vector<4x64xf32>
    %184 = arith.subf %183, %23 : vector<4x64xf32>
    %cst_74 = arith.constant 2.500000e+00 : f32
    %185 = vector.broadcast %cst_74 : f32 to vector<4x64xf32>
    %186 = arith.mulf %184, %185 : vector<4x64xf32>
    %187 = arith.mulf %186, %90 : vector<4x64xf32>
    %188 = arith.addf %182, %187 : vector<4x64xf32>
    %cst_75 = arith.constant 6.000000e-01 : f32
    %189 = vector.broadcast %cst_75 : f32 to vector<4x64xf32>
    %190 = arith.subf %23, %189 : vector<4x64xf32>
    %cst_76 = arith.constant 2.500000e+00 : f32
    %191 = vector.broadcast %cst_76 : f32 to vector<4x64xf32>
    %192 = arith.mulf %190, %191 : vector<4x64xf32>
    %193 = arith.mulf %192, %90 : vector<4x64xf32>
    %cst_77 = arith.constant 1.400000e+00 : f32
    %194 = vector.broadcast %cst_77 : f32 to vector<4x64xf32>
    %195 = arith.subf %194, %23 : vector<4x64xf32>
    %cst_78 = arith.constant 2.500000e+00 : f32
    %196 = vector.broadcast %cst_78 : f32 to vector<4x64xf32>
    %197 = arith.mulf %195, %196 : vector<4x64xf32>
    %198 = arith.mulf %197, %97 : vector<4x64xf32>
    %199 = arith.addf %193, %198 : vector<4x64xf32>
    %cst_79 = arith.constant 1.000000e+00 : f32
    %200 = vector.broadcast %cst_79 : f32 to vector<4x64xf32>
    %201 = arith.subf %23, %200 : vector<4x64xf32>
    %cst_80 = arith.constant 2.500000e+00 : f32
    %202 = vector.broadcast %cst_80 : f32 to vector<4x64xf32>
    %203 = arith.mulf %201, %202 : vector<4x64xf32>
    %204 = arith.mulf %203, %97 : vector<4x64xf32>
    %cst_81 = arith.constant 1.800000e+00 : f32
    %205 = vector.broadcast %cst_81 : f32 to vector<4x64xf32>
    %206 = arith.subf %205, %23 : vector<4x64xf32>
    %cst_82 = arith.constant 2.500000e+00 : f32
    %207 = vector.broadcast %cst_82 : f32 to vector<4x64xf32>
    %208 = arith.mulf %206, %207 : vector<4x64xf32>
    %209 = arith.mulf %208, %104 : vector<4x64xf32>
    %210 = arith.addf %204, %209 : vector<4x64xf32>
    %cst_83 = arith.constant 1.400000e+00 : f32
    %211 = vector.broadcast %cst_83 : f32 to vector<4x64xf32>
    %212 = arith.subf %23, %211 : vector<4x64xf32>
    %cst_84 = arith.constant 2.500000e+00 : f32
    %213 = vector.broadcast %cst_84 : f32 to vector<4x64xf32>
    %214 = arith.mulf %212, %213 : vector<4x64xf32>
    %215 = arith.mulf %214, %104 : vector<4x64xf32>
    %cst_85 = arith.constant 2.200000e+00 : f32
    %216 = vector.broadcast %cst_85 : f32 to vector<4x64xf32>
    %217 = arith.subf %216, %23 : vector<4x64xf32>
    %cst_86 = arith.constant 2.500000e+00 : f32
    %218 = vector.broadcast %cst_86 : f32 to vector<4x64xf32>
    %219 = arith.mulf %217, %218 : vector<4x64xf32>
    %220 = arith.mulf %219, %111 : vector<4x64xf32>
    %221 = arith.addf %215, %220 : vector<4x64xf32>
    %cst_87 = arith.constant -2.200000e+00 : f32
    %222 = vector.broadcast %cst_87 : f32 to vector<4x64xf32>
    %223 = arith.subf %23, %222 : vector<4x64xf32>
    %cst_88 = arith.constant 1.250000e+00 : f32
    %224 = vector.broadcast %cst_88 : f32 to vector<4x64xf32>
    %225 = arith.mulf %223, %224 : vector<4x64xf32>
    %226 = arith.mulf %225, %122 : vector<4x64xf32>
    %cst_89 = arith.constant -1.000000e+00 : f32
    %227 = vector.broadcast %cst_89 : f32 to vector<4x64xf32>
    %228 = arith.subf %227, %23 : vector<4x64xf32>
    %cst_90 = arith.constant 1.250000e+00 : f32
    %229 = vector.broadcast %cst_90 : f32 to vector<4x64xf32>
    %230 = arith.mulf %228, %229 : vector<4x64xf32>
    %231 = arith.mulf %230, %133 : vector<4x64xf32>
    %232 = arith.addf %226, %231 : vector<4x64xf32>
    %cst_91 = arith.constant -1.800000e+00 : f32
    %233 = vector.broadcast %cst_91 : f32 to vector<4x64xf32>
    %234 = arith.subf %23, %233 : vector<4x64xf32>
    %cst_92 = arith.constant 1.250000e+00 : f32
    %235 = vector.broadcast %cst_92 : f32 to vector<4x64xf32>
    %236 = arith.mulf %234, %235 : vector<4x64xf32>
    %237 = arith.mulf %236, %133 : vector<4x64xf32>
    %cst_93 = arith.constant -6.000000e-01 : f32
    %238 = vector.broadcast %cst_93 : f32 to vector<4x64xf32>
    %239 = arith.subf %238, %23 : vector<4x64xf32>
    %cst_94 = arith.constant 1.250000e+00 : f32
    %240 = vector.broadcast %cst_94 : f32 to vector<4x64xf32>
    %241 = arith.mulf %239, %240 : vector<4x64xf32>
    %242 = arith.mulf %241, %144 : vector<4x64xf32>
    %243 = arith.addf %237, %242 : vector<4x64xf32>
    %cst_95 = arith.constant -1.400000e+00 : f32
    %244 = vector.broadcast %cst_95 : f32 to vector<4x64xf32>
    %245 = arith.subf %23, %244 : vector<4x64xf32>
    %cst_96 = arith.constant 1.250000e+00 : f32
    %246 = vector.broadcast %cst_96 : f32 to vector<4x64xf32>
    %247 = arith.mulf %245, %246 : vector<4x64xf32>
    %248 = arith.mulf %247, %144 : vector<4x64xf32>
    %cst_97 = arith.constant -2.000000e-01 : f32
    %249 = vector.broadcast %cst_97 : f32 to vector<4x64xf32>
    %250 = arith.subf %249, %23 : vector<4x64xf32>
    %cst_98 = arith.constant 1.250000e+00 : f32
    %251 = vector.broadcast %cst_98 : f32 to vector<4x64xf32>
    %252 = arith.mulf %250, %251 : vector<4x64xf32>
    %253 = arith.mulf %252, %155 : vector<4x64xf32>
    %254 = arith.addf %248, %253 : vector<4x64xf32>
    %cst_99 = arith.constant -1.000000e+00 : f32
    %255 = vector.broadcast %cst_99 : f32 to vector<4x64xf32>
    %256 = arith.subf %23, %255 : vector<4x64xf32>
    %cst_100 = arith.constant 1.250000e+00 : f32
    %257 = vector.broadcast %cst_100 : f32 to vector<4x64xf32>
    %258 = arith.mulf %256, %257 : vector<4x64xf32>
    %259 = arith.mulf %258, %155 : vector<4x64xf32>
    %cst_101 = arith.constant 2.000000e-01 : f32
    %260 = vector.broadcast %cst_101 : f32 to vector<4x64xf32>
    %261 = arith.subf %260, %23 : vector<4x64xf32>
    %cst_102 = arith.constant 1.250000e+00 : f32
    %262 = vector.broadcast %cst_102 : f32 to vector<4x64xf32>
    %263 = arith.mulf %261, %262 : vector<4x64xf32>
    %264 = arith.mulf %263, %166 : vector<4x64xf32>
    %265 = arith.addf %259, %264 : vector<4x64xf32>
    %cst_103 = arith.constant -6.000000e-01 : f32
    %266 = vector.broadcast %cst_103 : f32 to vector<4x64xf32>
    %267 = arith.subf %23, %266 : vector<4x64xf32>
    %cst_104 = arith.constant 1.250000e+00 : f32
    %268 = vector.broadcast %cst_104 : f32 to vector<4x64xf32>
    %269 = arith.mulf %267, %268 : vector<4x64xf32>
    %270 = arith.mulf %269, %166 : vector<4x64xf32>
    %cst_105 = arith.constant 6.000000e-01 : f32
    %271 = vector.broadcast %cst_105 : f32 to vector<4x64xf32>
    %272 = arith.subf %271, %23 : vector<4x64xf32>
    %cst_106 = arith.constant 1.250000e+00 : f32
    %273 = vector.broadcast %cst_106 : f32 to vector<4x64xf32>
    %274 = arith.mulf %272, %273 : vector<4x64xf32>
    %275 = arith.mulf %274, %177 : vector<4x64xf32>
    %276 = arith.addf %270, %275 : vector<4x64xf32>
    %cst_107 = arith.constant -2.000000e-01 : f32
    %277 = vector.broadcast %cst_107 : f32 to vector<4x64xf32>
    %278 = arith.subf %23, %277 : vector<4x64xf32>
    %cst_108 = arith.constant 1.250000e+00 : f32
    %279 = vector.broadcast %cst_108 : f32 to vector<4x64xf32>
    %280 = arith.mulf %278, %279 : vector<4x64xf32>
    %281 = arith.mulf %280, %177 : vector<4x64xf32>
    %cst_109 = arith.constant 1.000000e+00 : f32
    %282 = vector.broadcast %cst_109 : f32 to vector<4x64xf32>
    %283 = arith.subf %282, %23 : vector<4x64xf32>
    %cst_110 = arith.constant 1.250000e+00 : f32
    %284 = vector.broadcast %cst_110 : f32 to vector<4x64xf32>
    %285 = arith.mulf %283, %284 : vector<4x64xf32>
    %286 = arith.mulf %285, %188 : vector<4x64xf32>
    %287 = arith.addf %281, %286 : vector<4x64xf32>
    %cst_111 = arith.constant 2.000000e-01 : f32
    %288 = vector.broadcast %cst_111 : f32 to vector<4x64xf32>
    %289 = arith.subf %23, %288 : vector<4x64xf32>
    %cst_112 = arith.constant 1.250000e+00 : f32
    %290 = vector.broadcast %cst_112 : f32 to vector<4x64xf32>
    %291 = arith.mulf %289, %290 : vector<4x64xf32>
    %292 = arith.mulf %291, %188 : vector<4x64xf32>
    %cst_113 = arith.constant 1.400000e+00 : f32
    %293 = vector.broadcast %cst_113 : f32 to vector<4x64xf32>
    %294 = arith.subf %293, %23 : vector<4x64xf32>
    %cst_114 = arith.constant 1.250000e+00 : f32
    %295 = vector.broadcast %cst_114 : f32 to vector<4x64xf32>
    %296 = arith.mulf %294, %295 : vector<4x64xf32>
    %297 = arith.mulf %296, %199 : vector<4x64xf32>
    %298 = arith.addf %292, %297 : vector<4x64xf32>
    %cst_115 = arith.constant 6.000000e-01 : f32
    %299 = vector.broadcast %cst_115 : f32 to vector<4x64xf32>
    %300 = arith.subf %23, %299 : vector<4x64xf32>
    %cst_116 = arith.constant 1.250000e+00 : f32
    %301 = vector.broadcast %cst_116 : f32 to vector<4x64xf32>
    %302 = arith.mulf %300, %301 : vector<4x64xf32>
    %303 = arith.mulf %302, %199 : vector<4x64xf32>
    %cst_117 = arith.constant 1.800000e+00 : f32
    %304 = vector.broadcast %cst_117 : f32 to vector<4x64xf32>
    %305 = arith.subf %304, %23 : vector<4x64xf32>
    %cst_118 = arith.constant 1.250000e+00 : f32
    %306 = vector.broadcast %cst_118 : f32 to vector<4x64xf32>
    %307 = arith.mulf %305, %306 : vector<4x64xf32>
    %308 = arith.mulf %307, %210 : vector<4x64xf32>
    %309 = arith.addf %303, %308 : vector<4x64xf32>
    %cst_119 = arith.constant 1.000000e+00 : f32
    %310 = vector.broadcast %cst_119 : f32 to vector<4x64xf32>
    %311 = arith.subf %23, %310 : vector<4x64xf32>
    %cst_120 = arith.constant 1.250000e+00 : f32
    %312 = vector.broadcast %cst_120 : f32 to vector<4x64xf32>
    %313 = arith.mulf %311, %312 : vector<4x64xf32>
    %314 = arith.mulf %313, %210 : vector<4x64xf32>
    %cst_121 = arith.constant 2.200000e+00 : f32
    %315 = vector.broadcast %cst_121 : f32 to vector<4x64xf32>
    %316 = arith.subf %315, %23 : vector<4x64xf32>
    %cst_122 = arith.constant 1.250000e+00 : f32
    %317 = vector.broadcast %cst_122 : f32 to vector<4x64xf32>
    %318 = arith.mulf %316, %317 : vector<4x64xf32>
    %319 = arith.mulf %318, %221 : vector<4x64xf32>
    %320 = arith.addf %314, %319 : vector<4x64xf32>
    %cst_123 = arith.constant -2.200000e+00 : f32
    %321 = vector.broadcast %cst_123 : f32 to vector<4x64xf32>
    %322 = arith.subf %23, %321 : vector<4x64xf32>
    %cst_124 = arith.constant 0.833333313 : f32
    %323 = vector.broadcast %cst_124 : f32 to vector<4x64xf32>
    %324 = arith.mulf %322, %323 : vector<4x64xf32>
    %325 = arith.mulf %324, %232 : vector<4x64xf32>
    %cst_125 = arith.constant -6.000000e-01 : f32
    %326 = vector.broadcast %cst_125 : f32 to vector<4x64xf32>
    %327 = arith.subf %326, %23 : vector<4x64xf32>
    %cst_126 = arith.constant 0.833333313 : f32
    %328 = vector.broadcast %cst_126 : f32 to vector<4x64xf32>
    %329 = arith.mulf %327, %328 : vector<4x64xf32>
    %330 = arith.mulf %329, %243 : vector<4x64xf32>
    %331 = arith.addf %325, %330 : vector<4x64xf32>
    %cst_127 = arith.constant -1.800000e+00 : f32
    %332 = vector.broadcast %cst_127 : f32 to vector<4x64xf32>
    %333 = arith.subf %23, %332 : vector<4x64xf32>
    %cst_128 = arith.constant 0.833333313 : f32
    %334 = vector.broadcast %cst_128 : f32 to vector<4x64xf32>
    %335 = arith.mulf %333, %334 : vector<4x64xf32>
    %336 = arith.mulf %335, %243 : vector<4x64xf32>
    %cst_129 = arith.constant -2.000000e-01 : f32
    %337 = vector.broadcast %cst_129 : f32 to vector<4x64xf32>
    %338 = arith.subf %337, %23 : vector<4x64xf32>
    %cst_130 = arith.constant 0.833333313 : f32
    %339 = vector.broadcast %cst_130 : f32 to vector<4x64xf32>
    %340 = arith.mulf %338, %339 : vector<4x64xf32>
    %341 = arith.mulf %340, %254 : vector<4x64xf32>
    %342 = arith.addf %336, %341 : vector<4x64xf32>
    %cst_131 = arith.constant -1.400000e+00 : f32
    %343 = vector.broadcast %cst_131 : f32 to vector<4x64xf32>
    %344 = arith.subf %23, %343 : vector<4x64xf32>
    %cst_132 = arith.constant 0.833333313 : f32
    %345 = vector.broadcast %cst_132 : f32 to vector<4x64xf32>
    %346 = arith.mulf %344, %345 : vector<4x64xf32>
    %347 = arith.mulf %346, %254 : vector<4x64xf32>
    %cst_133 = arith.constant 2.000000e-01 : f32
    %348 = vector.broadcast %cst_133 : f32 to vector<4x64xf32>
    %349 = arith.subf %348, %23 : vector<4x64xf32>
    %cst_134 = arith.constant 0.833333313 : f32
    %350 = vector.broadcast %cst_134 : f32 to vector<4x64xf32>
    %351 = arith.mulf %349, %350 : vector<4x64xf32>
    %352 = arith.mulf %351, %265 : vector<4x64xf32>
    %353 = arith.addf %347, %352 : vector<4x64xf32>
    %cst_135 = arith.constant -1.000000e+00 : f32
    %354 = vector.broadcast %cst_135 : f32 to vector<4x64xf32>
    %355 = arith.subf %23, %354 : vector<4x64xf32>
    %cst_136 = arith.constant 0.833333313 : f32
    %356 = vector.broadcast %cst_136 : f32 to vector<4x64xf32>
    %357 = arith.mulf %355, %356 : vector<4x64xf32>
    %358 = arith.mulf %357, %265 : vector<4x64xf32>
    %cst_137 = arith.constant 6.000000e-01 : f32
    %359 = vector.broadcast %cst_137 : f32 to vector<4x64xf32>
    %360 = arith.subf %359, %23 : vector<4x64xf32>
    %cst_138 = arith.constant 0.833333313 : f32
    %361 = vector.broadcast %cst_138 : f32 to vector<4x64xf32>
    %362 = arith.mulf %360, %361 : vector<4x64xf32>
    %363 = arith.mulf %362, %276 : vector<4x64xf32>
    %364 = arith.addf %358, %363 : vector<4x64xf32>
    %cst_139 = arith.constant -6.000000e-01 : f32
    %365 = vector.broadcast %cst_139 : f32 to vector<4x64xf32>
    %366 = arith.subf %23, %365 : vector<4x64xf32>
    %cst_140 = arith.constant 0.833333313 : f32
    %367 = vector.broadcast %cst_140 : f32 to vector<4x64xf32>
    %368 = arith.mulf %366, %367 : vector<4x64xf32>
    %369 = arith.mulf %368, %276 : vector<4x64xf32>
    %cst_141 = arith.constant 1.000000e+00 : f32
    %370 = vector.broadcast %cst_141 : f32 to vector<4x64xf32>
    %371 = arith.subf %370, %23 : vector<4x64xf32>
    %cst_142 = arith.constant 0.833333313 : f32
    %372 = vector.broadcast %cst_142 : f32 to vector<4x64xf32>
    %373 = arith.mulf %371, %372 : vector<4x64xf32>
    %374 = arith.mulf %373, %287 : vector<4x64xf32>
    %375 = arith.addf %369, %374 : vector<4x64xf32>
    %cst_143 = arith.constant -2.000000e-01 : f32
    %376 = vector.broadcast %cst_143 : f32 to vector<4x64xf32>
    %377 = arith.subf %23, %376 : vector<4x64xf32>
    %cst_144 = arith.constant 0.833333313 : f32
    %378 = vector.broadcast %cst_144 : f32 to vector<4x64xf32>
    %379 = arith.mulf %377, %378 : vector<4x64xf32>
    %380 = arith.mulf %379, %287 : vector<4x64xf32>
    %cst_145 = arith.constant 1.400000e+00 : f32
    %381 = vector.broadcast %cst_145 : f32 to vector<4x64xf32>
    %382 = arith.subf %381, %23 : vector<4x64xf32>
    %cst_146 = arith.constant 0.833333313 : f32
    %383 = vector.broadcast %cst_146 : f32 to vector<4x64xf32>
    %384 = arith.mulf %382, %383 : vector<4x64xf32>
    %385 = arith.mulf %384, %298 : vector<4x64xf32>
    %386 = arith.addf %380, %385 : vector<4x64xf32>
    %cst_147 = arith.constant 2.000000e-01 : f32
    %387 = vector.broadcast %cst_147 : f32 to vector<4x64xf32>
    %388 = arith.subf %23, %387 : vector<4x64xf32>
    %cst_148 = arith.constant 0.833333313 : f32
    %389 = vector.broadcast %cst_148 : f32 to vector<4x64xf32>
    %390 = arith.mulf %388, %389 : vector<4x64xf32>
    %391 = arith.mulf %390, %298 : vector<4x64xf32>
    %cst_149 = arith.constant 1.800000e+00 : f32
    %392 = vector.broadcast %cst_149 : f32 to vector<4x64xf32>
    %393 = arith.subf %392, %23 : vector<4x64xf32>
    %cst_150 = arith.constant 0.833333313 : f32
    %394 = vector.broadcast %cst_150 : f32 to vector<4x64xf32>
    %395 = arith.mulf %393, %394 : vector<4x64xf32>
    %396 = arith.mulf %395, %309 : vector<4x64xf32>
    %397 = arith.addf %391, %396 : vector<4x64xf32>
    %cst_151 = arith.constant 6.000000e-01 : f32
    %398 = vector.broadcast %cst_151 : f32 to vector<4x64xf32>
    %399 = arith.subf %23, %398 : vector<4x64xf32>
    %cst_152 = arith.constant 0.833333313 : f32
    %400 = vector.broadcast %cst_152 : f32 to vector<4x64xf32>
    %401 = arith.mulf %399, %400 : vector<4x64xf32>
    %402 = arith.mulf %401, %309 : vector<4x64xf32>
    %cst_153 = arith.constant 2.200000e+00 : f32
    %403 = vector.broadcast %cst_153 : f32 to vector<4x64xf32>
    %404 = arith.subf %403, %23 : vector<4x64xf32>
    %cst_154 = arith.constant 0.833333313 : f32
    %405 = vector.broadcast %cst_154 : f32 to vector<4x64xf32>
    %406 = arith.mulf %404, %405 : vector<4x64xf32>
    %407 = arith.mulf %406, %320 : vector<4x64xf32>
    %408 = arith.addf %402, %407 : vector<4x64xf32>
    %409 = vector.shape_cast %331 : vector<4x64xf32> to vector<1x4x64xf32>
    %410 = vector.shape_cast %342 : vector<4x64xf32> to vector<1x4x64xf32>
    %411 = vector.shape_cast %353 : vector<4x64xf32> to vector<1x4x64xf32>
    %412 = vector.shape_cast %364 : vector<4x64xf32> to vector<1x4x64xf32>
    %413 = vector.shape_cast %375 : vector<4x64xf32> to vector<1x4x64xf32>
    %414 = vector.shape_cast %386 : vector<4x64xf32> to vector<1x4x64xf32>
    %415 = vector.shape_cast %397 : vector<4x64xf32> to vector<1x4x64xf32>
    %416 = vector.shape_cast %408 : vector<4x64xf32> to vector<1x4x64xf32>
    %417 = tpu.concatenate %409, %410, %411, %412, %413, %414, %415, %416 in 0 : vector<1x4x64xf32>, vector<1x4x64xf32>, vector<1x4x64xf32>, vector<1x4x64xf32>, vector<1x4x64xf32>, vector<1x4x64xf32>, vector<1x4x64xf32>, vector<1x4x64xf32> -> vector<8x4x64xf32>
    "tpu.trace_start"() <{level = 10 : i32, message = "jbi,jio->jbo"}> : () -> ()
    %cst_155 = arith.constant dense<0.000000e+00> : vector<8x4x32xf32>
    %418 = tpu.matmul %417, %25, %cst_155 {dimension_numbers = #tpu.dot_dimension_numbers<[2], [1], [1], [2], [0, 0, 0, 1, 1, 2], [0], [0]>} : vector<8x4x64xf32>, vector<8x64x32xf32>, vector<8x4x32xf32> -> vector<8x4x32xf32>
    "tpu.trace_stop"() : () -> ()
    %cst_156 = arith.constant dense<0.000000e+00> : vector<4x32xf32>
    %419 = vector.multi_reduction <add>, %418, %cst_156 [0] : vector<8x4x32xf32> to vector<4x32xf32>
    %420 = arith.addf %34, %419 : vector<4x32xf32>
    %c0_157 = arith.constant 0 : index
    %c0_158 = arith.constant 0 : index
    %421 = vector.load %arg10[%c0_157, %c0_158] : memref<32x8xf32, #tpu.memory_space<vmem>>, vector<32x8xf32>
    %c0_159 = arith.constant 0 : index
    %c0_160 = arith.constant 0 : index
    %c0_161 = arith.constant 0 : index
    %422 = vector.load %arg11[%c0_159, %c0_160, %c0_161] : memref<8x32x8xf32, #tpu.memory_space<vmem>>, vector<8x32x8xf32>
    %cst_162 = arith.constant 0.000000e+00 : f32
    %423 = vector.broadcast %cst_162 : f32 to vector<4x32xf32>
    %424 = arith.subf %423, %420 : vector<4x32xf32>
    %425 = math.exp %424 : vector<4x32xf32>
    %cst_163 = arith.constant 1.000000e+00 : f32
    %426 = vector.broadcast %cst_163 : f32 to vector<4x32xf32>
    %427 = arith.addf %426, %425 : vector<4x32xf32>
    %cst_164 = arith.constant 1.000000e+00 : f32
    %428 = vector.broadcast %cst_164 : f32 to vector<4x32xf32>
    %429 = arith.divf %428, %427 : vector<4x32xf32>
    %430 = arith.mulf %420, %429 : vector<4x32xf32>
    %cst_165 = arith.constant dense<0.000000e+00> : vector<4x8xf32>
    %431 = tpu.matmul %430, %421, %cst_165 {dimension_numbers = #tpu.dot_dimension_numbers<[1], [0], [0], [1], [0, 0, 1, 1], [], []>} : vector<4x32xf32>, vector<32x8xf32>, vector<4x8xf32> -> vector<4x8xf32>
    %cst_166 = arith.constant -2.200000e+00 : f32
    %432 = vector.broadcast %cst_166 : f32 to vector<4x32xf32>
    %433 = arith.cmpf oge, %420, %432 : vector<4x32xf32>
    %cst_167 = arith.constant -1.800000e+00 : f32
    %434 = vector.broadcast %cst_167 : f32 to vector<4x32xf32>
    %435 = arith.cmpf olt, %420, %434 : vector<4x32xf32>
    %436 = arith.andi %433, %435 : vector<4x32xi1>
    %437 = arith.extui %436 : vector<4x32xi1> to vector<4x32xi32>
    %438 = arith.sitofp %437 : vector<4x32xi32> to vector<4x32xf32>
    %cst_168 = arith.constant -1.800000e+00 : f32
    %439 = vector.broadcast %cst_168 : f32 to vector<4x32xf32>
    %440 = arith.cmpf oge, %420, %439 : vector<4x32xf32>
    %cst_169 = arith.constant -1.400000e+00 : f32
    %441 = vector.broadcast %cst_169 : f32 to vector<4x32xf32>
    %442 = arith.cmpf olt, %420, %441 : vector<4x32xf32>
    %443 = arith.andi %440, %442 : vector<4x32xi1>
    %444 = arith.extui %443 : vector<4x32xi1> to vector<4x32xi32>
    %445 = arith.sitofp %444 : vector<4x32xi32> to vector<4x32xf32>
    %cst_170 = arith.constant -1.400000e+00 : f32
    %446 = vector.broadcast %cst_170 : f32 to vector<4x32xf32>
    %447 = arith.cmpf oge, %420, %446 : vector<4x32xf32>
    %cst_171 = arith.constant -1.000000e+00 : f32
    %448 = vector.broadcast %cst_171 : f32 to vector<4x32xf32>
    %449 = arith.cmpf olt, %420, %448 : vector<4x32xf32>
    %450 = arith.andi %447, %449 : vector<4x32xi1>
    %451 = arith.extui %450 : vector<4x32xi1> to vector<4x32xi32>
    %452 = arith.sitofp %451 : vector<4x32xi32> to vector<4x32xf32>
    %cst_172 = arith.constant -1.000000e+00 : f32
    %453 = vector.broadcast %cst_172 : f32 to vector<4x32xf32>
    %454 = arith.cmpf oge, %420, %453 : vector<4x32xf32>
    %cst_173 = arith.constant -6.000000e-01 : f32
    %455 = vector.broadcast %cst_173 : f32 to vector<4x32xf32>
    %456 = arith.cmpf olt, %420, %455 : vector<4x32xf32>
    %457 = arith.andi %454, %456 : vector<4x32xi1>
    %458 = arith.extui %457 : vector<4x32xi1> to vector<4x32xi32>
    %459 = arith.sitofp %458 : vector<4x32xi32> to vector<4x32xf32>
    %cst_174 = arith.constant -6.000000e-01 : f32
    %460 = vector.broadcast %cst_174 : f32 to vector<4x32xf32>
    %461 = arith.cmpf oge, %420, %460 : vector<4x32xf32>
    %cst_175 = arith.constant -2.000000e-01 : f32
    %462 = vector.broadcast %cst_175 : f32 to vector<4x32xf32>
    %463 = arith.cmpf olt, %420, %462 : vector<4x32xf32>
    %464 = arith.andi %461, %463 : vector<4x32xi1>
    %465 = arith.extui %464 : vector<4x32xi1> to vector<4x32xi32>
    %466 = arith.sitofp %465 : vector<4x32xi32> to vector<4x32xf32>
    %cst_176 = arith.constant -2.000000e-01 : f32
    %467 = vector.broadcast %cst_176 : f32 to vector<4x32xf32>
    %468 = arith.cmpf oge, %420, %467 : vector<4x32xf32>
    %cst_177 = arith.constant 2.000000e-01 : f32
    %469 = vector.broadcast %cst_177 : f32 to vector<4x32xf32>
    %470 = arith.cmpf olt, %420, %469 : vector<4x32xf32>
    %471 = arith.andi %468, %470 : vector<4x32xi1>
    %472 = arith.extui %471 : vector<4x32xi1> to vector<4x32xi32>
    %473 = arith.sitofp %472 : vector<4x32xi32> to vector<4x32xf32>
    %cst_178 = arith.constant 2.000000e-01 : f32
    %474 = vector.broadcast %cst_178 : f32 to vector<4x32xf32>
    %475 = arith.cmpf oge, %420, %474 : vector<4x32xf32>
    %cst_179 = arith.constant 6.000000e-01 : f32
    %476 = vector.broadcast %cst_179 : f32 to vector<4x32xf32>
    %477 = arith.cmpf olt, %420, %476 : vector<4x32xf32>
    %478 = arith.andi %475, %477 : vector<4x32xi1>
    %479 = arith.extui %478 : vector<4x32xi1> to vector<4x32xi32>
    %480 = arith.sitofp %479 : vector<4x32xi32> to vector<4x32xf32>
    %cst_180 = arith.constant 6.000000e-01 : f32
    %481 = vector.broadcast %cst_180 : f32 to vector<4x32xf32>
    %482 = arith.cmpf oge, %420, %481 : vector<4x32xf32>
    %cst_181 = arith.constant 1.000000e+00 : f32
    %483 = vector.broadcast %cst_181 : f32 to vector<4x32xf32>
    %484 = arith.cmpf olt, %420, %483 : vector<4x32xf32>
    %485 = arith.andi %482, %484 : vector<4x32xi1>
    %486 = arith.extui %485 : vector<4x32xi1> to vector<4x32xi32>
    %487 = arith.sitofp %486 : vector<4x32xi32> to vector<4x32xf32>
    %cst_182 = arith.constant 1.000000e+00 : f32
    %488 = vector.broadcast %cst_182 : f32 to vector<4x32xf32>
    %489 = arith.cmpf oge, %420, %488 : vector<4x32xf32>
    %cst_183 = arith.constant 1.400000e+00 : f32
    %490 = vector.broadcast %cst_183 : f32 to vector<4x32xf32>
    %491 = arith.cmpf olt, %420, %490 : vector<4x32xf32>
    %492 = arith.andi %489, %491 : vector<4x32xi1>
    %493 = arith.extui %492 : vector<4x32xi1> to vector<4x32xi32>
    %494 = arith.sitofp %493 : vector<4x32xi32> to vector<4x32xf32>
    %cst_184 = arith.constant 1.400000e+00 : f32
    %495 = vector.broadcast %cst_184 : f32 to vector<4x32xf32>
    %496 = arith.cmpf oge, %420, %495 : vector<4x32xf32>
    %cst_185 = arith.constant 1.800000e+00 : f32
    %497 = vector.broadcast %cst_185 : f32 to vector<4x32xf32>
    %498 = arith.cmpf olt, %420, %497 : vector<4x32xf32>
    %499 = arith.andi %496, %498 : vector<4x32xi1>
    %500 = arith.extui %499 : vector<4x32xi1> to vector<4x32xi32>
    %501 = arith.sitofp %500 : vector<4x32xi32> to vector<4x32xf32>
    %cst_186 = arith.constant 1.800000e+00 : f32
    %502 = vector.broadcast %cst_186 : f32 to vector<4x32xf32>
    %503 = arith.cmpf oge, %420, %502 : vector<4x32xf32>
    %cst_187 = arith.constant 2.200000e+00 : f32
    %504 = vector.broadcast %cst_187 : f32 to vector<4x32xf32>
    %505 = arith.cmpf olt, %420, %504 : vector<4x32xf32>
    %506 = arith.andi %503, %505 : vector<4x32xi1>
    %507 = arith.extui %506 : vector<4x32xi1> to vector<4x32xi32>
    %508 = arith.sitofp %507 : vector<4x32xi32> to vector<4x32xf32>
    %cst_188 = arith.constant -2.200000e+00 : f32
    %509 = vector.broadcast %cst_188 : f32 to vector<4x32xf32>
    %510 = arith.subf %420, %509 : vector<4x32xf32>
    %cst_189 = arith.constant 2.500000e+00 : f32
    %511 = vector.broadcast %cst_189 : f32 to vector<4x32xf32>
    %512 = arith.mulf %510, %511 : vector<4x32xf32>
    %513 = arith.mulf %512, %438 : vector<4x32xf32>
    %cst_190 = arith.constant -1.400000e+00 : f32
    %514 = vector.broadcast %cst_190 : f32 to vector<4x32xf32>
    %515 = arith.subf %514, %420 : vector<4x32xf32>
    %cst_191 = arith.constant 2.500000e+00 : f32
    %516 = vector.broadcast %cst_191 : f32 to vector<4x32xf32>
    %517 = arith.mulf %515, %516 : vector<4x32xf32>
    %518 = arith.mulf %517, %445 : vector<4x32xf32>
    %519 = arith.addf %513, %518 : vector<4x32xf32>
    %cst_192 = arith.constant -1.800000e+00 : f32
    %520 = vector.broadcast %cst_192 : f32 to vector<4x32xf32>
    %521 = arith.subf %420, %520 : vector<4x32xf32>
    %cst_193 = arith.constant 2.500000e+00 : f32
    %522 = vector.broadcast %cst_193 : f32 to vector<4x32xf32>
    %523 = arith.mulf %521, %522 : vector<4x32xf32>
    %524 = arith.mulf %523, %445 : vector<4x32xf32>
    %cst_194 = arith.constant -1.000000e+00 : f32
    %525 = vector.broadcast %cst_194 : f32 to vector<4x32xf32>
    %526 = arith.subf %525, %420 : vector<4x32xf32>
    %cst_195 = arith.constant 2.500000e+00 : f32
    %527 = vector.broadcast %cst_195 : f32 to vector<4x32xf32>
    %528 = arith.mulf %526, %527 : vector<4x32xf32>
    %529 = arith.mulf %528, %452 : vector<4x32xf32>
    %530 = arith.addf %524, %529 : vector<4x32xf32>
    %cst_196 = arith.constant -1.400000e+00 : f32
    %531 = vector.broadcast %cst_196 : f32 to vector<4x32xf32>
    %532 = arith.subf %420, %531 : vector<4x32xf32>
    %cst_197 = arith.constant 2.500000e+00 : f32
    %533 = vector.broadcast %cst_197 : f32 to vector<4x32xf32>
    %534 = arith.mulf %532, %533 : vector<4x32xf32>
    %535 = arith.mulf %534, %452 : vector<4x32xf32>
    %cst_198 = arith.constant -6.000000e-01 : f32
    %536 = vector.broadcast %cst_198 : f32 to vector<4x32xf32>
    %537 = arith.subf %536, %420 : vector<4x32xf32>
    %cst_199 = arith.constant 2.500000e+00 : f32
    %538 = vector.broadcast %cst_199 : f32 to vector<4x32xf32>
    %539 = arith.mulf %537, %538 : vector<4x32xf32>
    %540 = arith.mulf %539, %459 : vector<4x32xf32>
    %541 = arith.addf %535, %540 : vector<4x32xf32>
    %cst_200 = arith.constant -1.000000e+00 : f32
    %542 = vector.broadcast %cst_200 : f32 to vector<4x32xf32>
    %543 = arith.subf %420, %542 : vector<4x32xf32>
    %cst_201 = arith.constant 2.500000e+00 : f32
    %544 = vector.broadcast %cst_201 : f32 to vector<4x32xf32>
    %545 = arith.mulf %543, %544 : vector<4x32xf32>
    %546 = arith.mulf %545, %459 : vector<4x32xf32>
    %cst_202 = arith.constant -2.000000e-01 : f32
    %547 = vector.broadcast %cst_202 : f32 to vector<4x32xf32>
    %548 = arith.subf %547, %420 : vector<4x32xf32>
    %cst_203 = arith.constant 2.500000e+00 : f32
    %549 = vector.broadcast %cst_203 : f32 to vector<4x32xf32>
    %550 = arith.mulf %548, %549 : vector<4x32xf32>
    %551 = arith.mulf %550, %466 : vector<4x32xf32>
    %552 = arith.addf %546, %551 : vector<4x32xf32>
    %cst_204 = arith.constant -6.000000e-01 : f32
    %553 = vector.broadcast %cst_204 : f32 to vector<4x32xf32>
    %554 = arith.subf %420, %553 : vector<4x32xf32>
    %cst_205 = arith.constant 2.500000e+00 : f32
    %555 = vector.broadcast %cst_205 : f32 to vector<4x32xf32>
    %556 = arith.mulf %554, %555 : vector<4x32xf32>
    %557 = arith.mulf %556, %466 : vector<4x32xf32>
    %cst_206 = arith.constant 2.000000e-01 : f32
    %558 = vector.broadcast %cst_206 : f32 to vector<4x32xf32>
    %559 = arith.subf %558, %420 : vector<4x32xf32>
    %cst_207 = arith.constant 2.500000e+00 : f32
    %560 = vector.broadcast %cst_207 : f32 to vector<4x32xf32>
    %561 = arith.mulf %559, %560 : vector<4x32xf32>
    %562 = arith.mulf %561, %473 : vector<4x32xf32>
    %563 = arith.addf %557, %562 : vector<4x32xf32>
    %cst_208 = arith.constant -2.000000e-01 : f32
    %564 = vector.broadcast %cst_208 : f32 to vector<4x32xf32>
    %565 = arith.subf %420, %564 : vector<4x32xf32>
    %cst_209 = arith.constant 2.500000e+00 : f32
    %566 = vector.broadcast %cst_209 : f32 to vector<4x32xf32>
    %567 = arith.mulf %565, %566 : vector<4x32xf32>
    %568 = arith.mulf %567, %473 : vector<4x32xf32>
    %cst_210 = arith.constant 6.000000e-01 : f32
    %569 = vector.broadcast %cst_210 : f32 to vector<4x32xf32>
    %570 = arith.subf %569, %420 : vector<4x32xf32>
    %cst_211 = arith.constant 2.500000e+00 : f32
    %571 = vector.broadcast %cst_211 : f32 to vector<4x32xf32>
    %572 = arith.mulf %570, %571 : vector<4x32xf32>
    %573 = arith.mulf %572, %480 : vector<4x32xf32>
    %574 = arith.addf %568, %573 : vector<4x32xf32>
    %cst_212 = arith.constant 2.000000e-01 : f32
    %575 = vector.broadcast %cst_212 : f32 to vector<4x32xf32>
    %576 = arith.subf %420, %575 : vector<4x32xf32>
    %cst_213 = arith.constant 2.500000e+00 : f32
    %577 = vector.broadcast %cst_213 : f32 to vector<4x32xf32>
    %578 = arith.mulf %576, %577 : vector<4x32xf32>
    %579 = arith.mulf %578, %480 : vector<4x32xf32>
    %cst_214 = arith.constant 1.000000e+00 : f32
    %580 = vector.broadcast %cst_214 : f32 to vector<4x32xf32>
    %581 = arith.subf %580, %420 : vector<4x32xf32>
    %cst_215 = arith.constant 2.500000e+00 : f32
    %582 = vector.broadcast %cst_215 : f32 to vector<4x32xf32>
    %583 = arith.mulf %581, %582 : vector<4x32xf32>
    %584 = arith.mulf %583, %487 : vector<4x32xf32>
    %585 = arith.addf %579, %584 : vector<4x32xf32>
    %cst_216 = arith.constant 6.000000e-01 : f32
    %586 = vector.broadcast %cst_216 : f32 to vector<4x32xf32>
    %587 = arith.subf %420, %586 : vector<4x32xf32>
    %cst_217 = arith.constant 2.500000e+00 : f32
    %588 = vector.broadcast %cst_217 : f32 to vector<4x32xf32>
    %589 = arith.mulf %587, %588 : vector<4x32xf32>
    %590 = arith.mulf %589, %487 : vector<4x32xf32>
    %cst_218 = arith.constant 1.400000e+00 : f32
    %591 = vector.broadcast %cst_218 : f32 to vector<4x32xf32>
    %592 = arith.subf %591, %420 : vector<4x32xf32>
    %cst_219 = arith.constant 2.500000e+00 : f32
    %593 = vector.broadcast %cst_219 : f32 to vector<4x32xf32>
    %594 = arith.mulf %592, %593 : vector<4x32xf32>
    %595 = arith.mulf %594, %494 : vector<4x32xf32>
    %596 = arith.addf %590, %595 : vector<4x32xf32>
    %cst_220 = arith.constant 1.000000e+00 : f32
    %597 = vector.broadcast %cst_220 : f32 to vector<4x32xf32>
    %598 = arith.subf %420, %597 : vector<4x32xf32>
    %cst_221 = arith.constant 2.500000e+00 : f32
    %599 = vector.broadcast %cst_221 : f32 to vector<4x32xf32>
    %600 = arith.mulf %598, %599 : vector<4x32xf32>
    %601 = arith.mulf %600, %494 : vector<4x32xf32>
    %cst_222 = arith.constant 1.800000e+00 : f32
    %602 = vector.broadcast %cst_222 : f32 to vector<4x32xf32>
    %603 = arith.subf %602, %420 : vector<4x32xf32>
    %cst_223 = arith.constant 2.500000e+00 : f32
    %604 = vector.broadcast %cst_223 : f32 to vector<4x32xf32>
    %605 = arith.mulf %603, %604 : vector<4x32xf32>
    %606 = arith.mulf %605, %501 : vector<4x32xf32>
    %607 = arith.addf %601, %606 : vector<4x32xf32>
    %cst_224 = arith.constant 1.400000e+00 : f32
    %608 = vector.broadcast %cst_224 : f32 to vector<4x32xf32>
    %609 = arith.subf %420, %608 : vector<4x32xf32>
    %cst_225 = arith.constant 2.500000e+00 : f32
    %610 = vector.broadcast %cst_225 : f32 to vector<4x32xf32>
    %611 = arith.mulf %609, %610 : vector<4x32xf32>
    %612 = arith.mulf %611, %501 : vector<4x32xf32>
    %cst_226 = arith.constant 2.200000e+00 : f32
    %613 = vector.broadcast %cst_226 : f32 to vector<4x32xf32>
    %614 = arith.subf %613, %420 : vector<4x32xf32>
    %cst_227 = arith.constant 2.500000e+00 : f32
    %615 = vector.broadcast %cst_227 : f32 to vector<4x32xf32>
    %616 = arith.mulf %614, %615 : vector<4x32xf32>
    %617 = arith.mulf %616, %508 : vector<4x32xf32>
    %618 = arith.addf %612, %617 : vector<4x32xf32>
    %cst_228 = arith.constant -2.200000e+00 : f32
    %619 = vector.broadcast %cst_228 : f32 to vector<4x32xf32>
    %620 = arith.subf %420, %619 : vector<4x32xf32>
    %cst_229 = arith.constant 1.250000e+00 : f32
    %621 = vector.broadcast %cst_229 : f32 to vector<4x32xf32>
    %622 = arith.mulf %620, %621 : vector<4x32xf32>
    %623 = arith.mulf %622, %519 : vector<4x32xf32>
    %cst_230 = arith.constant -1.000000e+00 : f32
    %624 = vector.broadcast %cst_230 : f32 to vector<4x32xf32>
    %625 = arith.subf %624, %420 : vector<4x32xf32>
    %cst_231 = arith.constant 1.250000e+00 : f32
    %626 = vector.broadcast %cst_231 : f32 to vector<4x32xf32>
    %627 = arith.mulf %625, %626 : vector<4x32xf32>
    %628 = arith.mulf %627, %530 : vector<4x32xf32>
    %629 = arith.addf %623, %628 : vector<4x32xf32>
    %cst_232 = arith.constant -1.800000e+00 : f32
    %630 = vector.broadcast %cst_232 : f32 to vector<4x32xf32>
    %631 = arith.subf %420, %630 : vector<4x32xf32>
    %cst_233 = arith.constant 1.250000e+00 : f32
    %632 = vector.broadcast %cst_233 : f32 to vector<4x32xf32>
    %633 = arith.mulf %631, %632 : vector<4x32xf32>
    %634 = arith.mulf %633, %530 : vector<4x32xf32>
    %cst_234 = arith.constant -6.000000e-01 : f32
    %635 = vector.broadcast %cst_234 : f32 to vector<4x32xf32>
    %636 = arith.subf %635, %420 : vector<4x32xf32>
    %cst_235 = arith.constant 1.250000e+00 : f32
    %637 = vector.broadcast %cst_235 : f32 to vector<4x32xf32>
    %638 = arith.mulf %636, %637 : vector<4x32xf32>
    %639 = arith.mulf %638, %541 : vector<4x32xf32>
    %640 = arith.addf %634, %639 : vector<4x32xf32>
    %cst_236 = arith.constant -1.400000e+00 : f32
    %641 = vector.broadcast %cst_236 : f32 to vector<4x32xf32>
    %642 = arith.subf %420, %641 : vector<4x32xf32>
    %cst_237 = arith.constant 1.250000e+00 : f32
    %643 = vector.broadcast %cst_237 : f32 to vector<4x32xf32>
    %644 = arith.mulf %642, %643 : vector<4x32xf32>
    %645 = arith.mulf %644, %541 : vector<4x32xf32>
    %cst_238 = arith.constant -2.000000e-01 : f32
    %646 = vector.broadcast %cst_238 : f32 to vector<4x32xf32>
    %647 = arith.subf %646, %420 : vector<4x32xf32>
    %cst_239 = arith.constant 1.250000e+00 : f32
    %648 = vector.broadcast %cst_239 : f32 to vector<4x32xf32>
    %649 = arith.mulf %647, %648 : vector<4x32xf32>
    %650 = arith.mulf %649, %552 : vector<4x32xf32>
    %651 = arith.addf %645, %650 : vector<4x32xf32>
    %cst_240 = arith.constant -1.000000e+00 : f32
    %652 = vector.broadcast %cst_240 : f32 to vector<4x32xf32>
    %653 = arith.subf %420, %652 : vector<4x32xf32>
    %cst_241 = arith.constant 1.250000e+00 : f32
    %654 = vector.broadcast %cst_241 : f32 to vector<4x32xf32>
    %655 = arith.mulf %653, %654 : vector<4x32xf32>
    %656 = arith.mulf %655, %552 : vector<4x32xf32>
    %cst_242 = arith.constant 2.000000e-01 : f32
    %657 = vector.broadcast %cst_242 : f32 to vector<4x32xf32>
    %658 = arith.subf %657, %420 : vector<4x32xf32>
    %cst_243 = arith.constant 1.250000e+00 : f32
    %659 = vector.broadcast %cst_243 : f32 to vector<4x32xf32>
    %660 = arith.mulf %658, %659 : vector<4x32xf32>
    %661 = arith.mulf %660, %563 : vector<4x32xf32>
    %662 = arith.addf %656, %661 : vector<4x32xf32>
    %cst_244 = arith.constant -6.000000e-01 : f32
    %663 = vector.broadcast %cst_244 : f32 to vector<4x32xf32>
    %664 = arith.subf %420, %663 : vector<4x32xf32>
    %cst_245 = arith.constant 1.250000e+00 : f32
    %665 = vector.broadcast %cst_245 : f32 to vector<4x32xf32>
    %666 = arith.mulf %664, %665 : vector<4x32xf32>
    %667 = arith.mulf %666, %563 : vector<4x32xf32>
    %cst_246 = arith.constant 6.000000e-01 : f32
    %668 = vector.broadcast %cst_246 : f32 to vector<4x32xf32>
    %669 = arith.subf %668, %420 : vector<4x32xf32>
    %cst_247 = arith.constant 1.250000e+00 : f32
    %670 = vector.broadcast %cst_247 : f32 to vector<4x32xf32>
    %671 = arith.mulf %669, %670 : vector<4x32xf32>
    %672 = arith.mulf %671, %574 : vector<4x32xf32>
    %673 = arith.addf %667, %672 : vector<4x32xf32>
    %cst_248 = arith.constant -2.000000e-01 : f32
    %674 = vector.broadcast %cst_248 : f32 to vector<4x32xf32>
    %675 = arith.subf %420, %674 : vector<4x32xf32>
    %cst_249 = arith.constant 1.250000e+00 : f32
    %676 = vector.broadcast %cst_249 : f32 to vector<4x32xf32>
    %677 = arith.mulf %675, %676 : vector<4x32xf32>
    %678 = arith.mulf %677, %574 : vector<4x32xf32>
    %cst_250 = arith.constant 1.000000e+00 : f32
    %679 = vector.broadcast %cst_250 : f32 to vector<4x32xf32>
    %680 = arith.subf %679, %420 : vector<4x32xf32>
    %cst_251 = arith.constant 1.250000e+00 : f32
    %681 = vector.broadcast %cst_251 : f32 to vector<4x32xf32>
    %682 = arith.mulf %680, %681 : vector<4x32xf32>
    %683 = arith.mulf %682, %585 : vector<4x32xf32>
    %684 = arith.addf %678, %683 : vector<4x32xf32>
    %cst_252 = arith.constant 2.000000e-01 : f32
    %685 = vector.broadcast %cst_252 : f32 to vector<4x32xf32>
    %686 = arith.subf %420, %685 : vector<4x32xf32>
    %cst_253 = arith.constant 1.250000e+00 : f32
    %687 = vector.broadcast %cst_253 : f32 to vector<4x32xf32>
    %688 = arith.mulf %686, %687 : vector<4x32xf32>
    %689 = arith.mulf %688, %585 : vector<4x32xf32>
    %cst_254 = arith.constant 1.400000e+00 : f32
    %690 = vector.broadcast %cst_254 : f32 to vector<4x32xf32>
    %691 = arith.subf %690, %420 : vector<4x32xf32>
    %cst_255 = arith.constant 1.250000e+00 : f32
    %692 = vector.broadcast %cst_255 : f32 to vector<4x32xf32>
    %693 = arith.mulf %691, %692 : vector<4x32xf32>
    %694 = arith.mulf %693, %596 : vector<4x32xf32>
    %695 = arith.addf %689, %694 : vector<4x32xf32>
    %cst_256 = arith.constant 6.000000e-01 : f32
    %696 = vector.broadcast %cst_256 : f32 to vector<4x32xf32>
    %697 = arith.subf %420, %696 : vector<4x32xf32>
    %cst_257 = arith.constant 1.250000e+00 : f32
    %698 = vector.broadcast %cst_257 : f32 to vector<4x32xf32>
    %699 = arith.mulf %697, %698 : vector<4x32xf32>
    %700 = arith.mulf %699, %596 : vector<4x32xf32>
    %cst_258 = arith.constant 1.800000e+00 : f32
    %701 = vector.broadcast %cst_258 : f32 to vector<4x32xf32>
    %702 = arith.subf %701, %420 : vector<4x32xf32>
    %cst_259 = arith.constant 1.250000e+00 : f32
    %703 = vector.broadcast %cst_259 : f32 to vector<4x32xf32>
    %704 = arith.mulf %702, %703 : vector<4x32xf32>
    %705 = arith.mulf %704, %607 : vector<4x32xf32>
    %706 = arith.addf %700, %705 : vector<4x32xf32>
    %cst_260 = arith.constant 1.000000e+00 : f32
    %707 = vector.broadcast %cst_260 : f32 to vector<4x32xf32>
    %708 = arith.subf %420, %707 : vector<4x32xf32>
    %cst_261 = arith.constant 1.250000e+00 : f32
    %709 = vector.broadcast %cst_261 : f32 to vector<4x32xf32>
    %710 = arith.mulf %708, %709 : vector<4x32xf32>
    %711 = arith.mulf %710, %607 : vector<4x32xf32>
    %cst_262 = arith.constant 2.200000e+00 : f32
    %712 = vector.broadcast %cst_262 : f32 to vector<4x32xf32>
    %713 = arith.subf %712, %420 : vector<4x32xf32>
    %cst_263 = arith.constant 1.250000e+00 : f32
    %714 = vector.broadcast %cst_263 : f32 to vector<4x32xf32>
    %715 = arith.mulf %713, %714 : vector<4x32xf32>
    %716 = arith.mulf %715, %618 : vector<4x32xf32>
    %717 = arith.addf %711, %716 : vector<4x32xf32>
    %cst_264 = arith.constant -2.200000e+00 : f32
    %718 = vector.broadcast %cst_264 : f32 to vector<4x32xf32>
    %719 = arith.subf %420, %718 : vector<4x32xf32>
    %cst_265 = arith.constant 0.833333313 : f32
    %720 = vector.broadcast %cst_265 : f32 to vector<4x32xf32>
    %721 = arith.mulf %719, %720 : vector<4x32xf32>
    %722 = arith.mulf %721, %629 : vector<4x32xf32>
    %cst_266 = arith.constant -6.000000e-01 : f32
    %723 = vector.broadcast %cst_266 : f32 to vector<4x32xf32>
    %724 = arith.subf %723, %420 : vector<4x32xf32>
    %cst_267 = arith.constant 0.833333313 : f32
    %725 = vector.broadcast %cst_267 : f32 to vector<4x32xf32>
    %726 = arith.mulf %724, %725 : vector<4x32xf32>
    %727 = arith.mulf %726, %640 : vector<4x32xf32>
    %728 = arith.addf %722, %727 : vector<4x32xf32>
    %cst_268 = arith.constant -1.800000e+00 : f32
    %729 = vector.broadcast %cst_268 : f32 to vector<4x32xf32>
    %730 = arith.subf %420, %729 : vector<4x32xf32>
    %cst_269 = arith.constant 0.833333313 : f32
    %731 = vector.broadcast %cst_269 : f32 to vector<4x32xf32>
    %732 = arith.mulf %730, %731 : vector<4x32xf32>
    %733 = arith.mulf %732, %640 : vector<4x32xf32>
    %cst_270 = arith.constant -2.000000e-01 : f32
    %734 = vector.broadcast %cst_270 : f32 to vector<4x32xf32>
    %735 = arith.subf %734, %420 : vector<4x32xf32>
    %cst_271 = arith.constant 0.833333313 : f32
    %736 = vector.broadcast %cst_271 : f32 to vector<4x32xf32>
    %737 = arith.mulf %735, %736 : vector<4x32xf32>
    %738 = arith.mulf %737, %651 : vector<4x32xf32>
    %739 = arith.addf %733, %738 : vector<4x32xf32>
    %cst_272 = arith.constant -1.400000e+00 : f32
    %740 = vector.broadcast %cst_272 : f32 to vector<4x32xf32>
    %741 = arith.subf %420, %740 : vector<4x32xf32>
    %cst_273 = arith.constant 0.833333313 : f32
    %742 = vector.broadcast %cst_273 : f32 to vector<4x32xf32>
    %743 = arith.mulf %741, %742 : vector<4x32xf32>
    %744 = arith.mulf %743, %651 : vector<4x32xf32>
    %cst_274 = arith.constant 2.000000e-01 : f32
    %745 = vector.broadcast %cst_274 : f32 to vector<4x32xf32>
    %746 = arith.subf %745, %420 : vector<4x32xf32>
    %cst_275 = arith.constant 0.833333313 : f32
    %747 = vector.broadcast %cst_275 : f32 to vector<4x32xf32>
    %748 = arith.mulf %746, %747 : vector<4x32xf32>
    %749 = arith.mulf %748, %662 : vector<4x32xf32>
    %750 = arith.addf %744, %749 : vector<4x32xf32>
    %cst_276 = arith.constant -1.000000e+00 : f32
    %751 = vector.broadcast %cst_276 : f32 to vector<4x32xf32>
    %752 = arith.subf %420, %751 : vector<4x32xf32>
    %cst_277 = arith.constant 0.833333313 : f32
    %753 = vector.broadcast %cst_277 : f32 to vector<4x32xf32>
    %754 = arith.mulf %752, %753 : vector<4x32xf32>
    %755 = arith.mulf %754, %662 : vector<4x32xf32>
    %cst_278 = arith.constant 6.000000e-01 : f32
    %756 = vector.broadcast %cst_278 : f32 to vector<4x32xf32>
    %757 = arith.subf %756, %420 : vector<4x32xf32>
    %cst_279 = arith.constant 0.833333313 : f32
    %758 = vector.broadcast %cst_279 : f32 to vector<4x32xf32>
    %759 = arith.mulf %757, %758 : vector<4x32xf32>
    %760 = arith.mulf %759, %673 : vector<4x32xf32>
    %761 = arith.addf %755, %760 : vector<4x32xf32>
    %cst_280 = arith.constant -6.000000e-01 : f32
    %762 = vector.broadcast %cst_280 : f32 to vector<4x32xf32>
    %763 = arith.subf %420, %762 : vector<4x32xf32>
    %cst_281 = arith.constant 0.833333313 : f32
    %764 = vector.broadcast %cst_281 : f32 to vector<4x32xf32>
    %765 = arith.mulf %763, %764 : vector<4x32xf32>
    %766 = arith.mulf %765, %673 : vector<4x32xf32>
    %cst_282 = arith.constant 1.000000e+00 : f32
    %767 = vector.broadcast %cst_282 : f32 to vector<4x32xf32>
    %768 = arith.subf %767, %420 : vector<4x32xf32>
    %cst_283 = arith.constant 0.833333313 : f32
    %769 = vector.broadcast %cst_283 : f32 to vector<4x32xf32>
    %770 = arith.mulf %768, %769 : vector<4x32xf32>
    %771 = arith.mulf %770, %684 : vector<4x32xf32>
    %772 = arith.addf %766, %771 : vector<4x32xf32>
    %cst_284 = arith.constant -2.000000e-01 : f32
    %773 = vector.broadcast %cst_284 : f32 to vector<4x32xf32>
    %774 = arith.subf %420, %773 : vector<4x32xf32>
    %cst_285 = arith.constant 0.833333313 : f32
    %775 = vector.broadcast %cst_285 : f32 to vector<4x32xf32>
    %776 = arith.mulf %774, %775 : vector<4x32xf32>
    %777 = arith.mulf %776, %684 : vector<4x32xf32>
    %cst_286 = arith.constant 1.400000e+00 : f32
    %778 = vector.broadcast %cst_286 : f32 to vector<4x32xf32>
    %779 = arith.subf %778, %420 : vector<4x32xf32>
    %cst_287 = arith.constant 0.833333313 : f32
    %780 = vector.broadcast %cst_287 : f32 to vector<4x32xf32>
    %781 = arith.mulf %779, %780 : vector<4x32xf32>
    %782 = arith.mulf %781, %695 : vector<4x32xf32>
    %783 = arith.addf %777, %782 : vector<4x32xf32>
    %cst_288 = arith.constant 2.000000e-01 : f32
    %784 = vector.broadcast %cst_288 : f32 to vector<4x32xf32>
    %785 = arith.subf %420, %784 : vector<4x32xf32>
    %cst_289 = arith.constant 0.833333313 : f32
    %786 = vector.broadcast %cst_289 : f32 to vector<4x32xf32>
    %787 = arith.mulf %785, %786 : vector<4x32xf32>
    %788 = arith.mulf %787, %695 : vector<4x32xf32>
    %cst_290 = arith.constant 1.800000e+00 : f32
    %789 = vector.broadcast %cst_290 : f32 to vector<4x32xf32>
    %790 = arith.subf %789, %420 : vector<4x32xf32>
    %cst_291 = arith.constant 0.833333313 : f32
    %791 = vector.broadcast %cst_291 : f32 to vector<4x32xf32>
    %792 = arith.mulf %790, %791 : vector<4x32xf32>
    %793 = arith.mulf %792, %706 : vector<4x32xf32>
    %794 = arith.addf %788, %793 : vector<4x32xf32>
    %cst_292 = arith.constant 6.000000e-01 : f32
    %795 = vector.broadcast %cst_292 : f32 to vector<4x32xf32>
    %796 = arith.subf %420, %795 : vector<4x32xf32>
    %cst_293 = arith.constant 0.833333313 : f32
    %797 = vector.broadcast %cst_293 : f32 to vector<4x32xf32>
    %798 = arith.mulf %796, %797 : vector<4x32xf32>
    %799 = arith.mulf %798, %706 : vector<4x32xf32>
    %cst_294 = arith.constant 2.200000e+00 : f32
    %800 = vector.broadcast %cst_294 : f32 to vector<4x32xf32>
    %801 = arith.subf %800, %420 : vector<4x32xf32>
    %cst_295 = arith.constant 0.833333313 : f32
    %802 = vector.broadcast %cst_295 : f32 to vector<4x32xf32>
    %803 = arith.mulf %801, %802 : vector<4x32xf32>
    %804 = arith.mulf %803, %717 : vector<4x32xf32>
    %805 = arith.addf %799, %804 : vector<4x32xf32>
    %806 = vector.shape_cast %728 : vector<4x32xf32> to vector<1x4x32xf32>
    %807 = vector.shape_cast %739 : vector<4x32xf32> to vector<1x4x32xf32>
    %808 = vector.shape_cast %750 : vector<4x32xf32> to vector<1x4x32xf32>
    %809 = vector.shape_cast %761 : vector<4x32xf32> to vector<1x4x32xf32>
    %810 = vector.shape_cast %772 : vector<4x32xf32> to vector<1x4x32xf32>
    %811 = vector.shape_cast %783 : vector<4x32xf32> to vector<1x4x32xf32>
    %812 = vector.shape_cast %794 : vector<4x32xf32> to vector<1x4x32xf32>
    %813 = vector.shape_cast %805 : vector<4x32xf32> to vector<1x4x32xf32>
    %814 = tpu.concatenate %806, %807, %808, %809, %810, %811, %812, %813 in 0 : vector<1x4x32xf32>, vector<1x4x32xf32>, vector<1x4x32xf32>, vector<1x4x32xf32>, vector<1x4x32xf32>, vector<1x4x32xf32>, vector<1x4x32xf32>, vector<1x4x32xf32> -> vector<8x4x32xf32>
    "tpu.trace_start"() <{level = 10 : i32, message = "jbi,jio->jbo"}> : () -> ()
    %cst_296 = arith.constant dense<0.000000e+00> : vector<8x4x8xf32>
    %815 = tpu.matmul %814, %422, %cst_296 {dimension_numbers = #tpu.dot_dimension_numbers<[2], [1], [1], [2], [0, 0, 0, 1, 1, 2], [0], [0]>} : vector<8x4x32xf32>, vector<8x32x8xf32>, vector<8x4x8xf32> -> vector<8x4x8xf32>
    "tpu.trace_stop"() : () -> ()
    %cst_297 = arith.constant dense<0.000000e+00> : vector<4x8xf32>
    %816 = vector.multi_reduction <add>, %815, %cst_297 [0] : vector<8x4x8xf32> to vector<4x8xf32>
    %817 = arith.addf %431, %816 : vector<4x8xf32>
    %c0_298 = arith.constant 0 : index
    %c0_299 = arith.constant 0 : index
    %818 = vector.load %arg12[%c0_298, %c0_299] : memref<4x8xf32, #tpu.memory_space<vmem>>, vector<4x8xf32>
    tpu.vector_store %arg12[%c0_298, %c0_299], %817 {strides = array<i32>} : memref<4x8xf32, #tpu.memory_space<vmem>>, vector<4x8xf32>,
    %cst_300 = arith.constant dense<0xFF800000> : vector<4xf32>
    %819 = vector.multi_reduction <maximumf>, %817, %cst_300 [1] : vector<4x8xf32> to vector<4xf32>
    %820 = vector.shape_cast %819 : vector<4xf32> to vector<4x1xf32>
    %821 = vector.broadcast %820 : vector<4x1xf32> to vector<4x8xf32>
    %822 = arith.subf %817, %821 : vector<4x8xf32>
    %823 = math.exp %822 : vector<4x8xf32>
    %cst_301 = arith.constant dense<0.000000e+00> : vector<4xf32>
    %824 = vector.multi_reduction <add>, %823, %cst_301 [1] : vector<4x8xf32> to vector<4xf32>
    %825 = vector.shape_cast %824 : vector<4xf32> to vector<4x1xf32>
    %826 = vector.broadcast %825 : vector<4x1xf32> to vector<4x8xf32>
    %827 = arith.divf %823, %826 : vector<4x8xf32>
    %c0_302 = arith.constant 0 : index
    %c0_303 = arith.constant 0 : index
    %828 = vector.load %arg13[%c0_302, %c0_303] : memref<4x8xf32, #tpu.memory_space<vmem>>, vector<4x8xf32>
    tpu.vector_store %arg13[%c0_302, %c0_303], %827 {strides = array<i32>} : memref<4x8xf32, #tpu.memory_space<vmem>>, vector<4x8xf32>,
    return
  }
  func.func @transform_0(%arg0: i32) -> (i32, i32) {
    %c0_i32 = arith.constant 0 : i32
    %c0_i32_0 = arith.constant 0 : i32
    %c0_i32_1 = arith.constant 0 : i32
    return %c0_i32, %c0_i32_0 : i32, i32
  }
  func.func @transform_1(%arg0: i32) -> (i32, i32) {
    %c0_i32 = arith.constant 0 : i32
    %c0_i32_0 = arith.constant 0 : i32
    %c0_i32_1 = arith.constant 0 : i32
    return %c0_i32, %c0_i32_0 : i32, i32
  }
  func.func @transform_2(%arg0: i32) -> (i32, i32) {
    %c0_i32 = arith.constant 0 : i32
    %c0_i32_0 = arith.constant 0 : i32
    %c0_i32_1 = arith.constant 0 : i32
    return %c0_i32, %c0_i32_0 : i32, i32
  }
  func.func @transform_3(%arg0: i32) -> (i32, i32) {
    %c0_i32 = arith.constant 0 : i32
    %c0_i32_0 = arith.constant 0 : i32
    %c0_i32_1 = arith.constant 0 : i32
    return %c0_i32, %c0_i32_0 : i32, i32
  }
  func.func @transform_4(%arg0: i32) -> (i32, i32) {
    %c0_i32 = arith.constant 0 : i32
    %c0_i32_0 = arith.constant 0 : i32
    %c0_i32_1 = arith.constant 0 : i32
    return %c0_i32, %c0_i32_0 : i32, i32
  }
  func.func @transform_5(%arg0: i32) -> (i32, i32) {
    %c0_i32 = arith.constant 0 : i32
    %c0_i32_0 = arith.constant 0 : i32
    %c0_i32_1 = arith.constant 0 : i32
    return %c0_i32, %c0_i32_0 : i32, i32
  }
  func.func @transform_6(%arg0: i32) -> (i32, i32) {
    %c0_i32 = arith.constant 0 : i32
    %c0_i32_0 = arith.constant 0 : i32
    %c0_i32_1 = arith.constant 0 : i32
    return %c0_i32, %c0_i32_0 : i32, i32
  }
  func.func @transform_7(%arg0: i32) -> (i32, i32) {
    %c0_i32 = arith.constant 0 : i32
    %c0_i32_0 = arith.constant 0 : i32
    %c0_i32_1 = arith.constant 0 : i32
    return %c0_i32, %c0_i32_0 : i32, i32
  }
  func.func @transform_8(%arg0: i32) -> (i32, i32, i32) {
    %c0_i32 = arith.constant 0 : i32
    %c0_i32_0 = arith.constant 0 : i32
    %c0_i32_1 = arith.constant 0 : i32
    %c0_i32_2 = arith.constant 0 : i32
    return %c0_i32, %c0_i32_0, %c0_i32_1 : i32, i32, i32
  }
  func.func @transform_9(%arg0: i32) -> (i32, i32) {
    %c0_i32 = arith.constant 0 : i32
    %c0_i32_0 = arith.constant 0 : i32
    %c0_i32_1 = arith.constant 0 : i32
    return %c0_i32, %c0_i32_0 : i32, i32
  }
  func.func @transform_10(%arg0: i32) -> (i32, i32, i32) {
    %c0_i32 = arith.constant 0 : i32
    %c0_i32_0 = arith.constant 0 : i32
    %c0_i32_1 = arith.constant 0 : i32
    %c0_i32_2 = arith.constant 0 : i32
    return %c0_i32, %c0_i32_0, %c0_i32_1 : i32, i32, i32
  }
  func.func @transform_11(%arg0: i32) -> (i32, i32) {
    %c0_i32 = arith.constant 0 : i32
    %c0_i32_0 = arith.constant 0 : i32
    %c0_i32_1 = arith.constant 0 : i32
    return %c0_i32, %c0_i32_0 : i32, i32
  }
  func.func @transform_12(%arg0: i32) -> (i32, i32) {
    %c0_i32 = arith.constant 0 : i32
    %c0_i32_0 = arith.constant 0 : i32
    %c0_i32_1 = arith.constant 0 : i32
    return %c0_i32, %c0_i32_0 : i32, i32
  }
}

</mosaic_0001>

<bundles_post_ra>
// kernel: cnn_forward.2
= control target key start
LH: loop header
LB: loop body
LE: loop exit
PB: predicated region body
PF: predicated region fallthrough
CT: control target
= control target key end

     0   :  { %vm728_vm0 = vcmask 519168   ;;  %s1631_s1 = inlined_call_operand.vmem [shape: f32[128,64], index: 1, kind: input, shape index: {}]   ;;  %s1632_s0 = inlined_call_operand.vmem [shape: f32[816,128], index: 0, kind: input, shape index: {}]   ;;  %s1633_s2 = inlined_call_operand.vmem [shape: f32[1,64], index: 2, kind: input, shape index: {}]   ;;  %s1634_s3 = inlined_call_operand.vmem [shape: f32[1,64], index: 3, kind: input, shape index: {}]   ;;  %s1635_s4 = inlined_call_operand.vmem [shape: f32[1,64], index: 4, kind: input, shape index: {}]   ;;  %s1636_s5 = inlined_call_operand.vmem [shape: bf16[408,64], index: 5, kind: output, shape index: {}]  }
   0x1   :  { %v137_v0 = vld [vmem:[%s1631_s1 + $0x78] sm:$0xff]  ;;  %v136_v1 = vld [vmem:[%s1631_s1 + $0x70] sm:$0xff]  ;;  %v135_v2 = vld [vmem:[%s1631_s1 + $0x68] sm:$0xff] }
   0x2   :  { %785 = vmatpush.msra.mxu2 %v137_v0  ;;  %786 = vmatpush.msra.mxu3 %v137_v0  ;;  %v134_v3 = vld [vmem:[%s1631_s1 + $0x60] sm:$0xff]  ;;  %v133_v4 = vld [vmem:[%s1631_s1 + $0x58] sm:$0xff]  ;;  %v132_v5 = vld [vmem:[%s1631_s1 + $0x50] sm:$0xff] }
   0x3   :  { %784 = vmatpush.msra.mxu1 %v137_v0  ;;  %142 = vmatpush.msra.mxu0 %v137_v0  ;;  %v131_v6 = vld [vmem:[%s1631_s1 + $0x48] sm:$0xff]  ;;  %v130_v7 = vld [vmem:[%s1631_s1 + $0x40] sm:$0xff]  ;;  %v129_v8 = vld [vmem:[%s1631_s1 + $0x38] sm:$0xff] }
   0x4   :  { %788 = vmatpush.msra.mxu2 %v136_v1  ;;  %789 = vmatpush.msra.mxu3 %v136_v1  ;;  %v128_v9 = vld [vmem:[%s1631_s1 + $0x30] sm:$0xff]  ;;  %v127_v10 = vld [vmem:[%s1631_s1 + $0x28] sm:$0xff]  ;;  %v126_v11 = vld [vmem:[%s1631_s1 + $0x20] sm:$0xff] }
   0x5   :  { %787 = vmatpush.msra.mxu1 %v136_v1  ;;  %143 = vmatpush.msra.mxu0 %v136_v1  ;;  %v125_v12 = vld [vmem:[%s1631_s1 + $0x18] sm:$0xff]  ;;  %v124_v13 = vld [vmem:[%s1631_s1 + $0x10] sm:$0xff]  ;;  %v123_v14 = vld [vmem:[%s1631_s1 + $0x8] sm:$0xff] }
   0x6   :  { %791 = vmatpush.msra.mxu2 %v135_v2  ;;  %792 = vmatpush.msra.mxu3 %v135_v2  ;;  %v122_v15 = vld [vmem:[%s1631_s1] sm:$0xff]  ;;  %v70_v16 = vld [vmem:[%s1632_s0 + $0x190] sm:$0xff]  ;;  %v45_v18 = vld [vmem:[%s1632_s0 + $0xc8] sm:$0xff] }
   0x7   :  { %790 = vmatpush.msra.mxu1 %v135_v2  ;;  %144 = vmatpush.msra.mxu0 %v135_v2  ;;  %v96_v17 = vld [vmem:[%s1632_s0 + $0x260] sm:$0xff]  ;;  %v71_v20 = vld [vmem:[%s1632_s0 + $0x198] sm:$0xff]  ;;  %v97_v21 = vld [vmem:[%s1632_s0 + $0x268] sm:$0xff] }
   0x8   :  { %794 = vmatpush.msra.mxu2 %v134_v3  ;;  %795 = vmatpush.msra.mxu3 %v134_v3  ;;  %v20_v19 = vld [vmem:[%s1632_s0] sm:$0xff]  ;;  %v46_v22 = vld [vmem:[%s1632_s0 + $0xd0] sm:$0xff]  ;;  %v21_v23 = vld [vmem:[%s1632_s0 + $0x8] sm:$0xff] }
   0x9   :  { %793 = vmatpush.msra.mxu1 %v134_v3  ;;  %145 = vmatpush.msra.mxu0 %v134_v3  ;;  %v72_v24 = vld [vmem:[%s1632_s0 + $0x1a0] sm:$0xff]  ;;  %v98_v25 = vld [vmem:[%s1632_s0 + $0x270] sm:$0xff]  ;;  %v47_v26 = vld [vmem:[%s1632_s0 + $0xd8] sm:$0xff] }
   0xa   :  { %797 = vmatpush.msra.mxu2 %v133_v4  ;;  %798 = vmatpush.msra.mxu3 %v133_v4  ;;  %v22_v27 = vld [vmem:[%s1632_s0 + $0x10] sm:$0xff]  ;;  %v73_v28 = vld [vmem:[%s1632_s0 + $0x1a8] sm:$0xff]  ;;  %v99_v29 = vld [vmem:[%s1632_s0 + $0x278] sm:$0xff] }
   0xb   :  { %796 = vmatpush.msra.mxu1 %v133_v4  ;;  %146 = vmatpush.msra.mxu0 %v133_v4  ;;  %v48_v30 = vld [vmem:[%s1632_s0 + $0xe0] sm:$0xff]  ;;  %v23_v31 = vld [vmem:[%s1632_s0 + $0x18] sm:$0xff]  ;;  %v74_v32 = vld [vmem:[%s1632_s0 + $0x1b0] sm:$0xff] }
   0xc   :  { %800 = vmatpush.msra.mxu2 %v132_v5  ;;  %801 = vmatpush.msra.mxu3 %v132_v5  ;;  %v100_v33 = vld [vmem:[%s1632_s0 + $0x280] sm:$0xff]  ;;  %v49_v34 = vld [vmem:[%s1632_s0 + $0xe8] sm:$0xff]  ;;  %v75_v36 = vld [vmem:[%s1632_s0 + $0x1b8] sm:$0xff] }
   0xd   :  { %799 = vmatpush.msra.mxu1 %v132_v5  ;;  %147 = vmatpush.msra.mxu0 %v132_v5  ;;  %v24_v35 = vld [vmem:[%s1632_s0 + $0x20] sm:$0xff]  ;;  %v101_v37 = vld [vmem:[%s1632_s0 + $0x288] sm:$0xff]  ;;  %v50_v38 = vld [vmem:[%s1632_s0 + $0xf0] sm:$0xff] }
   0xe   :  { %803 = vmatpush.msra.mxu2 %v131_v6  ;;  %804 = vmatpush.msra.mxu3 %v131_v6  ;;  %v25_v39 = vld [vmem:[%s1632_s0 + $0x28] sm:$0xff]  ;;  %v76_v40 = vld [vmem:[%s1632_s0 + $0x1c0] sm:$0xff]  ;;  %v102_v41 = vld [vmem:[%s1632_s0 + $0x290] sm:$0xff] }
   0xf   :  { %802 = vmatpush.msra.mxu1 %v131_v6  ;;  %148 = vmatpush.msra.mxu0 %v131_v6  ;;  %v51_v42 = vld [vmem:[%s1632_s0 + $0xf8] sm:$0xff]  ;;  %v26_v43 = vld [vmem:[%s1632_s0 + $0x30] sm:$0xff]  ;;  %v77_v44 = vld [vmem:[%s1632_s0 + $0x1c8] sm:$0xff] }
  0x10   :  { %806 = vmatpush.msra.mxu2 %v130_v7  ;;  %807 = vmatpush.msra.mxu3 %v130_v7  ;;  %v103_v45 = vld [vmem:[%s1632_s0 + $0x298] sm:$0xff]  ;;  %v52_v46 = vld [vmem:[%s1632_s0 + $0x100] sm:$0xff]  ;;  %v78_v48 = vld [vmem:[%s1632_s0 + $0x1d0] sm:$0xff] }
  0x11   :  { %805 = vmatpush.msra.mxu1 %v130_v7  ;;  %149 = vmatpush.msra.mxu0 %v130_v7  ;;  %v27_v47 = vld [vmem:[%s1632_s0 + $0x38] sm:$0xff]  ;;  %v104_v49 = vld [vmem:[%s1632_s0 + $0x2a0] sm:$0xff]  ;;  %v53_v50 = vld [vmem:[%s1632_s0 + $0x108] sm:$0xff] }
  0x12   :  { %809 = vmatpush.msra.mxu2 %v129_v8  ;;  %810 = vmatpush.msra.mxu3 %v129_v8  ;;  %v28_v51 = vld [vmem:[%s1632_s0 + $0x40] sm:$0xff]  ;;  %v79_v52 = vld [vmem:[%s1632_s0 + $0x1d8] sm:$0xff]  ;;  %v105_v53 = vld [vmem:[%s1632_s0 + $0x2a8] sm:$0xff] }
  0x13   :  { %808 = vmatpush.msra.mxu1 %v129_v8  ;;  %150 = vmatpush.msra.mxu0 %v129_v8  ;;  %v54_v54 = vld [vmem:[%s1632_s0 + $0x110] sm:$0xff]  ;;  %v29_v55 = vld [vmem:[%s1632_s0 + $0x48] sm:$0xff]  ;;  %v80_v56 = vld [vmem:[%s1632_s0 + $0x1e0] sm:$0xff] }
  0x14   :  { %812 = vmatpush.msra.mxu2 %v128_v9  ;;  %813 = vmatpush.msra.mxu3 %v128_v9  ;;  %v106_v57 = vld [vmem:[%s1632_s0 + $0x2b0] sm:$0xff]  ;;  %v55_v58 = vld [vmem:[%s1632_s0 + $0x118] sm:$0xff]  ;;  %v81_v60 = vld [vmem:[%s1632_s0 + $0x1e8] sm:$0xff] }
  0x15   :  { %811 = vmatpush.msra.mxu1 %v128_v9  ;;  %151 = vmatpush.msra.mxu0 %v128_v9  ;;  %v30_v59 = vld [vmem:[%s1632_s0 + $0x50] sm:$0xff]  ;;  %v107_v61 = vld [vmem:[%s1632_s0 + $0x2b8] sm:$0xff]  ;;  %v56_v62 = vld [vmem:[%s1632_s0 + $0x120] sm:$0xff] }
  0x16   :  { %815 = vmatpush.msra.mxu2 %v127_v10  ;;  %816 = vmatpush.msra.mxu3 %v127_v10  ;;  %v31_v63 = vld [vmem:[%s1632_s0 + $0x58] sm:$0xff]  ;;  %v82_v0 = vld [vmem:[%s1632_s0 + $0x1f0] sm:$0xff]  ;;  %v108_v1 = vld [vmem:[%s1632_s0 + $0x2c0] sm:$0xff] }
  0x17   :  { %814 = vmatpush.msra.mxu1 %v127_v10  ;;  %152 = vmatpush.msra.mxu0 %v127_v10  ;;  %v57_v2 = vld [vmem:[%s1632_s0 + $0x128] sm:$0xff]  ;;  %v32_v3 = vld [vmem:[%s1632_s0 + $0x60] sm:$0xff]  ;;  %v83_v4 = vld [vmem:[%s1632_s0 + $0x1f8] sm:$0xff] }
  0x18   :  { %818 = vmatpush.msra.mxu2 %v126_v11  ;;  %819 = vmatpush.msra.mxu3 %v126_v11  ;;  %v109_v5 = vld [vmem:[%s1632_s0 + $0x2c8] sm:$0xff]  ;;  %v58_v6 = vld [vmem:[%s1632_s0 + $0x130] sm:$0xff]  ;;  %v84_v8 = vld [vmem:[%s1632_s0 + $0x200] sm:$0xff] }
  0x19   :  { %817 = vmatpush.msra.mxu1 %v126_v11  ;;  %153 = vmatpush.msra.mxu0 %v126_v11  ;;  %v33_v7 = vld [vmem:[%s1632_s0 + $0x68] sm:$0xff]  ;;  %v110_v9 = vld [vmem:[%s1632_s0 + $0x2d0] sm:$0xff]  ;;  %v59_v10 = vld [vmem:[%s1632_s0 + $0x138] sm:$0xff] }
  0x1a   :  { %821 = vmatpush.msra.mxu2 %v125_v12  ;;  %822 = vmatpush.msra.mxu3 %v125_v12  ;;  %v34_v11 = vld [vmem:[%s1632_s0 + $0x70] sm:$0xff] }
  0x1b   :  { %820 = vmatpush.msra.mxu1 %v125_v12  ;;  %154 = vmatpush.msra.mxu0 %v125_v12  ;;  %v85_v12 = vld [vmem:[%s1632_s0 + $0x208] sm:$0xff] }
  0x1c   :  { %824 = vmatpush.msra.mxu2 %v124_v13  ;;  %825 = vmatpush.msra.mxu3 %v124_v13 }
  0x1d   :  { %823 = vmatpush.msra.mxu1 %v124_v13  ;;  %155 = vmatpush.msra.mxu0 %v124_v13  ;;  %v111_v13 = vld [vmem:[%s1632_s0 + $0x2d8] sm:$0xff] }
  0x1e   :  { %827 = vmatpush.msra.mxu2 %v123_v14  ;;  %828 = vmatpush.msra.mxu3 %v123_v14 }
  0x1f   :  { %826 = vmatpush.msra.mxu1 %v123_v14  ;;  %156 = vmatpush.msra.mxu0 %v123_v14  ;;  %v60_v14 = vld [vmem:[%s1632_s0 + $0x140] sm:$0xff] }
  0x20   :  { %830 = vmatpush.msra.mxu2 %v122_v15  ;;  %831 = vmatpush.msra.mxu3 %v122_v15 }
  0x21   :  { %308 = vmatmul.f32.vlgmr.msra.gmra.mxu2 %v70_v16  ;;  %386 = vmatmul.f32.vlgmr.msra.gmra.mxu3 %v96_v17  ;;  %v86_v16 = vld [vmem:[%s1632_s0 + $0x210] sm:$0xff]  ;;  %v112_v17 = vld [vmem:[%s1632_s0 + $0x2e0] sm:$0xff] }
  0x22   :  { %829 = vmatpush.msra.mxu1 %v122_v15  ;;  %157 = vmatpush.msra.mxu0 %v122_v15  ;;  %v35_v15 = vld [vmem:[%s1632_s0 + $0x78] sm:$0xff] }
  0x23   :  { %233 = vmatmul.f32.vlgmr.msra.gmra.mxu1 %v45_v18  ;;  %158 = vmatmul.f32.vlgmr.msra.gmra.mxu0 %v20_v19  ;;  %v1117_v18 = vld [vmem:[%s1633_s2] ss:$0 sm:$0xff] }
  0x29   :  { %311 = vmatmul.f32.gmra.mxu2 %v71_v20  ;;  %389 = vmatmul.f32.gmra.mxu3 %v97_v21  ;;  %v61_v20 = vld [vmem:[%s1632_s0 + $0x148] sm:$0xff] }
  0x2b   :  { %236 = vmatmul.f32.gmra.mxu1 %v46_v22  ;;  %161 = vmatmul.f32.gmra.mxu0 %v21_v23  ;;  %v36_v22 = vld [vmem:[%s1632_s0 + $0x80] sm:$0xff] }
  0x31   :  { %314 = vmatmul.f32.gmra.mxu2 %v72_v24  ;;  %392 = vmatmul.f32.gmra.mxu3 %v98_v25 }
  0x33   :  { %239 = vmatmul.f32.gmra.mxu1 %v47_v26  ;;  %164 = vmatmul.f32.gmra.mxu0 %v22_v27  ;;  %v87_v27 = vld [vmem:[%s1632_s0 + $0x218] sm:$0xff] }
  0x39   :  { %317 = vmatmul.f32.gmra.mxu2 %v73_v28  ;;  %395 = vmatmul.f32.gmra.mxu3 %v99_v29  ;;  %v113_v28 = vld [vmem:[%s1632_s0 + $0x2e8] sm:$0xff] }
  0x3b   :  { %242 = vmatmul.f32.gmra.mxu1 %v48_v30  ;;  %167 = vmatmul.f32.gmra.mxu0 %v23_v31  ;;  %v1138_v30 = vld [vmem:[%s1634_s3] ss:$0 sm:$0xff] }
  0x41   :  { %320 = vmatmul.f32.gmra.mxu2 %v74_v32  ;;  %398 = vmatmul.f32.gmra.mxu3 %v100_v33  ;;  %v62_v32 = vld [vmem:[%s1632_s0 + $0x150] sm:$0xff] }
  0x43   :  { %245 = vmatmul.f32.gmra.mxu1 %v49_v34  ;;  %170 = vmatmul.f32.gmra.mxu0 %v24_v35  ;;  %v37_v34 = vld [vmem:[%s1632_s0 + $0x88] sm:$0xff] }
  0x49   :  { %323 = vmatmul.f32.gmra.mxu2 %v75_v36  ;;  %401 = vmatmul.f32.gmra.mxu3 %v101_v37  ;;  %v1149_v36 = vld [vmem:[%s1635_s4] ss:$0 sm:$0xff] }
  0x4b   :  { %248 = vmatmul.f32.gmra.mxu1 %v50_v38  ;;  %173 = vmatmul.f32.gmra.mxu0 %v25_v39 }
  0x51   :  { %326 = vmatmul.f32.gmra.mxu2 %v76_v40  ;;  %404 = vmatmul.f32.gmra.mxu3 %v102_v41 }
  0x53   :  { %251 = vmatmul.f32.gmra.mxu1 %v51_v42  ;;  %176 = vmatmul.f32.gmra.mxu0 %v26_v43 }
  0x59   :  { %329 = vmatmul.f32.gmra.mxu2 %v77_v44  ;;  %407 = vmatmul.f32.gmra.mxu3 %v103_v45  ;;  %v88_v45 = vld [vmem:[%s1632_s0 + $0x220] sm:$0xff] }
  0x5b   :  { %254 = vmatmul.f32.gmra.mxu1 %v52_v46  ;;  %179 = vmatmul.f32.gmra.mxu0 %v27_v47  ;;  %v114_v46 = vld [vmem:[%s1632_s0 + $0x2f0] sm:$0xff] }
  0x61   :  { %332 = vmatmul.f32.gmra.mxu2 %v78_v48  ;;  %410 = vmatmul.f32.gmra.mxu3 %v104_v49 }
  0x63   :  { %257 = vmatmul.f32.gmra.mxu1 %v53_v50  ;;  %182 = vmatmul.f32.gmra.mxu0 %v28_v51  ;;  %v63_v51 = vld [vmem:[%s1632_s0 + $0x158] sm:$0xff] }
  0x69   :  { %335 = vmatmul.f32.gmra.mxu2 %v79_v52  ;;  %413 = vmatmul.f32.gmra.mxu3 %v105_v53  ;;  %v38_v53 = vld [vmem:[%s1632_s0 + $0x90] sm:$0xff] }
  0x6b   :  { %260 = vmatmul.f32.gmra.mxu1 %v54_v54  ;;  %185 = vmatmul.f32.gmra.mxu0 %v29_v55 }
  0x71   :  { %338 = vmatmul.f32.gmra.mxu2 %v80_v56  ;;  %416 = vmatmul.f32.gmra.mxu3 %v106_v57 }
  0x73   :  { %263 = vmatmul.f32.gmra.mxu1 %v55_v58  ;;  %188 = vmatmul.f32.gmra.mxu0 %v30_v59 }
  0x79   :  { %341 = vmatmul.f32.gmra.mxu2 %v81_v60  ;;  %419 = vmatmul.f32.gmra.mxu3 %v107_v61 }
  0x7b   :  { %266 = vmatmul.f32.gmra.mxu1 %v56_v62  ;;  %191 = vmatmul.f32.gmra.mxu0 %v31_v63 }
  0x81   :  { %344 = vmatmul.f32.gmra.mxu2 %v82_v0  ;;  %422 = vmatmul.f32.gmra.mxu3 %v108_v1 }
  0x83   :  { %269 = vmatmul.f32.gmra.mxu1 %v57_v2  ;;  %194 = vmatmul.f32.gmra.mxu0 %v32_v3  ;;  %v89_v2 = vld [vmem:[%s1632_s0 + $0x228] sm:$0xff]  ;;  %v115_v3 = vld [vmem:[%s1632_s0 + $0x2f8] sm:$0xff] }
  0x89   :  { %347 = vmatmul.f32.gmra.mxu2 %v83_v4  ;;  %425 = vmatmul.f32.gmra.mxu3 %v109_v5 }
  0x8b   :  { %272 = vmatmul.f32.gmra.mxu1 %v58_v6  ;;  %197 = vmatmul.f32.gmra.mxu0 %v33_v7 }
  0x91   :  { %350 = vmatmul.f32.gmra.mxu2 %v84_v8  ;;  %428 = vmatmul.f32.gmra.mxu3 %v110_v9  ;;  %v64_v9 = vld [vmem:[%s1632_s0 + $0x160] sm:$0xff] }
  0x93   :  { %275 = vmatmul.f32.gmra.mxu1 %v59_v10  ;;  %200 = vmatmul.f32.gmra.mxu0 %v34_v11  ;;  %v39_v11 = vld [vmem:[%s1632_s0 + $0x98] sm:$0xff] }
  0x99   :  { %353 = vmatmul.f32.gmra.mxu2 %v85_v12  ;;  %431 = vmatmul.f32.gmra.mxu3 %v111_v13 }
  0x9b   :  { %278 = vmatmul.f32.gmra.mxu1 %v60_v14  ;;  %203 = vmatmul.f32.gmra.mxu0 %v35_v15 }
  0xa0   :  { %v234_v19 = vpop.f32.mrf.mxu1  ;;  %v159_v21 = vpop.f32.mrf.mxu0 }
  0xa1   :  { %356 = vmatmul.f32.gmra.mxu2 %v86_v16  ;;  %434 = vmatmul.f32.gmra.mxu3 %v112_v17  ;;  %v235_v23 = vadd.f32 %v1117_v18, %v234_v19  ;;  %v160_v38 = vadd.f32 %v1117_v18, %v159_v21 }
  0xa3   :  { %281 = vmatmul.f32.gmra.mxu1 %v61_v20  ;;  %206 = vmatmul.f32.gmra.mxu0 %v36_v22 }
  0xa4   :  { %v1126_v24 = vpop.f32.mrf.mxu2  ;;  %v387_v25 = vpop.f32.mrf.mxu3 }
  0xa5   :  { %v388_v26 = vadd.f32 %v1117_v18, %v387_v25 }
  0xa7   :  { %v490_v29 = vmax.f32 %v235_v23, %v388_v26  ;;  %v90_v26 = vld [vmem:[%s1632_s0 + $0x230] sm:$0xff] }
  0xa8   :  { %v237_v31 = vpop.f32.mrf.mxu1  ;;  %v162_v33 = vpop.f32.mrf.mxu0 }
  0xa9   :  { %v541_v35 = vmax.f32 %v490_v29, 0.0  ;;  %359 = vmatmul.f32.gmra.mxu2 %v87_v27  ;;  %437 = vmatmul.f32.gmra.mxu3 %v113_v28  ;;  %v238_v39 = vadd.f32 %v1117_v18, %v237_v31  ;;  %v163_v56 = vadd.f32 %v1117_v18, %v162_v33  ;;  %v116_v27 = vld [vmem:[%s1632_s0 + $0x300] sm:$0xff] }
  0xab   :  { %v596_v37 = vmul.f32 %v1138_v30, %v541_v35  ;;  %284 = vmatmul.f32.gmra.mxu1 %v62_v32  ;;  %209 = vmatmul.f32.gmra.mxu0 %v37_v34  ;;  %v65_v34 = vld [vmem:[%s1632_s0 + $0x168] sm:$0xff] }
  0xac   :  { %v312_v40 = vpop.f32.mrf.mxu2  ;;  %v390_v41 = vpop.f32.mrf.mxu3 }
  0xad   :  { %v651_v42 = vadd.f32 %v1149_v36, %v596_v37  ;;  %v313_v43 = vadd.f32 %v1117_v18, %v312_v40  ;;  %v391_v44 = vadd.f32 %v1117_v18, %v390_v41  ;;  %v40_v37 = vld [vmem:[%s1632_s0 + $0xa0] sm:$0xff] }
  0xaf   :  { %v702_v47 = vpack.c.bf16 %v651_v42, %v651_v42  ;;  %v465_v48 = vmax.f32 %v160_v38, %v313_v43  ;;  %v491_v49 = vmax.f32 %v238_v39, %v391_v44 }
  0xb0   :  { %v240_v50 = vpop.f32.mrf.mxu1  ;;  %v165_v52 = vpop.f32.mrf.mxu0 }
  0xb1   :  { %754 = vst.msk [vmem:[%s1636_s5 + $0x64] sm:$0xf] %vm728_vm0, %v702_v47  ;;  %v516_v54 = vmax.f32 %v465_v48, 0.0  ;;  %v542_v55 = vmax.f32 %v491_v49, 0.0  ;;  %362 = vmatmul.f32.gmra.mxu2 %v88_v45  ;;  %440 = vmatmul.f32.gmra.mxu3 %v114_v46  ;;  %v241_v59 = vadd.f32 %v1117_v18, %v240_v50  ;;  %v166_v14 = vadd.f32 %v1117_v18, %v165_v52  ;;  %v91_v50 = vld [vmem:[%s1632_s0 + $0x238] sm:$0xff] }
  0xb3   :  { %v571_v57 = vmul.f32 %v1138_v30, %v516_v54  ;;  %v597_v58 = vmul.f32 %v1138_v30, %v542_v55  ;;  %287 = vmatmul.f32.gmra.mxu1 %v63_v51  ;;  %212 = vmatmul.f32.gmra.mxu0 %v38_v53  ;;  %v117_v51 = vld [vmem:[%s1632_s0 + $0x308] sm:$0xff] }
  0xb4   :  { %v315_v60 = vpop.f32.mrf.mxu2  ;;  %v393_v61 = vpop.f32.mrf.mxu3 }
  0xb5   :  { %v626_v62 = vadd.f32 %v1149_v36, %v571_v57  ;;  %v652_v63 = vadd.f32 %v1149_v36, %v597_v58  ;;  %v316_v0 = vadd.f32 %v1117_v18, %v315_v60  ;;  %v394_v1 = vadd.f32 %v1117_v18, %v393_v61  ;;  %v66_v57 = vld [vmem:[%s1632_s0 + $0x170] sm:$0xff] }
  0xb7   :  { %v677_v4 = vpack.c.bf16 %v626_v62, %v626_v62  ;;  %v703_v5 = vpack.c.bf16 %v652_v63, %v652_v63  ;;  %v466_v6 = vmax.f32 %v163_v56, %v316_v0  ;;  %v492_v7 = vmax.f32 %v241_v59, %v394_v1  ;;  %v41_v59 = vld [vmem:[%s1632_s0 + $0xa8] sm:$0xff] }
  0xb8   :  { %v243_v8 = vpop.f32.mrf.mxu1  ;;  %v168_v10 = vpop.f32.mrf.mxu0 }
  0xb9   :  { %729 = vst.msk [vmem:[%s1636_s5] sm:$0xf] %vm728_vm0, %v677_v4  ;;  %v517_v12 = vmax.f32 %v466_v6, 0.0  ;;  %v543_v13 = vmax.f32 %v492_v7, 0.0  ;;  %365 = vmatmul.f32.gmra.mxu2 %v89_v2  ;;  %443 = vmatmul.f32.gmra.mxu3 %v115_v3  ;;  %v244_v17 = vadd.f32 %v1117_v18, %v243_v8  ;;  %v169_v40 = vadd.f32 %v1117_v18, %v168_v10  ;;  %v92_v8 = vld [vmem:[%s1632_s0 + $0x240] sm:$0xff] }
  0xba   :  { %755 = vst.msk [vmem:[%s1636_s5 + $0x68] sm:$0xf] %vm728_vm0, %v703_v5 }
  0xbb   :  { %v572_v15 = vmul.f32 %v1138_v30, %v517_v12  ;;  %v598_v16 = vmul.f32 %v1138_v30, %v543_v13  ;;  %290 = vmatmul.f32.gmra.mxu1 %v64_v9  ;;  %215 = vmatmul.f32.gmra.mxu0 %v39_v11  ;;  %v118_v9 = vld [vmem:[%s1632_s0 + $0x310] sm:$0xff] }
  0xbc   :  { %v318_v19 = vpop.f32.mrf.mxu2  ;;  %v396_v20 = vpop.f32.mrf.mxu3 }
  0xbd   :  { %v627_v21 = vadd.f32 %v1149_v36, %v572_v15  ;;  %v653_v22 = vadd.f32 %v1149_v36, %v598_v16  ;;  %v319_v23 = vadd.f32 %v1117_v18, %v318_v19  ;;  %v397_v25 = vadd.f32 %v1117_v18, %v396_v20  ;;  %v67_v15 = vld [vmem:[%s1632_s0 + $0x178] sm:$0xff] }
  0xbf   :  { %v678_v28 = vpack.c.bf16 %v627_v21, %v627_v21  ;;  %v704_v29 = vpack.c.bf16 %v653_v22, %v653_v22  ;;  %v467_v31 = vmax.f32 %v166_v14, %v319_v23  ;;  %v493_v32 = vmax.f32 %v244_v17, %v397_v25  ;;  %v42_v17 = vld [vmem:[%s1632_s0 + $0xb0] sm:$0xff] }
  0xc0   :  { %v246_v33 = vpop.f32.mrf.mxu1  ;;  %v171_v35 = vpop.f32.mrf.mxu0 }
  0xc1   :  { %730 = vst.msk [vmem:[%s1636_s5 + $0x4] sm:$0xf] %vm728_vm0, %v678_v28  ;;  %v518_v38 = vmax.f32 %v467_v31, 0.0  ;;  %v544_v39 = vmax.f32 %v493_v32, 0.0  ;;  %368 = vmatmul.f32.gmra.mxu2 %v90_v26  ;;  %446 = vmatmul.f32.gmra.mxu3 %v116_v27  ;;  %v247_v43 = vadd.f32 %v1117_v18, %v246_v33  ;;  %v172_v62 = vadd.f32 %v1117_v18, %v171_v35  ;;  %v93_v33 = vld [vmem:[%s1632_s0 + $0x248] sm:$0xff] }
  0xc2   :  { %756 = vst.msk [vmem:[%s1636_s5 + $0x6c] sm:$0xf] %vm728_vm0, %v704_v29 }
  0xc3   :  { %v573_v41 = vmul.f32 %v1138_v30, %v518_v38  ;;  %v599_v42 = vmul.f32 %v1138_v30, %v544_v39  ;;  %293 = vmatmul.f32.gmra.mxu1 %v65_v34  ;;  %218 = vmatmul.f32.gmra.mxu0 %v40_v37  ;;  %v119_v34 = vld [vmem:[%s1632_s0 + $0x318] sm:$0xff] }
  0xc4   :  { %v321_v44 = vpop.f32.mrf.mxu2  ;;  %v399_v45 = vpop.f32.mrf.mxu3 }
  0xc5   :  { %v628_v46 = vadd.f32 %v1149_v36, %v573_v41  ;;  %v654_v47 = vadd.f32 %v1149_v36, %v599_v42  ;;  %v322_v48 = vadd.f32 %v1117_v18, %v321_v44  ;;  %v400_v49 = vadd.f32 %v1117_v18, %v399_v45  ;;  %v68_v41 = vld [vmem:[%s1632_s0 + $0x180] sm:$0xff] }
  0xc7   :  { %v679_v52 = vpack.c.bf16 %v628_v46, %v628_v46  ;;  %v705_v53 = vpack.c.bf16 %v654_v47, %v654_v47  ;;  %v468_v54 = vmax.f32 %v169_v40, %v322_v48  ;;  %v494_v55 = vmax.f32 %v247_v43, %v400_v49  ;;  %v43_v43 = vld [vmem:[%s1632_s0 + $0xb8] sm:$0xff] }
  0xc8   :  { %v249_v56 = vpop.f32.mrf.mxu1  ;;  %v174_v58 = vpop.f32.mrf.mxu0 }
  0xc9   :  { %731 = vst.msk [vmem:[%s1636_s5 + $0x8] sm:$0xf] %vm728_vm0, %v679_v52  ;;  %v519_v60 = vmax.f32 %v468_v54, 0.0  ;;  %v545_v61 = vmax.f32 %v494_v55, 0.0  ;;  %371 = vmatmul.f32.gmra.mxu2 %v91_v50  ;;  %449 = vmatmul.f32.gmra.mxu3 %v117_v51  ;;  %v250_v1 = vadd.f32 %v1117_v18, %v249_v56  ;;  %v175_v21 = vadd.f32 %v1117_v18, %v174_v58  ;;  %v94_v56 = vld [vmem:[%s1632_s0 + $0x250] sm:$0xff] }
  0xca   :  { %757 = vst.msk [vmem:[%s1636_s5 + $0x70] sm:$0xf] %vm728_vm0, %v705_v53 }
  0xcb   :  { %v574_v63 = vmul.f32 %v1138_v30, %v519_v60  ;;  %v600_v0 = vmul.f32 %v1138_v30, %v545_v61  ;;  %296 = vmatmul.f32.gmra.mxu1 %v66_v57  ;;  %221 = vmatmul.f32.gmra.mxu0 %v41_v59  ;;  %v120_v57 = vld [vmem:[%s1632_s0 + $0x320] sm:$0xff] }
  0xcc   :  { %v324_v2 = vpop.f32.mrf.mxu2  ;;  %v402_v3 = vpop.f32.mrf.mxu3 }
  0xcd   :  { %v629_v4 = vadd.f32 %v1149_v36, %v574_v63  ;;  %v655_v5 = vadd.f32 %v1149_v36, %v600_v0  ;;  %v325_v6 = vadd.f32 %v1117_v18, %v324_v2  ;;  %v403_v7 = vadd.f32 %v1117_v18, %v402_v3  ;;  %v69_v63 = vld [vmem:[%s1632_s0 + $0x188] sm:$0xff] }
  0xcf   :  { %v680_v10 = vpack.c.bf16 %v629_v4, %v629_v4  ;;  %v706_v11 = vpack.c.bf16 %v655_v5, %v655_v5  ;;  %v469_v12 = vmax.f32 %v172_v62, %v325_v6  ;;  %v495_v13 = vmax.f32 %v250_v1, %v403_v7  ;;  %v44_v1 = vld [vmem:[%s1632_s0 + $0xc0] sm:$0xff] }
  0xd0   :  { %v252_v14 = vpop.f32.mrf.mxu1  ;;  %v177_v16 = vpop.f32.mrf.mxu0 }
  0xd1   :  { %732 = vst.msk [vmem:[%s1636_s5 + $0xc] sm:$0xf] %vm728_vm0, %v680_v10  ;;  %v520_v19 = vmax.f32 %v469_v12, 0.0  ;;  %v546_v20 = vmax.f32 %v495_v13, 0.0  ;;  %374 = vmatmul.f32.gmra.mxu2 %v92_v8  ;;  %452 = vmatmul.f32.gmra.mxu3 %v118_v9  ;;  %v253_v25 = vadd.f32 %v1117_v18, %v252_v14  ;;  %v178_v46 = vadd.f32 %v1117_v18, %v177_v16  ;;  %v95_v14 = vld [vmem:[%s1632_s0 + $0x258] sm:$0xff] }
  0xd2   :  { %758 = vst.msk [vmem:[%s1636_s5 + $0x74] sm:$0xf] %vm728_vm0, %v706_v11 }
  0xd3   :  { %v575_v22 = vmul.f32 %v1138_v30, %v520_v19  ;;  %v601_v23 = vmul.f32 %v1138_v30, %v546_v20  ;;  %299 = vmatmul.f32.gmra.mxu1 %v67_v15  ;;  %224 = vmatmul.f32.gmra.mxu0 %v42_v17  ;;  %v121_v15 = vld [vmem:[%s1632_s0 + $0x328] sm:$0xff] }
  0xd4   :  { %v327_v26 = vpop.f32.mrf.mxu2  ;;  %v405_v27 = vpop.f32.mrf.mxu3 }
  0xd5   :  { %v630_v28 = vadd.f32 %v1149_v36, %v575_v22  ;;  %v656_v29 = vadd.f32 %v1149_v36, %v601_v23  ;;  %v328_v31 = vadd.f32 %v1117_v18, %v327_v26  ;;  %v406_v32 = vadd.f32 %v1117_v18, %v405_v27 }
  0xd7   :  { %v681_v35 = vpack.c.bf16 %v630_v28, %v630_v28  ;;  %v707_v37 = vpack.c.bf16 %v656_v29, %v656_v29  ;;  %v470_v38 = vmax.f32 %v175_v21, %v328_v31  ;;  %v496_v39 = vmax.f32 %v253_v25, %v406_v32 }
  0xd8   :  { %v255_v40 = vpop.f32.mrf.mxu1  ;;  %v180_v42 = vpop.f32.mrf.mxu0 }
  0xd9   :  { %733 = vst.msk [vmem:[%s1636_s5 + $0x10] sm:$0xf] %vm728_vm0, %v681_v35  ;;  %v521_v44 = vmax.f32 %v470_v38, 0.0  ;;  %v547_v45 = vmax.f32 %v496_v39, 0.0  ;;  %377 = vmatmul.f32.gmra.mxu2 %v93_v33  ;;  %455 = vmatmul.f32.gmra.mxu3 %v119_v34  ;;  %v256_v49 = vadd.f32 %v1117_v18, %v255_v40  ;;  %v181_v4 = vadd.f32 %v1117_v18, %v180_v42 }
  0xda   :  { %759 = vst.msk [vmem:[%s1636_s5 + $0x78] sm:$0xf] %vm728_vm0, %v707_v37 }
  0xdb   :  { %v576_v47 = vmul.f32 %v1138_v30, %v521_v44  ;;  %v602_v48 = vmul.f32 %v1138_v30, %v547_v45  ;;  %302 = vmatmul.f32.gmra.mxu1 %v68_v41  ;;  %227 = vmatmul.f32.gmra.mxu0 %v43_v43 }
  0xdc   :  { %v330_v50 = vpop.f32.mrf.mxu2  ;;  %v408_v51 = vpop.f32.mrf.mxu3 }
  0xdd   :  { %v631_v52 = vadd.f32 %v1149_v36, %v576_v47  ;;  %v657_v53 = vadd.f32 %v1149_v36, %v602_v48  ;;  %v331_v54 = vadd.f32 %v1117_v18, %v330_v50  ;;  %v409_v55 = vadd.f32 %v1117_v18, %v408_v51 }
  0xdf   :  { %v682_v58 = vpack.c.bf16 %v631_v52, %v631_v52  ;;  %v708_v59 = vpack.c.bf16 %v657_v53, %v657_v53  ;;  %v471_v60 = vmax.f32 %v178_v46, %v331_v54  ;;  %v497_v61 = vmax.f32 %v256_v49, %v409_v55 }
  0xe0   :  { %v258_v62 = vpop.f32.mrf.mxu1  ;;  %v183_v0 = vpop.f32.mrf.mxu0 }
  0xe1   :  { %734 = vst.msk [vmem:[%s1636_s5 + $0x14] sm:$0xf] %vm728_vm0, %v682_v58  ;;  %v522_v2 = vmax.f32 %v471_v60, 0.0  ;;  %v548_v3 = vmax.f32 %v497_v61, 0.0  ;;  %380 = vmatmul.f32.gmra.mxu2 %v94_v56  ;;  %458 = vmatmul.f32.gmra.mxu3 %v120_v57  ;;  %v259_v7 = vadd.f32 %v1117_v18, %v258_v62  ;;  %v184_v28 = vadd.f32 %v1117_v18, %v183_v0 }
  0xe2   :  { %760 = vst.msk [vmem:[%s1636_s5 + $0x7c] sm:$0xf] %vm728_vm0, %v708_v59 }
  0xe3   :  { %v577_v5 = vmul.f32 %v1138_v30, %v522_v2  ;;  %v603_v6 = vmul.f32 %v1138_v30, %v548_v3  ;;  %305 = vmatmul.f32.gmra.mxu1 %v69_v63  ;;  %230 = vmatmul.f32.gmra.mxu0 %v44_v1 }
  0xe4   :  { %v333_v8 = vpop.f32.mrf.mxu2  ;;  %v411_v9 = vpop.f32.mrf.mxu3 }
  0xe5   :  { %v632_v10 = vadd.f32 %v1149_v36, %v577_v5  ;;  %v658_v11 = vadd.f32 %v1149_v36, %v603_v6  ;;  %v334_v12 = vadd.f32 %v1117_v18, %v333_v8  ;;  %v412_v13 = vadd.f32 %v1117_v18, %v411_v9 }
  0xe7   :  { %v683_v16 = vpack.c.bf16 %v632_v10, %v632_v10  ;;  %v709_v17 = vpack.c.bf16 %v658_v11, %v658_v11  ;;  %v472_v19 = vmax.f32 %v181_v4, %v334_v12  ;;  %v498_v20 = vmax.f32 %v259_v7, %v412_v13 }
  0xe8   :  { %v261_v21 = vpop.f32.mrf.mxu1  ;;  %v186_v22 = vpop.f32.mrf.mxu0 }
  0xe9   :  { %735 = vst.msk [vmem:[%s1636_s5 + $0x18] sm:$0xf] %vm728_vm0, %v683_v16  ;;  %v523_v23 = vmax.f32 %v472_v19, 0.0  ;;  %v549_v25 = vmax.f32 %v498_v20, 0.0  ;;  %383 = vmatmul.f32.gmra.mxu2 %v95_v14  ;;  %461 = vmatmul.f32.gmra.mxu3 %v121_v15  ;;  %v262_v29 = vadd.f32 %v1117_v18, %v261_v21  ;;  %v187_v48 = vadd.f32 %v1117_v18, %v186_v22 }
  0xea   :  { %761 = vst.msk [vmem:[%s1636_s5 + $0x80] sm:$0xf] %vm728_vm0, %v709_v17 }
  0xeb   :  { %v578_v26 = vmul.f32 %v1138_v30, %v523_v23  ;;  %v604_v27 = vmul.f32 %v1138_v30, %v549_v25 }
  0xec   :  { %v336_v31 = vpop.f32.mrf.mxu2  ;;  %v414_v32 = vpop.f32.mrf.mxu3 }
  0xed   :  { %v633_v33 = vadd.f32 %v1149_v36, %v578_v26  ;;  %v659_v34 = vadd.f32 %v1149_v36, %v604_v27  ;;  %v337_v35 = vadd.f32 %v1117_v18, %v336_v31  ;;  %v415_v37 = vadd.f32 %v1117_v18, %v414_v32 }
  0xef   :  { %v684_v38 = vpack.c.bf16 %v633_v33, %v633_v33  ;;  %v710_v39 = vpack.c.bf16 %v659_v34, %v659_v34  ;;  %v473_v40 = vmax.f32 %v184_v28, %v337_v35  ;;  %v499_v41 = vmax.f32 %v262_v29, %v415_v37 }
  0xf0   :  { %v264_v42 = vpop.f32.mrf.mxu1  ;;  %v189_v43 = vpop.f32.mrf.mxu0 }
  0xf1   :  { %736 = vst.msk [vmem:[%s1636_s5 + $0x1c] sm:$0xf] %vm728_vm0, %v684_v38  ;;  %v524_v44 = vmax.f32 %v473_v40, 0.0  ;;  %v550_v45 = vmax.f32 %v499_v41, 0.0  ;;  %v265_v49 = vadd.f32 %v1117_v18, %v264_v42  ;;  %v190_v2 = vadd.f32 %v1117_v18, %v189_v43 }
  0xf2   :  { %762 = vst.msk [vmem:[%s1636_s5 + $0x84] sm:$0xf] %vm728_vm0, %v710_v39 }
  0xf3   :  { %v579_v46 = vmul.f32 %v1138_v30, %v524_v44  ;;  %v605_v47 = vmul.f32 %v1138_v30, %v550_v45 }
  0xf4   :  { %v339_v50 = vpop.f32.mrf.mxu2  ;;  %v417_v51 = vpop.f32.mrf.mxu3 }
  0xf5   :  { %v634_v52 = vadd.f32 %v1149_v36, %v579_v46  ;;  %v660_v53 = vadd.f32 %v1149_v36, %v605_v47  ;;  %v340_v54 = vadd.f32 %v1117_v18, %v339_v50  ;;  %v418_v55 = vadd.f32 %v1117_v18, %v417_v51 }
  0xf7   :  { %v685_v56 = vpack.c.bf16 %v634_v52, %v634_v52  ;;  %v711_v57 = vpack.c.bf16 %v660_v53, %v660_v53  ;;  %v474_v58 = vmax.f32 %v187_v48, %v340_v54  ;;  %v500_v59 = vmax.f32 %v265_v49, %v418_v55 }
  0xf8   :  { %v267_v60 = vpop.f32.mrf.mxu1  ;;  %v192_v61 = vpop.f32.mrf.mxu0 }
  0xf9   :  { %737 = vst.msk [vmem:[%s1636_s5 + $0x20] sm:$0xf] %vm728_vm0, %v685_v56  ;;  %v525_v62 = vmax.f32 %v474_v58, 0.0  ;;  %v551_v63 = vmax.f32 %v500_v59, 0.0  ;;  %v268_v3 = vadd.f32 %v1117_v18, %v267_v60  ;;  %v193_v21 = vadd.f32 %v1117_v18, %v192_v61 }
  0xfa   :  { %763 = vst.msk [vmem:[%s1636_s5 + $0x88] sm:$0xf] %vm728_vm0, %v711_v57 }
  0xfb   :  { %v580_v0 = vmul.f32 %v1138_v30, %v525_v62  ;;  %v606_v1 = vmul.f32 %v1138_v30, %v551_v63 }
  0xfc   :  { %v342_v4 = vpop.f32.mrf.mxu2  ;;  %v420_v5 = vpop.f32.mrf.mxu3 }
  0xfd   :  { %v635_v6 = vadd.f32 %v1149_v36, %v580_v0  ;;  %v661_v7 = vadd.f32 %v1149_v36, %v606_v1  ;;  %v343_v8 = vadd.f32 %v1117_v18, %v342_v4  ;;  %v421_v9 = vadd.f32 %v1117_v18, %v420_v5 }
  0xff   :  { %v686_v10 = vpack.c.bf16 %v635_v6, %v635_v6  ;;  %v712_v11 = vpack.c.bf16 %v661_v7, %v661_v7  ;;  %v475_v12 = vmax.f32 %v190_v2, %v343_v8  ;;  %v501_v13 = vmax.f32 %v268_v3, %v421_v9 }
 0x100   :  { %v270_v14 = vpop.f32.mrf.mxu1  ;;  %v195_v15 = vpop.f32.mrf.mxu0 }
 0x101   :  { %738 = vst.msk [vmem:[%s1636_s5 + $0x24] sm:$0xf] %vm728_vm0, %v686_v10  ;;  %v526_v16 = vmax.f32 %v475_v12, 0.0  ;;  %v552_v17 = vmax.f32 %v501_v13, 0.0  ;;  %v271_v22 = vadd.f32 %v1117_v18, %v270_v14  ;;  %v196_v42 = vadd.f32 %v1117_v18, %v195_v15 }
 0x102   :  { %764 = vst.msk [vmem:[%s1636_s5 + $0x8c] sm:$0xf] %vm728_vm0, %v712_v11 }
 0x103   :  { %v581_v19 = vmul.f32 %v1138_v30, %v526_v16  ;;  %v607_v20 = vmul.f32 %v1138_v30, %v552_v17 }
 0x104   :  { %v345_v23 = vpop.f32.mrf.mxu2  ;;  %v423_v25 = vpop.f32.mrf.mxu3 }
 0x105   :  { %v636_v26 = vadd.f32 %v1149_v36, %v581_v19  ;;  %v662_v27 = vadd.f32 %v1149_v36, %v607_v20  ;;  %v346_v28 = vadd.f32 %v1117_v18, %v345_v23  ;;  %v424_v29 = vadd.f32 %v1117_v18, %v423_v25 }
 0x107   :  { %v687_v31 = vpack.c.bf16 %v636_v26, %v636_v26  ;;  %v713_v32 = vpack.c.bf16 %v662_v27, %v662_v27  ;;  %v476_v33 = vmax.f32 %v193_v21, %v346_v28  ;;  %v502_v34 = vmax.f32 %v271_v22, %v424_v29 }
 0x108   :  { %v273_v35 = vpop.f32.mrf.mxu1  ;;  %v198_v37 = vpop.f32.mrf.mxu0 }
 0x109   :  { %739 = vst.msk [vmem:[%s1636_s5 + $0x28] sm:$0xf] %vm728_vm0, %v687_v31  ;;  %v527_v38 = vmax.f32 %v476_v33, 0.0  ;;  %v553_v39 = vmax.f32 %v502_v34, 0.0  ;;  %v274_v43 = vadd.f32 %v1117_v18, %v273_v35  ;;  %v199_v60 = vadd.f32 %v1117_v18, %v198_v37 }
 0x10a   :  { %765 = vst.msk [vmem:[%s1636_s5 + $0x90] sm:$0xf] %vm728_vm0, %v713_v32 }
 0x10b   :  { %v582_v40 = vmul.f32 %v1138_v30, %v527_v38  ;;  %v608_v41 = vmul.f32 %v1138_v30, %v553_v39 }
 0x10c   :  { %v348_v44 = vpop.f32.mrf.mxu2  ;;  %v426_v45 = vpop.f32.mrf.mxu3 }
 0x10d   :  { %v637_v46 = vadd.f32 %v1149_v36, %v582_v40  ;;  %v663_v47 = vadd.f32 %v1149_v36, %v608_v41  ;;  %v349_v48 = vadd.f32 %v1117_v18, %v348_v44  ;;  %v427_v49 = vadd.f32 %v1117_v18, %v426_v45 }
 0x10f   :  { %v688_v50 = vpack.c.bf16 %v637_v46, %v637_v46  ;;  %v714_v51 = vpack.c.bf16 %v663_v47, %v663_v47  ;;  %v477_v52 = vmax.f32 %v196_v42, %v349_v48  ;;  %v503_v53 = vmax.f32 %v274_v43, %v427_v49 }
 0x110   :  { %v276_v54 = vpop.f32.mrf.mxu1  ;;  %v201_v55 = vpop.f32.mrf.mxu0 }
 0x111   :  { %740 = vst.msk [vmem:[%s1636_s5 + $0x2c] sm:$0xf] %vm728_vm0, %v688_v50  ;;  %v528_v56 = vmax.f32 %v477_v52, 0.0  ;;  %v554_v57 = vmax.f32 %v503_v53, 0.0  ;;  %v277_v61 = vadd.f32 %v1117_v18, %v276_v54  ;;  %v202_v14 = vadd.f32 %v1117_v18, %v201_v55 }
 0x112   :  { %766 = vst.msk [vmem:[%s1636_s5 + $0x94] sm:$0xf] %vm728_vm0, %v714_v51 }
 0x113   :  { %v583_v58 = vmul.f32 %v1138_v30, %v528_v56  ;;  %v609_v59 = vmul.f32 %v1138_v30, %v554_v57 }
 0x114   :  { %v351_v62 = vpop.f32.mrf.mxu2  ;;  %v429_v63 = vpop.f32.mrf.mxu3 }
 0x115   :  { %v638_v0 = vadd.f32 %v1149_v36, %v583_v58  ;;  %v664_v1 = vadd.f32 %v1149_v36, %v609_v59  ;;  %v352_v2 = vadd.f32 %v1117_v18, %v351_v62  ;;  %v430_v3 = vadd.f32 %v1117_v18, %v429_v63 }
 0x117   :  { %v689_v4 = vpack.c.bf16 %v638_v0, %v638_v0  ;;  %v715_v5 = vpack.c.bf16 %v664_v1, %v664_v1  ;;  %v478_v6 = vmax.f32 %v199_v60, %v352_v2  ;;  %v504_v7 = vmax.f32 %v277_v61, %v430_v3 }
 0x118   :  { %v279_v8 = vpop.f32.mrf.mxu1  ;;  %v204_v9 = vpop.f32.mrf.mxu0 }
 0x119   :  { %741 = vst.msk [vmem:[%s1636_s5 + $0x30] sm:$0xf] %vm728_vm0, %v689_v4  ;;  %v529_v10 = vmax.f32 %v478_v6, 0.0  ;;  %v555_v11 = vmax.f32 %v504_v7, 0.0  ;;  %v280_v15 = vadd.f32 %v1117_v18, %v279_v8  ;;  %v205_v35 = vadd.f32 %v1117_v18, %v204_v9 }
 0x11a   :  { %767 = vst.msk [vmem:[%s1636_s5 + $0x98] sm:$0xf] %vm728_vm0, %v715_v5 }
 0x11b   :  { %v584_v12 = vmul.f32 %v1138_v30, %v529_v10  ;;  %v610_v13 = vmul.f32 %v1138_v30, %v555_v11 }
 0x11c   :  { %v354_v16 = vpop.f32.mrf.mxu2  ;;  %v432_v17 = vpop.f32.mrf.mxu3 }
 0x11d   :  { %v639_v19 = vadd.f32 %v1149_v36, %v584_v12  ;;  %v665_v20 = vadd.f32 %v1149_v36, %v610_v13  ;;  %v355_v21 = vadd.f32 %v1117_v18, %v354_v16  ;;  %v433_v22 = vadd.f32 %v1117_v18, %v432_v17 }
 0x11f   :  { %v690_v23 = vpack.c.bf16 %v639_v19, %v639_v19  ;;  %v716_v25 = vpack.c.bf16 %v665_v20, %v665_v20  ;;  %v479_v26 = vmax.f32 %v202_v14, %v355_v21  ;;  %v505_v27 = vmax.f32 %v280_v15, %v433_v22 }
 0x120   :  { %v282_v28 = vpop.f32.mrf.mxu1  ;;  %v207_v29 = vpop.f32.mrf.mxu0 }
 0x121   :  { %742 = vst.msk [vmem:[%s1636_s5 + $0x34] sm:$0xf] %vm728_vm0, %v690_v23  ;;  %v530_v31 = vmax.f32 %v479_v26, 0.0  ;;  %v556_v32 = vmax.f32 %v505_v27, 0.0  ;;  %v283_v37 = vadd.f32 %v1117_v18, %v282_v28  ;;  %v208_v54 = vadd.f32 %v1117_v18, %v207_v29 }
 0x122   :  { %768 = vst.msk [vmem:[%s1636_s5 + $0x9c] sm:$0xf] %vm728_vm0, %v716_v25 }
 0x123   :  { %v585_v33 = vmul.f32 %v1138_v30, %v530_v31  ;;  %v611_v34 = vmul.f32 %v1138_v30, %v556_v32 }
 0x124   :  { %v357_v38 = vpop.f32.mrf.mxu2  ;;  %v435_v39 = vpop.f32.mrf.mxu3 }
 0x125   :  { %v640_v40 = vadd.f32 %v1149_v36, %v585_v33  ;;  %v666_v41 = vadd.f32 %v1149_v36, %v611_v34  ;;  %v358_v42 = vadd.f32 %v1117_v18, %v357_v38  ;;  %v436_v43 = vadd.f32 %v1117_v18, %v435_v39 }
 0x127   :  { %v691_v44 = vpack.c.bf16 %v640_v40, %v640_v40  ;;  %v717_v45 = vpack.c.bf16 %v666_v41, %v666_v41  ;;  %v480_v46 = vmax.f32 %v205_v35, %v358_v42  ;;  %v506_v47 = vmax.f32 %v283_v37, %v436_v43 }
 0x128   :  { %v285_v48 = vpop.f32.mrf.mxu1  ;;  %v210_v49 = vpop.f32.mrf.mxu0 }
 0x129   :  { %743 = vst.msk [vmem:[%s1636_s5 + $0x38] sm:$0xf] %vm728_vm0, %v691_v44  ;;  %v531_v50 = vmax.f32 %v480_v46, 0.0  ;;  %v557_v51 = vmax.f32 %v506_v47, 0.0  ;;  %v286_v55 = vadd.f32 %v1117_v18, %v285_v48  ;;  %v211_v8 = vadd.f32 %v1117_v18, %v210_v49 }
 0x12a   :  { %769 = vst.msk [vmem:[%s1636_s5 + $0xa0] sm:$0xf] %vm728_vm0, %v717_v45 }
 0x12b   :  { %v586_v52 = vmul.f32 %v1138_v30, %v531_v50  ;;  %v612_v53 = vmul.f32 %v1138_v30, %v557_v51 }
 0x12c   :  { %v360_v56 = vpop.f32.mrf.mxu2  ;;  %v438_v57 = vpop.f32.mrf.mxu3 }
 0x12d   :  { %v641_v58 = vadd.f32 %v1149_v36, %v586_v52  ;;  %v667_v59 = vadd.f32 %v1149_v36, %v612_v53  ;;  %v361_v60 = vadd.f32 %v1117_v18, %v360_v56  ;;  %v439_v61 = vadd.f32 %v1117_v18, %v438_v57 }
 0x12f   :  { %v692_v62 = vpack.c.bf16 %v641_v58, %v641_v58  ;;  %v718_v63 = vpack.c.bf16 %v667_v59, %v667_v59  ;;  %v481_v0 = vmax.f32 %v208_v54, %v361_v60  ;;  %v507_v1 = vmax.f32 %v286_v55, %v439_v61 }
 0x130   :  { %v288_v2 = vpop.f32.mrf.mxu1  ;;  %v213_v3 = vpop.f32.mrf.mxu0 }
 0x131   :  { %744 = vst.msk [vmem:[%s1636_s5 + $0x3c] sm:$0xf] %vm728_vm0, %v692_v62  ;;  %v532_v4 = vmax.f32 %v481_v0, 0.0  ;;  %v558_v5 = vmax.f32 %v507_v1, 0.0  ;;  %v289_v9 = vadd.f32 %v1117_v18, %v288_v2  ;;  %v214_v28 = vadd.f32 %v1117_v18, %v213_v3 }
 0x132   :  { %770 = vst.msk [vmem:[%s1636_s5 + $0xa4] sm:$0xf] %vm728_vm0, %v718_v63 }
 0x133   :  { %v587_v6 = vmul.f32 %v1138_v30, %v532_v4  ;;  %v613_v7 = vmul.f32 %v1138_v30, %v558_v5 }
 0x134   :  { %v363_v10 = vpop.f32.mrf.mxu2  ;;  %v441_v11 = vpop.f32.mrf.mxu3 }
 0x135   :  { %v642_v12 = vadd.f32 %v1149_v36, %v587_v6  ;;  %v668_v13 = vadd.f32 %v1149_v36, %v613_v7  ;;  %v364_v14 = vadd.f32 %v1117_v18, %v363_v10  ;;  %v442_v15 = vadd.f32 %v1117_v18, %v441_v11 }
 0x137   :  { %v693_v16 = vpack.c.bf16 %v642_v12, %v642_v12  ;;  %v719_v17 = vpack.c.bf16 %v668_v13, %v668_v13  ;;  %v482_v19 = vmax.f32 %v211_v8, %v364_v14  ;;  %v508_v20 = vmax.f32 %v289_v9, %v442_v15 }
 0x138   :  { %v291_v21 = vpop.f32.mrf.mxu1  ;;  %v216_v22 = vpop.f32.mrf.mxu0 }
 0x139   :  { %745 = vst.msk [vmem:[%s1636_s5 + $0x40] sm:$0xf] %vm728_vm0, %v693_v16  ;;  %v533_v23 = vmax.f32 %v482_v19, 0.0  ;;  %v559_v25 = vmax.f32 %v508_v20, 0.0  ;;  %v292_v29 = vadd.f32 %v1117_v18, %v291_v21  ;;  %v217_v48 = vadd.f32 %v1117_v18, %v216_v22 }
 0x13a   :  { %771 = vst.msk [vmem:[%s1636_s5 + $0xa8] sm:$0xf] %vm728_vm0, %v719_v17 }
 0x13b   :  { %v588_v26 = vmul.f32 %v1138_v30, %v533_v23  ;;  %v614_v27 = vmul.f32 %v1138_v30, %v559_v25 }
 0x13c   :  { %v366_v31 = vpop.f32.mrf.mxu2  ;;  %v444_v32 = vpop.f32.mrf.mxu3 }
 0x13d   :  { %v643_v33 = vadd.f32 %v1149_v36, %v588_v26  ;;  %v669_v34 = vadd.f32 %v1149_v36, %v614_v27  ;;  %v367_v35 = vadd.f32 %v1117_v18, %v366_v31  ;;  %v445_v37 = vadd.f32 %v1117_v18, %v444_v32 }
 0x13f   :  { %v694_v38 = vpack.c.bf16 %v643_v33, %v643_v33  ;;  %v720_v39 = vpack.c.bf16 %v669_v34, %v669_v34  ;;  %v483_v40 = vmax.f32 %v214_v28, %v367_v35  ;;  %v509_v41 = vmax.f32 %v292_v29, %v445_v37  ;;  %v835_v28 = vld [vmem:[%s1633_s2] ss:$0 sm:$0xff] }
 0x140   :  { %v294_v42 = vpop.f32.mrf.mxu1  ;;  %v219_v43 = vpop.f32.mrf.mxu0 }
 0x141   :  { %746 = vst.msk [vmem:[%s1636_s5 + $0x44] sm:$0xf] %vm728_vm0, %v694_v38  ;;  %v534_v44 = vmax.f32 %v483_v40, 0.0  ;;  %v560_v45 = vmax.f32 %v509_v41, 0.0  ;;  %v295_v49 = vadd.f32 %v1117_v18, %v294_v42  ;;  %v220_v2 = vadd.f32 %v1117_v18, %v219_v43 }
 0x142   :  { %772 = vst.msk [vmem:[%s1636_s5 + $0xac] sm:$0xf] %vm728_vm0, %v720_v39 }
 0x143   :  { %v589_v46 = vmul.f32 %v1138_v30, %v534_v44  ;;  %v615_v47 = vmul.f32 %v1138_v30, %v560_v45 }
 0x144   :  { %v369_v50 = vpop.f32.mrf.mxu2  ;;  %v447_v51 = vpop.f32.mrf.mxu3 }
 0x145   :  { %v644_v52 = vadd.f32 %v1149_v36, %v589_v46  ;;  %v670_v53 = vadd.f32 %v1149_v36, %v615_v47  ;;  %v370_v54 = vadd.f32 %v1117_v18, %v369_v50  ;;  %v448_v55 = vadd.f32 %v1117_v18, %v447_v51 }
 0x147   :  { %v695_v56 = vpack.c.bf16 %v644_v52, %v644_v52  ;;  %v721_v57 = vpack.c.bf16 %v670_v53, %v670_v53  ;;  %v484_v58 = vmax.f32 %v217_v48, %v370_v54  ;;  %v510_v59 = vmax.f32 %v295_v49, %v448_v55 }
 0x148   :  { %v297_v60 = vpop.f32.mrf.mxu1  ;;  %v222_v63 = vpop.f32.mrf.mxu0 }
 0x149   :  { %747 = vst.msk [vmem:[%s1636_s5 + $0x48] sm:$0xf] %vm728_vm0, %v695_v56  ;;  %v535_v61 = vmax.f32 %v484_v58, 0.0  ;;  %v561_v62 = vmax.f32 %v510_v59, 0.0  ;;  %v298_v3 = vadd.f32 %v1117_v18, %v297_v60  ;;  %v223_v20 = vadd.f32 %v1117_v18, %v222_v63 }
 0x14a   :  { %773 = vst.msk [vmem:[%s1636_s5 + $0xb0] sm:$0xf] %vm728_vm0, %v721_v57 }
 0x14b   :  { %v590_v0 = vmul.f32 %v1138_v30, %v535_v61  ;;  %v616_v1 = vmul.f32 %v1138_v30, %v561_v62  ;;  %v837_v62 = vld [vmem:[%s1635_s4] ss:$0 sm:$0xff] }
 0x14c   :  { %v372_v4 = vpop.f32.mrf.mxu2  ;;  %v450_v5 = vpop.f32.mrf.mxu3 }
 0x14d   :  { %v645_v6 = vadd.f32 %v1149_v36, %v590_v0  ;;  %v671_v7 = vadd.f32 %v1149_v36, %v616_v1  ;;  %v373_v8 = vadd.f32 %v1117_v18, %v372_v4  ;;  %v451_v9 = vadd.f32 %v1117_v18, %v450_v5 }
 0x14f   :  { %v696_v10 = vpack.c.bf16 %v645_v6, %v645_v6  ;;  %v722_v11 = vpack.c.bf16 %v671_v7, %v671_v7  ;;  %v485_v12 = vmax.f32 %v220_v2, %v373_v8  ;;  %v511_v13 = vmax.f32 %v298_v3, %v451_v9 }
 0x150   :  { %v300_v14 = vpop.f32.mrf.mxu1  ;;  %v225_v22 = vpop.f32.mrf.mxu0 }
 0x151   :  { %748 = vst.msk [vmem:[%s1636_s5 + $0x4c] sm:$0xf] %vm728_vm0, %v696_v10  ;;  %v536_v15 = vmax.f32 %v485_v12, 0.0  ;;  %v562_v16 = vmax.f32 %v511_v13, 0.0  ;;  %v301_v21 = vadd.f32 %v1117_v18, %v300_v14  ;;  %v226_v41 = vadd.f32 %v835_v28, %v225_v22 }
 0x152   :  { %774 = vst.msk [vmem:[%s1636_s5 + $0xb4] sm:$0xf] %vm728_vm0, %v722_v11  ;;  %v310_v13 = vadd.f32 %v835_v28, %v1126_v24 }
 0x153   :  { %v591_v17 = vmul.f32 %v1138_v30, %v536_v15  ;;  %v617_v19 = vmul.f32 %v1138_v30, %v562_v16 }
 0x154   :  { %v375_v23 = vpop.f32.mrf.mxu2  ;;  %v453_v25 = vpop.f32.mrf.mxu3 }
 0x155   :  { %v646_v26 = vadd.f32 %v1149_v36, %v591_v17  ;;  %v672_v27 = vadd.f32 %v1149_v36, %v617_v19  ;;  %v376_v29 = vadd.f32 %v835_v28, %v375_v23  ;;  %v454_v31 = vadd.f32 %v835_v28, %v453_v25 }
 0x157   :  { %v697_v32 = vpack.c.bf16 %v646_v26, %v646_v26  ;;  %v723_v33 = vpack.c.bf16 %v672_v27, %v672_v27  ;;  %v486_v34 = vmax.f32 %v223_v20, %v376_v29  ;;  %v512_v35 = vmax.f32 %v301_v21, %v454_v31 }
 0x158   :  { %v303_v37 = vpop.f32.mrf.mxu1  ;;  %v228_v49 = vpop.f32.mrf.mxu0 }
 0x159   :  { %749 = vst.msk [vmem:[%s1636_s5 + $0x50] sm:$0xf] %vm728_vm0, %v697_v32  ;;  %v537_v18 = vmax.f32 %v486_v34, 0.0  ;;  %v563_v38 = vmax.f32 %v512_v35, 0.0  ;;  %v304_v42 = vadd.f32 %v835_v28, %v303_v37  ;;  %v229_v58 = vadd.f32 %v835_v28, %v228_v49 }
 0x15a   :  { %775 = vst.msk [vmem:[%s1636_s5 + $0xb8] sm:$0xf] %vm728_vm0, %v723_v33 }
 0x15b   :  { %v592_v39 = vmul.f32 %v1138_v30, %v537_v18  ;;  %v618_v40 = vmul.f32 %v1138_v30, %v563_v38 }
 0x15c   :  { %v378_v43 = vpop.f32.mrf.mxu2  ;;  %v456_v44 = vpop.f32.mrf.mxu3 }
 0x15d   :  { %v647_v45 = vadd.f32 %v1149_v36, %v592_v39  ;;  %v673_v46 = vadd.f32 %v1149_v36, %v618_v40  ;;  %v379_v47 = vadd.f32 %v835_v28, %v378_v43  ;;  %v457_v48 = vadd.f32 %v835_v28, %v456_v44  ;;  %v836_v36 = vld [vmem:[%s1634_s3] ss:$0 sm:$0xff] }
 0x15f   :  { %v698_v50 = vpack.c.bf16 %v647_v45, %v647_v45  ;;  %v724_v51 = vpack.c.bf16 %v673_v46, %v673_v46  ;;  %v487_v52 = vmax.f32 %v226_v41, %v379_v47  ;;  %v513_v53 = vmax.f32 %v304_v42, %v457_v48 }
 0x160   :  { %v306_v54 = vpop.f32.mrf.mxu1  ;;  %v231_v7 = vpop.f32.mrf.mxu0 }
 0x161   :  { %750 = vst.msk [vmem:[%s1636_s5 + $0x54] sm:$0xf] %vm728_vm0, %v698_v50  ;;  %v538_v30 = vmax.f32 %v487_v52, 0.0  ;;  %v564_v55 = vmax.f32 %v513_v53, 0.0  ;;  %v307_v59 = vadd.f32 %v835_v28, %v306_v54  ;;  %v232_v12 = vadd.f32 %v835_v28, %v231_v7 }
 0x162   :  { %776 = vst.msk [vmem:[%s1636_s5 + $0xbc] sm:$0xf] %vm728_vm0, %v724_v51 }
 0x163   :  { %v593_v56 = vmul.f32 %v836_v36, %v538_v30  ;;  %v619_v57 = vmul.f32 %v836_v36, %v564_v55 }
 0x164   :  { %v381_v60 = vpop.f32.mrf.mxu2  ;;  %v459_v61 = vpop.f32.mrf.mxu3 }
 0x165   :  { %v648_v63 = vadd.f32 %v837_v62, %v593_v56  ;;  %v674_v0 = vadd.f32 %v837_v62, %v619_v57  ;;  %v382_v1 = vadd.f32 %v835_v28, %v381_v60  ;;  %v460_v2 = vadd.f32 %v835_v28, %v459_v61 }
 0x167   :  { %v699_v3 = vpack.c.bf16 %v648_v63, %v648_v63  ;;  %v725_v4 = vpack.c.bf16 %v674_v0, %v674_v0  ;;  %v488_v5 = vmax.f32 %v229_v58, %v382_v1  ;;  %v514_v6 = vmax.f32 %v307_v59, %v460_v2 }
 0x169   :  { %751 = vst.msk [vmem:[%s1636_s5 + $0x58] sm:$0xf] %vm728_vm0, %v699_v3  ;;  %v539_v8 = vmax.f32 %v488_v5, 0.0  ;;  %v565_v9 = vmax.f32 %v514_v6, 0.0 }
 0x16a   :  { %777 = vst.msk [vmem:[%s1636_s5 + $0xc0] sm:$0xf] %vm728_vm0, %v725_v4 }
 0x16b   :  { %v594_v10 = vmul.f32 %v836_v36, %v539_v8  ;;  %v620_v11 = vmul.f32 %v836_v36, %v565_v9 }
 0x16c   :  { %v384_v14 = vpop.f32.mrf.mxu2  ;;  %v462_v15 = vpop.f32.mrf.mxu3 }
 0x16d   :  { %v649_v16 = vadd.f32 %v837_v62, %v594_v10  ;;  %v675_v17 = vadd.f32 %v837_v62, %v620_v11  ;;  %v385_v19 = vadd.f32 %v835_v28, %v384_v14  ;;  %v463_v20 = vadd.f32 %v835_v28, %v462_v15 }
 0x16f   :  { %v700_v21 = vpack.c.bf16 %v649_v16, %v649_v16  ;;  %v726_v22 = vpack.c.bf16 %v675_v17, %v675_v17  ;;  %v489_v23 = vmax.f32 %v232_v12, %v385_v19  ;;  %v515_v25 = vmax.f32 %v310_v13, %v463_v20 }
 0x171   :  { %752 = vst.msk [vmem:[%s1636_s5 + $0x5c] sm:$0xf] %vm728_vm0, %v700_v21  ;;  %v540_v26 = vmax.f32 %v489_v23, 0.0  ;;  %v566_v27 = vmax.f32 %v515_v25, 0.0 }
 0x172   :  { %778 = vst.msk [vmem:[%s1636_s5 + $0xc4] sm:$0xf] %vm728_vm0, %v726_v22 }
 0x173   :  { %v595_v24 = vmul.f32 %v836_v36, %v540_v26  ;;  %v621_v29 = vmul.f32 %v836_v36, %v566_v27 }
 0x175   :  { %v650_v31 = vadd.f32 %v837_v62, %v595_v24  ;;  %v676_v28 = vadd.f32 %v837_v62, %v621_v29 }
 0x177   :  { %v701_v32 = vpack.c.bf16 %v650_v31, %v650_v31  ;;  %v727_v33 = vpack.c.bf16 %v676_v28, %v676_v28 }
 0x179   :  { %753 = vst.msk [vmem:[%s1636_s5 + $0x60] sm:$0xf] %vm728_vm0, %v701_v32 }
 0x17a   :  { %779 = vst.msk [vmem:[%s1636_s5 + $0xc8] sm:$0xf] %vm728_vm0, %v727_v33 }

// kernel: cnn_forward.3
= control target key start
LH: loop header
LB: loop body
LE: loop exit
PB: predicated region body
PF: predicated region fallthrough
CT: control target
= control target key end

     0   :  { %18 = vsyncpa [#allocation3], 0  ;;  %s9362_s0 = inlined_call_operand.vmem [shape: bf16[8,6400], index: 0, kind: input, shape index: {}]   ;;  %s9363_s1 = inlined_call_operand.vmem [shape: bf16[6400,128], index: 1, kind: input, shape index: {}]   ;;  %s9364_s2 = inlined_call_operand.vmem [shape: f32[1,128], index: 2, kind: input, shape index: {}]   ;;  %s9365_s3 = inlined_call_operand.vmem [shape: f32[1,128], index: 3, kind: input, shape index: {}]   ;;  %s9366_s4 = inlined_call_operand.vmem [shape: f32[1,128], index: 4, kind: input, shape index: {}]   ;;  %s9367_s5 = inlined_call_operand.vmem [shape: f32[128,64], index: 5, kind: input, shape index: {}]   ;;  %s9368_s6 = inlined_call_operand.vmem [shape: f32[1,64], index: 6, kind: input, shape index: {}]   ;;  %s9369_s7 = inlined_call_operand.vmem [shape: f32[64,32], index: 7, kind: input, shape index: {}]   ;;  %s9370_s8 = inlined_call_operand.vmem [shape: f32[8,64,32], index: 8, kind: input, shape index: {}]   ;;  %s9371_s9 = inlined_call_operand.vmem [shape: f32[32,8], index: 9, kind: input, shape index: {}]   ;;  %s9372_s10 = inlined_call_operand.vmem [shape: f32[8,32,8], index: 10, kind: input, shape index: {}]   ;;  %s9373_s11 = inlined_call_operand.hbm [shape: f32[4,8], index: 11, kind: output, shape index: {0}]   ;;  %s9374_s12 = inlined_call_operand.hbm [shape: f32[4,8], index: 12, kind: output, shape index: {1}]  }
   0x1   :  { %v6893_v0 = vld [vmem:[%s9363_s1 + $0x38] sm:$0xff]  ;;  %v6892_v4 = vld [vmem:[%s9363_s1 + $0x30] sm:$0xff]  ;;  %v6891_v8 = vld [vmem:[%s9363_s1 + $0x28] sm:$0xff] }
   0x2   :  { %v6901_v1 = vld [vmem:[%s9363_s1 + $0x78] sm:$0xff]  ;;  %3446 = vmatpush.bf16.msra.mxu0 %v6893_v0  ;;  %v6900_v5 = vld [vmem:[%s9363_s1 + $0x70] sm:$0xff]  ;;  %v6899_v9 = vld [vmem:[%s9363_s1 + $0x68] sm:$0xff] }
   0x3   :  { %v6909_v2 = vld [vmem:[%s9363_s1 + $0xb8] sm:$0xff]  ;;  %3459 = vmatpush.bf16.msra.mxu1 %v6901_v1  ;;  %v6908_v6 = vld [vmem:[%s9363_s1 + $0xb0] sm:$0xff]  ;;  %v6907_v10 = vld [vmem:[%s9363_s1 + $0xa8] sm:$0xff] }
   0x4   :  { %v6917_v3 = vld [vmem:[%s9363_s1 + $0xf8] sm:$0xff]  ;;  %3472 = vmatpush.bf16.msra.mxu2 %v6909_v2  ;;  %v6916_v7 = vld [vmem:[%s9363_s1 + $0xf0] sm:$0xff]  ;;  %v6915_v11 = vld [vmem:[%s9363_s1 + $0xe8] sm:$0xff] }
   0x5   :  { %3485 = vmatpush.bf16.msra.mxu3 %v6917_v3  ;;  %v6890_v12 = vld [vmem:[%s9363_s1 + $0x20] sm:$0xff]  ;;  %v6889_v16 = vld [vmem:[%s9363_s1 + $0x18] sm:$0xff]  ;;  %v6888_v20 = vld [vmem:[%s9363_s1 + $0x10] sm:$0xff] }
   0x6   :  { %3447 = vmatpush.bf16.msra.mxu0 %v6892_v4  ;;  %v6898_v13 = vld [vmem:[%s9363_s1 + $0x60] sm:$0xff]  ;;  %v6897_v17 = vld [vmem:[%s9363_s1 + $0x58] sm:$0xff]  ;;  %v6896_v21 = vld [vmem:[%s9363_s1 + $0x50] sm:$0xff] }
   0x7   :  { %3460 = vmatpush.bf16.msra.mxu1 %v6900_v5  ;;  %v6906_v14 = vld [vmem:[%s9363_s1 + $0xa0] sm:$0xff]  ;;  %v6905_v18 = vld [vmem:[%s9363_s1 + $0x98] sm:$0xff]  ;;  %v6904_v22 = vld [vmem:[%s9363_s1 + $0x90] sm:$0xff] }
   0x8   :  { %3473 = vmatpush.bf16.msra.mxu2 %v6908_v6  ;;  %v6914_v15 = vld [vmem:[%s9363_s1 + $0xe0] sm:$0xff]  ;;  %v6913_v19 = vld [vmem:[%s9363_s1 + $0xd8] sm:$0xff]  ;;  %v6912_v23 = vld [vmem:[%s9363_s1 + $0xd0] sm:$0xff] }
   0x9   :  { %3486 = vmatpush.bf16.msra.mxu3 %v6916_v7 }
   0xa   :  { %3448 = vmatpush.bf16.msra.mxu0 %v6891_v8 }
   0xb   :  { %3461 = vmatpush.bf16.msra.mxu1 %v6899_v9 }
   0xc   :  { %3474 = vmatpush.bf16.msra.mxu2 %v6907_v10 }
   0xd   :  { %3487 = vmatpush.bf16.msra.mxu3 %v6915_v11 }
   0xe   :  { %3449 = vmatpush.bf16.msra.mxu0 %v6890_v12 }
   0xf   :  { %3462 = vmatpush.bf16.msra.mxu1 %v6898_v13 }
  0x10   :  { %3475 = vmatpush.bf16.msra.mxu2 %v6906_v14 }
  0x11   :  { %3488 = vmatpush.bf16.msra.mxu3 %v6914_v15 }
  0x12   :  { %3450 = vmatpush.bf16.msra.mxu0 %v6889_v16 }
  0x13   :  { %3463 = vmatpush.bf16.msra.mxu1 %v6897_v17 }
  0x14   :  { %3476 = vmatpush.bf16.msra.mxu2 %v6905_v18 }
  0x15   :  { %3489 = vmatpush.bf16.msra.mxu3 %v6913_v19 }
  0x16   :  { %19 = vsyncpa [#allocation5], 0  ;;  %3451 = vmatpush.bf16.msra.mxu0 %v6888_v20  ;;  %v6887_v24 = vld [vmem:[%s9363_s1 + $0x8] sm:$0xff]  ;;  %v42_v26 = vld [vmem:[%s9362_s0] sm:$0xff]  ;;  %s5201_s25 = sshll.u32 %s9373_s11, 4  ;;  %s5212_s28 = sshll.u32 %s9374_s12, 4  ;;  %s5202_s25 = int_to_ptr.hbm [resolvable:$true] %s5201_s25  ;;  %s5213_s28 = int_to_ptr.hbm [resolvable:$true] %s5212_s28 }
  0x17   :  { %3464 = vmatpush.bf16.msra.mxu1 %v6896_v21  ;;  %v6895_v25 = vld [vmem:[%s9363_s1 + $0x48] sm:$0xff]  ;;  %v896_v30 = vunpack.c.l.b16 %v42_v26  ;;  %v6886_v31 = vld [vmem:[%s9363_s1] sm:$0xff]  ;;  %v6925_v35 = vld [vmem:[%s9363_s1 + $0x138] sm:$0xff]  ;;  %v897_v36 = vunpack.c.h.b16 %v42_v26 }
  0x18   :  { %3477 = vmatpush.bf16.msra.mxu2 %v6904_v22  ;;  %v6903_v27 = vld [vmem:[%s9363_s1 + $0x88] sm:$0xff]  ;;  %v6894_v32 = vld [vmem:[%s9363_s1 + $0x40] sm:$0xff]  ;;  %v6933_v37 = vld [vmem:[%s9363_s1 + $0x178] sm:$0xff] }
  0x19   :  { %3490 = vmatpush.bf16.msra.mxu3 %v6912_v23  ;;  %v6911_v28 = vld [vmem:[%s9363_s1 + $0xc8] sm:$0xff]  ;;  %v6902_v34 = vld [vmem:[%s9363_s1 + $0x80] sm:$0xff]  ;;  %v6941_v38 = vld [vmem:[%s9363_s1 + $0x1b8] sm:$0xff]  ;;  %v946_v40 = vpack.c.b16 %v896_v30, %v896_v30  ;;  %v947_v45 = vpack.c.b16 %v897_v36, %v897_v36 }
  0x1a   :  { %v43_v29 = vld [vmem:[%s9362_s0 + $0x8] sm:$0xff]  ;;  %3452 = vmatpush.bf16.msra.mxu0 %v6887_v24  ;;  %v6910_v39 = vld [vmem:[%s9363_s1 + $0xc0] sm:$0xff]  ;;  %v6949_v42 = vld [vmem:[%s9363_s1 + $0x1f8] sm:$0xff] }
  0x1b   :  { %3465 = vmatpush.bf16.msra.mxu1 %v6895_v25  ;;  %v898_v33 = vunpack.c.l.b16 %v43_v29  ;;  %v899_v41 = vunpack.c.h.b16 %v43_v29  ;;  %v6924_v44 = vld [vmem:[%s9363_s1 + $0x130] sm:$0xff]  ;;  %v6923_v50 = vld [vmem:[%s9363_s1 + $0x128] sm:$0xff]  ;;  %v6922_v54 = vld [vmem:[%s9363_s1 + $0x120] sm:$0xff] }
  0x1c   :  { %3478 = vmatpush.bf16.msra.mxu2 %v6903_v27  ;;  %v6932_v46 = vld [vmem:[%s9363_s1 + $0x170] sm:$0xff]  ;;  %v6931_v51 = vld [vmem:[%s9363_s1 + $0x168] sm:$0xff]  ;;  %v6930_v55 = vld [vmem:[%s9363_s1 + $0x160] sm:$0xff] }
  0x1d   :  { %3491 = vmatpush.bf16.msra.mxu3 %v6911_v28  ;;  %v948_v43 = vpack.c.b16 %v898_v33, %v898_v33  ;;  %v6940_v47 = vld [vmem:[%s9363_s1 + $0x1b0] sm:$0xff]  ;;  %v949_v48 = vpack.c.b16 %v899_v41, %v899_v41  ;;  %v6939_v52 = vld [vmem:[%s9363_s1 + $0x1a8] sm:$0xff]  ;;  %v6938_v56 = vld [vmem:[%s9363_s1 + $0x1a0] sm:$0xff] }
  0x1e   :  { %3453 = vmatpush.bf16.msra.mxu0 %v6886_v31  ;;  %v6948_v49 = vld [vmem:[%s9363_s1 + $0x1f0] sm:$0xff]  ;;  %v6947_v53 = vld [vmem:[%s9363_s1 + $0x1e8] sm:$0xff]  ;;  %v6946_v57 = vld [vmem:[%s9363_s1 + $0x1e0] sm:$0xff] }
  0x1f   :  { %3466 = vmatpush.bf16.msra.mxu1 %v6894_v32  ;;  %v6921_v58 = vld [vmem:[%s9363_s1 + $0x118] sm:$0xff]  ;;  %v6920_v62 = vld [vmem:[%s9363_s1 + $0x110] sm:$0xff]  ;;  %v6919_v2 = vld [vmem:[%s9363_s1 + $0x108] sm:$0xff] }
  0x20   :  { %3479 = vmatpush.bf16.msra.mxu2 %v6902_v34  ;;  %v6929_v59 = vld [vmem:[%s9363_s1 + $0x158] sm:$0xff]  ;;  %v6928_v63 = vld [vmem:[%s9363_s1 + $0x150] sm:$0xff]  ;;  %v6927_v3 = vld [vmem:[%s9363_s1 + $0x148] sm:$0xff] }
  0x21   :  { %3492 = vmatpush.bf16.msra.mxu3 %v6910_v39  ;;  %3454 = vmatmul.bf16.vlgmr.msra.gmra.mxu0 %v946_v40  ;;  %v6937_v60 = vld [vmem:[%s9363_s1 + $0x198] sm:$0xff]  ;;  %v6936_v0 = vld [vmem:[%s9363_s1 + $0x190] sm:$0xff]  ;;  %v6935_v4 = vld [vmem:[%s9363_s1 + $0x188] sm:$0xff] }
  0x22   :  { %3498 = vmatpush.bf16.msrb.mxu0 %v6925_v35  ;;  %3467 = vmatmul.bf16.vlgmr.msra.gmra.mxu1 %v947_v45  ;;  %v6945_v61 = vld [vmem:[%s9363_s1 + $0x1d8] sm:$0xff]  ;;  %v6944_v1 = vld [vmem:[%s9363_s1 + $0x1d0] sm:$0xff]  ;;  %v6943_v7 = vld [vmem:[%s9363_s1 + $0x1c8] sm:$0xff] }
  0x23   :  { %3511 = vmatpush.bf16.msrb.mxu1 %v6933_v37  ;;  %3480 = vmatmul.bf16.vlgmr.msra.gmra.mxu2 %v948_v43  ;;  %v45_v5 = vld [vmem:[%s9362_s0 + $0x18] sm:$0xff]  ;;  %v44_v6 = vld [vmem:[%s9362_s0 + $0x10] sm:$0xff]  ;;  %v6918_v8 = vld [vmem:[%s9363_s1 + $0x100] sm:$0xff] }
  0x24   :  { %3524 = vmatpush.bf16.msrb.mxu2 %v6941_v38  ;;  %3493 = vmatmul.bf16.vlgmr.msra.gmra.mxu3 %v949_v48  ;;  %v902_v9 = vunpack.c.l.b16 %v45_v5  ;;  %v6926_v10 = vld [vmem:[%s9363_s1 + $0x140] sm:$0xff]  ;;  %v900_v12 = vunpack.c.l.b16 %v44_v6  ;;  %v901_v13 = vunpack.c.h.b16 %v44_v6  ;;  %v6957_v14 = vld [vmem:[%s9363_s1 + $0x238] sm:$0xff]  ;;  %v903_v18 = vunpack.c.h.b16 %v45_v5  ;;  %v6956_v23 = vld [vmem:[%s9363_s1 + $0x230] sm:$0xff] }
  0x25   :  { %3537 = vmatpush.bf16.msrb.mxu3 %v6949_v42  ;;  %v6934_v11 = vld [vmem:[%s9363_s1 + $0x180] sm:$0xff]  ;;  %v6965_v15 = vld [vmem:[%s9363_s1 + $0x278] sm:$0xff]  ;;  %v6964_v24 = vld [vmem:[%s9363_s1 + $0x270] sm:$0xff] }
  0x26   :  { %3499 = vmatpush.bf16.msrb.mxu0 %v6924_v44  ;;  %v6973_v16 = vld [vmem:[%s9363_s1 + $0x2b8] sm:$0xff]  ;;  %v6942_v17 = vld [vmem:[%s9363_s1 + $0x1c0] sm:$0xff]  ;;  %v952_v20 = vpack.c.b16 %v902_v9, %v902_v9  ;;  %v950_v21 = vpack.c.b16 %v900_v12, %v900_v12  ;;  %v951_v22 = vpack.c.b16 %v901_v13, %v901_v13  ;;  %v6972_v25 = vld [vmem:[%s9363_s1 + $0x2b0] sm:$0xff]  ;;  %v953_v26 = vpack.c.b16 %v903_v18, %v903_v18 }
  0x27   :  { %3512 = vmatpush.bf16.msrb.mxu1 %v6932_v46  ;;  %v6981_v19 = vld [vmem:[%s9363_s1 + $0x2f8] sm:$0xff]  ;;  %v6980_v27 = vld [vmem:[%s9363_s1 + $0x2f0] sm:$0xff]  ;;  %v6955_v28 = vld [vmem:[%s9363_s1 + $0x228] sm:$0xff] }
  0x28   :  { %3525 = vmatpush.bf16.msrb.mxu2 %v6940_v47  ;;  %v6963_v29 = vld [vmem:[%s9363_s1 + $0x268] sm:$0xff]  ;;  %v6954_v32 = vld [vmem:[%s9363_s1 + $0x220] sm:$0xff]  ;;  %v6953_v36 = vld [vmem:[%s9363_s1 + $0x218] sm:$0xff] }
  0x29   :  { %3538 = vmatpush.bf16.msrb.mxu3 %v6948_v49  ;;  %v6971_v30 = vld [vmem:[%s9363_s1 + $0x2a8] sm:$0xff]  ;;  %v6962_v33 = vld [vmem:[%s9363_s1 + $0x260] sm:$0xff]  ;;  %v6961_v37 = vld [vmem:[%s9363_s1 + $0x258] sm:$0xff] }
  0x2a   :  { %3500 = vmatpush.bf16.msrb.mxu0 %v6923_v50  ;;  %v6979_v31 = vld [vmem:[%s9363_s1 + $0x2e8] sm:$0xff]  ;;  %v6970_v34 = vld [vmem:[%s9363_s1 + $0x2a0] sm:$0xff]  ;;  %v6969_v38 = vld [vmem:[%s9363_s1 + $0x298] sm:$0xff] }
  0x2b   :  { %3513 = vmatpush.bf16.msrb.mxu1 %v6931_v51  ;;  %v6978_v35 = vld [vmem:[%s9363_s1 + $0x2e0] sm:$0xff]  ;;  %v6977_v39 = vld [vmem:[%s9363_s1 + $0x2d8] sm:$0xff]  ;;  %v6952_v40 = vld [vmem:[%s9363_s1 + $0x210] sm:$0xff] }
  0x2c   :  { %3526 = vmatpush.bf16.msrb.mxu2 %v6939_v52  ;;  %v6960_v41 = vld [vmem:[%s9363_s1 + $0x250] sm:$0xff]  ;;  %v6951_v44 = vld [vmem:[%s9363_s1 + $0x208] sm:$0xff]  ;;  %v46_v46 = vld [vmem:[%s9362_s0 + $0x20] sm:$0xff] }
  0x2d   :  { %3539 = vmatpush.bf16.msrb.mxu3 %v6947_v53  ;;  %v6968_v42 = vld [vmem:[%s9363_s1 + $0x290] sm:$0xff]  ;;  %v6959_v45 = vld [vmem:[%s9363_s1 + $0x248] sm:$0xff]  ;;  %v904_v50 = vunpack.c.l.b16 %v46_v46  ;;  %v6950_v51 = vld [vmem:[%s9363_s1 + $0x200] sm:$0xff] }
  0x2e   :  { %3501 = vmatpush.bf16.msrb.mxu0 %v6922_v54  ;;  %v6976_v43 = vld [vmem:[%s9363_s1 + $0x2d0] sm:$0xff]  ;;  %v6967_v47 = vld [vmem:[%s9363_s1 + $0x288] sm:$0xff]  ;;  %v6958_v52 = vld [vmem:[%s9363_s1 + $0x240] sm:$0xff] }
  0x2f   :  { %3514 = vmatpush.bf16.msrb.mxu1 %v6930_v55  ;;  %v47_v48 = vld [vmem:[%s9362_s0 + $0x28] sm:$0xff]  ;;  %v6966_v54 = vld [vmem:[%s9363_s1 + $0x280] sm:$0xff]  ;;  %v6989_v55 = vld [vmem:[%s9363_s1 + $0x338] sm:$0xff] }
  0x30   :  { %3527 = vmatpush.bf16.msrb.mxu2 %v6938_v56  ;;  %v6975_v49 = vld [vmem:[%s9363_s1 + $0x2c8] sm:$0xff]  ;;  %v906_v53 = vunpack.c.l.b16 %v47_v48  ;;  %v905_v56 = vunpack.c.h.b16 %v46_v46  ;;  %v7012_v5 = vld [vmem:[%s9363_s1 + $0x3f0] sm:$0xff]  ;;  %v7002_v12 = vld [vmem:[%s9363_s1 + $0x3a0] sm:$0xff] }
  0x31   :  { %3540 = vmatpush.bf16.msrb.mxu3 %v6946_v57  ;;  %v6997_v57 = vld [vmem:[%s9363_s1 + $0x378] sm:$0xff]  ;;  %v6987_v6 = vld [vmem:[%s9363_s1 + $0x328] sm:$0xff]  ;;  %v7010_v13 = vld [vmem:[%s9363_s1 + $0x3e0] sm:$0xff] }
  0x32   :  { %3502 = vmatpush.bf16.msrb.mxu0 %v6921_v58  ;;  %v7005_v58 = vld [vmem:[%s9363_s1 + $0x3b8] sm:$0xff]  ;;  %v7011_v9 = vld [vmem:[%s9363_s1 + $0x3e8] sm:$0xff]  ;;  %v6984_v18 = vld [vmem:[%s9363_s1 + $0x310] sm:$0xff] }
  0x33   :  { %3515 = vmatpush.bf16.msrb.mxu1 %v6929_v59  ;;  %v907_v59 = vunpack.c.h.b16 %v47_v48  ;;  %v7036_v46 = vld [vmem:[%s9363_s1 + $0x4b0] sm:$0xff]  ;;  %v7019_v48 = vld [vmem:[%s9363_s1 + $0x428] sm:$0xff] }
  0x34   :  { %3528 = vmatpush.bf16.msrb.mxu2 %v6937_v60  ;;  %v6974_v60 = vld [vmem:[%s9363_s1 + $0x2c0] sm:$0xff] }
  0x35   :  { %3541 = vmatpush.bf16.msrb.mxu3 %v6945_v61  ;;  %v954_v61 = vpack.c.b16 %v904_v50, %v904_v50  ;;  %v7035_v50 = vld [vmem:[%s9363_s1 + $0x4a8] sm:$0xff] }
  0x36   :  { %3503 = vmatpush.bf16.msrb.mxu0 %v6920_v62  ;;  %v956_v62 = vpack.c.b16 %v906_v53, %v906_v53  ;;  %v7026_v53 = vld [vmem:[%s9363_s1 + $0x460] sm:$0xff] }
  0x37   :  { %3516 = vmatpush.bf16.msrb.mxu1 %v6928_v63  ;;  %v7013_v63 = vld [vmem:[%s9363_s1 + $0x3f8] sm:$0xff] }
  0x38   :  { %3529 = vmatpush.bf16.msrb.mxu2 %v6936_v0  ;;  %v955_v0 = vpack.c.b16 %v905_v56, %v905_v56  ;;  %v7017_v56 = vld [vmem:[%s9363_s1 + $0x418] sm:$0xff] }
  0x39   :  { %3542 = vmatpush.bf16.msrb.mxu3 %v6944_v1  ;;  %v6988_v1 = vld [vmem:[%s9363_s1 + $0x330] sm:$0xff] }
  0x3a   :  { %3504 = vmatpush.bf16.msrb.mxu0 %v6919_v2  ;;  %v957_v2 = vpack.c.b16 %v907_v59, %v907_v59  ;;  %v7041_v59 = vld [vmem:[%s9363_s1 + $0x4d8] sm:$0xff] }
  0x3b   :  { %3517 = vmatpush.bf16.msrb.mxu1 %v6927_v3  ;;  %v6996_v3 = vld [vmem:[%s9363_s1 + $0x370] sm:$0xff] }
  0x3c   :  { %3530 = vmatpush.bf16.msrb.mxu2 %v6935_v4  ;;  %v7004_v4 = vld [vmem:[%s9363_s1 + $0x3b0] sm:$0xff] }
  0x3d   :  { %3543 = vmatpush.bf16.msrb.mxu3 %v6943_v7  ;;  %v6995_v7 = vld [vmem:[%s9363_s1 + $0x368] sm:$0xff] }
  0x3e   :  { %3505 = vmatpush.bf16.msrb.mxu0 %v6918_v8  ;;  %v7003_v8 = vld [vmem:[%s9363_s1 + $0x3a8] sm:$0xff] }
  0x3f   :  { %3518 = vmatpush.bf16.msrb.mxu1 %v6926_v10  ;;  %v6986_v10 = vld [vmem:[%s9363_s1 + $0x320] sm:$0xff] }
  0x40   :  { %3531 = vmatpush.bf16.msrb.mxu2 %v6934_v11  ;;  %v6994_v11 = vld [vmem:[%s9363_s1 + $0x360] sm:$0xff] }
  0x41   :  { %3544 = vmatpush.bf16.msrb.mxu3 %v6942_v17  ;;  %3506 = vmatmul.bf16.vlgmr.msrb.gmra.mxu0 %v950_v21  ;;  %v7009_v17 = vld [vmem:[%s9363_s1 + $0x3d8] sm:$0xff]  ;;  %v7008_v21 = vld [vmem:[%s9363_s1 + $0x3d0] sm:$0xff] }
  0x42   :  { %3550 = vmatpush.bf16.msra.mxu0 %v6957_v14  ;;  %3519 = vmatmul.bf16.vlgmr.msrb.gmra.mxu1 %v951_v22  ;;  %v6985_v14 = vld [vmem:[%s9363_s1 + $0x318] sm:$0xff]  ;;  %v6983_v22 = vld [vmem:[%s9363_s1 + $0x308] sm:$0xff] }
  0x43   :  { %3563 = vmatpush.bf16.msra.mxu1 %v6965_v15  ;;  %3532 = vmatmul.bf16.vlgmr.msrb.gmra.mxu2 %v952_v20  ;;  %v6993_v15 = vld [vmem:[%s9363_s1 + $0x358] sm:$0xff]  ;;  %v7000_v20 = vld [vmem:[%s9363_s1 + $0x390] sm:$0xff] }
  0x44   :  { %3576 = vmatpush.bf16.msra.mxu2 %v6973_v16  ;;  %3545 = vmatmul.bf16.vlgmr.msrb.gmra.mxu3 %v953_v26  ;;  %v7001_v16 = vld [vmem:[%s9363_s1 + $0x398] sm:$0xff] }
  0x45   :  { %3589 = vmatpush.bf16.msra.mxu3 %v6981_v19  ;;  %v6992_v19 = vld [vmem:[%s9363_s1 + $0x350] sm:$0xff]  ;;  %v49_v26 = vld [vmem:[%s9362_s0 + $0x38] sm:$0xff] }
  0x46   :  { %3551 = vmatpush.bf16.msra.mxu0 %v6956_v23  ;;  %v6991_v23 = vld [vmem:[%s9363_s1 + $0x348] sm:$0xff] }
  0x47   :  { %3564 = vmatpush.bf16.msra.mxu1 %v6964_v24  ;;  %v48_v24 = vld [vmem:[%s9362_s0 + $0x30] sm:$0xff] }
  0x48   :  { %3577 = vmatpush.bf16.msra.mxu2 %v6972_v25  ;;  %v6999_v25 = vld [vmem:[%s9363_s1 + $0x388] sm:$0xff] }
  0x49   :  { %3590 = vmatpush.bf16.msra.mxu3 %v6980_v27  ;;  %v7007_v27 = vld [vmem:[%s9363_s1 + $0x3c8] sm:$0xff] }
  0x4a   :  { %3552 = vmatpush.bf16.msra.mxu0 %v6955_v28  ;;  %v6982_v28 = vld [vmem:[%s9363_s1 + $0x300] sm:$0xff] }
  0x4b   :  { %3565 = vmatpush.bf16.msra.mxu1 %v6963_v29  ;;  %v908_v29 = vunpack.c.l.b16 %v48_v24 }
  0x4c   :  { %3578 = vmatpush.bf16.msra.mxu2 %v6971_v30  ;;  %v6990_v30 = vld [vmem:[%s9363_s1 + $0x340] sm:$0xff] }
  0x4d   :  { %3591 = vmatpush.bf16.msra.mxu3 %v6979_v31  ;;  %v7021_v31 = vld [vmem:[%s9363_s1 + $0x438] sm:$0xff] }
  0x4e   :  { %3553 = vmatpush.bf16.msra.mxu0 %v6954_v32  ;;  %v910_v32 = vunpack.c.l.b16 %v49_v26 }
  0x4f   :  { %3566 = vmatpush.bf16.msra.mxu1 %v6962_v33  ;;  %v909_v33 = vunpack.c.h.b16 %v48_v24  ;;  %v7068_v24 = vld [vmem:[%s9363_s1 + $0x5b0] sm:$0xff] }
  0x50   :  { %3579 = vmatpush.bf16.msra.mxu2 %v6970_v34  ;;  %v6998_v34 = vld [vmem:[%s9363_s1 + $0x380] sm:$0xff] }
  0x51   :  { %3592 = vmatpush.bf16.msra.mxu3 %v6978_v35  ;;  %v7029_v35 = vld [vmem:[%s9363_s1 + $0x478] sm:$0xff] }
  0x52   :  { %3554 = vmatpush.bf16.msra.mxu0 %v6953_v36  ;;  %v911_v36 = vunpack.c.h.b16 %v49_v26  ;;  %v7051_v26 = vld [vmem:[%s9363_s1 + $0x528] sm:$0xff] }
  0x53   :  { %3567 = vmatpush.bf16.msra.mxu1 %v6961_v37  ;;  %v7037_v37 = vld [vmem:[%s9363_s1 + $0x4b8] sm:$0xff] }
  0x54   :  { %3580 = vmatpush.bf16.msra.mxu2 %v6969_v38  ;;  %v7006_v38 = vld [vmem:[%s9363_s1 + $0x3c0] sm:$0xff] }
  0x55   :  { %3593 = vmatpush.bf16.msra.mxu3 %v6977_v39  ;;  %v958_v39 = vpack.c.b16 %v908_v29, %v908_v29  ;;  %v7289_v29 = vld [vmem:[%s9364_s2] ss:$0 sm:$0xff] }
  0x56   :  { %3555 = vmatpush.bf16.msra.mxu0 %v6952_v40  ;;  %v7045_v40 = vld [vmem:[%s9363_s1 + $0x4f8] sm:$0xff] }
  0x57   :  { %3568 = vmatpush.bf16.msra.mxu1 %v6960_v41  ;;  %v960_v41 = vpack.c.b16 %v910_v32, %v910_v32 }
  0x58   :  { %3581 = vmatpush.bf16.msra.mxu2 %v6968_v42  ;;  %v959_v42 = vpack.c.b16 %v909_v33, %v909_v33  ;;  %v7058_v33 = vld [vmem:[%s9363_s1 + $0x560] sm:$0xff] }
  0x59   :  { %3594 = vmatpush.bf16.msra.mxu3 %v6976_v43  ;;  %v961_v43 = vpack.c.b16 %v911_v36, %v911_v36 }
  0x5a   :  { %3556 = vmatpush.bf16.msra.mxu0 %v6951_v44  ;;  %v7020_v44 = vld [vmem:[%s9363_s1 + $0x430] sm:$0xff] }
  0x5b   :  { %3569 = vmatpush.bf16.msra.mxu1 %v6959_v45  ;;  %v7028_v45 = vld [vmem:[%s9363_s1 + $0x470] sm:$0xff] }
  0x5c   :  { %3582 = vmatpush.bf16.msra.mxu2 %v6967_v47  ;;  %v7044_v47 = vld [vmem:[%s9363_s1 + $0x4f0] sm:$0xff] }
  0x5d   :  { %3595 = vmatpush.bf16.msra.mxu3 %v6975_v49  ;;  %v7027_v49 = vld [vmem:[%s9363_s1 + $0x468] sm:$0xff] }
  0x5e   :  { %3557 = vmatpush.bf16.msra.mxu0 %v6950_v51  ;;  %v7043_v51 = vld [vmem:[%s9363_s1 + $0x4e8] sm:$0xff] }
  0x5f   :  { %3570 = vmatpush.bf16.msra.mxu1 %v6958_v52  ;;  %v7018_v52 = vld [vmem:[%s9363_s1 + $0x420] sm:$0xff] }
  0x60   :  { %3583 = vmatpush.bf16.msra.mxu2 %v6966_v54  ;;  %v7034_v54 = vld [vmem:[%s9363_s1 + $0x4a0] sm:$0xff] }
  0x61   :  { %3596 = vmatpush.bf16.msra.mxu3 %v6974_v60  ;;  %3558 = vmatmul.bf16.vlgmr.msra.gmra.mxu0 %v954_v61  ;;  %v7016_v60 = vld [vmem:[%s9363_s1 + $0x410] sm:$0xff] }
  0x62   :  { %3602 = vmatpush.bf16.msrb.mxu0 %v6989_v55  ;;  %3571 = vmatmul.bf16.vlgmr.msra.gmra.mxu1 %v955_v0  ;;  %v7042_v55 = vld [vmem:[%s9363_s1 + $0x4e0] sm:$0xff]  ;;  %v7024_v61 = vld [vmem:[%s9363_s1 + $0x450] sm:$0xff]  ;;  %v7015_v0 = vld [vmem:[%s9363_s1 + $0x408] sm:$0xff] }
  0x63   :  { %3615 = vmatpush.bf16.msrb.mxu1 %v6997_v57  ;;  %3584 = vmatmul.bf16.vlgmr.msra.gmra.mxu2 %v956_v62  ;;  %v7025_v57 = vld [vmem:[%s9363_s1 + $0x458] sm:$0xff]  ;;  %v7032_v62 = vld [vmem:[%s9363_s1 + $0x490] sm:$0xff] }
  0x64   :  { %3628 = vmatpush.bf16.msrb.mxu2 %v7005_v58  ;;  %3597 = vmatmul.bf16.vlgmr.msra.gmra.mxu3 %v957_v2  ;;  %v7033_v58 = vld [vmem:[%s9363_s1 + $0x498] sm:$0xff]  ;;  %v7031_v2 = vld [vmem:[%s9363_s1 + $0x488] sm:$0xff] }
  0x65   :  { %3641 = vmatpush.bf16.msrb.mxu3 %v7013_v63  ;;  %v7040_v63 = vld [vmem:[%s9363_s1 + $0x4d0] sm:$0xff] }
  0x66   :  { %3603 = vmatpush.bf16.msrb.mxu0 %v6988_v1  ;;  %v7023_v1 = vld [vmem:[%s9363_s1 + $0x448] sm:$0xff] }
  0x67   :  { %3616 = vmatpush.bf16.msrb.mxu1 %v6996_v3  ;;  %v50_v3 = vld [vmem:[%s9362_s0 + $0x40] sm:$0xff] }
  0x68   :  { %3629 = vmatpush.bf16.msrb.mxu2 %v7004_v4  ;;  %v51_v4 = vld [vmem:[%s9362_s0 + $0x48] sm:$0xff] }
  0x69   :  { %3642 = vmatpush.bf16.msrb.mxu3 %v7012_v5  ;;  %v7039_v5 = vld [vmem:[%s9363_s1 + $0x4c8] sm:$0xff] }
  0x6a   :  { %3604 = vmatpush.bf16.msrb.mxu0 %v6987_v6  ;;  %v7014_v6 = vld [vmem:[%s9363_s1 + $0x400] sm:$0xff] }
  0x6b   :  { %3617 = vmatpush.bf16.msrb.mxu1 %v6995_v7  ;;  %v912_v7 = vunpack.c.l.b16 %v50_v3 }
  0x6c   :  { %3630 = vmatpush.bf16.msrb.mxu2 %v7003_v8  ;;  %v914_v8 = vunpack.c.l.b16 %v51_v4 }
  0x6d   :  { %3643 = vmatpush.bf16.msrb.mxu3 %v7011_v9  ;;  %v7022_v9 = vld [vmem:[%s9363_s1 + $0x440] sm:$0xff] }
  0x6e   :  { %3605 = vmatpush.bf16.msrb.mxu0 %v6986_v10  ;;  %v7030_v10 = vld [vmem:[%s9363_s1 + $0x480] sm:$0xff] }
  0x6f   :  { %3618 = vmatpush.bf16.msrb.mxu1 %v6994_v11  ;;  %v913_v11 = vunpack.c.h.b16 %v50_v3 }
  0x70   :  { %3631 = vmatpush.bf16.msrb.mxu2 %v7002_v12  ;;  %v7053_v12 = vld [vmem:[%s9363_s1 + $0x538] sm:$0xff] }
  0x71   :  { %3644 = vmatpush.bf16.msrb.mxu3 %v7010_v13  ;;  %v7061_v13 = vld [vmem:[%s9363_s1 + $0x578] sm:$0xff] }
  0x72   :  { %3606 = vmatpush.bf16.msrb.mxu0 %v6985_v14  ;;  %v915_v14 = vunpack.c.h.b16 %v51_v4  ;;  %v7101_v4 = vld [vmem:[%s9363_s1 + $0x6b8] sm:$0xff] }
  0x73   :  { %3619 = vmatpush.bf16.msrb.mxu1 %v6993_v15  ;;  %v7069_v15 = vld [vmem:[%s9363_s1 + $0x5b8] sm:$0xff] }
  0x74   :  { %3632 = vmatpush.bf16.msrb.mxu2 %v7001_v16  ;;  %v7038_v16 = vld [vmem:[%s9363_s1 + $0x4c0] sm:$0xff] }
  0x75   :  { %3645 = vmatpush.bf16.msrb.mxu3 %v7009_v17  ;;  %v962_v17 = vpack.c.b16 %v912_v7, %v912_v7 }
  0x76   :  { %3607 = vmatpush.bf16.msrb.mxu0 %v6984_v18  ;;  %v964_v18 = vpack.c.b16 %v914_v8, %v914_v8  ;;  %v7109_v8 = vld [vmem:[%s9363_s1 + $0x6f8] sm:$0xff] }
  0x77   :  { %3620 = vmatpush.bf16.msrb.mxu1 %v6992_v19  ;;  %v7077_v19 = vld [vmem:[%s9363_s1 + $0x5f8] sm:$0xff] }
  0x78   :  { %3633 = vmatpush.bf16.msrb.mxu2 %v7000_v20  ;;  %v963_v20 = vpack.c.b16 %v913_v11, %v913_v11  ;;  %v7084_v11 = vld [vmem:[%s9363_s1 + $0x630] sm:$0xff] }
  0x79   :  { %3646 = vmatpush.bf16.msrb.mxu3 %v7008_v21  ;;  %v965_v21 = vpack.c.b16 %v915_v14, %v915_v14  ;;  %v7108_v14 = vld [vmem:[%s9363_s1 + $0x6f0] sm:$0xff] }
  0x7a   :  { %3608 = vmatpush.bf16.msrb.mxu0 %v6983_v22  ;;  %v7052_v22 = vld [vmem:[%s9363_s1 + $0x530] sm:$0xff] }
  0x7b   :  { %3621 = vmatpush.bf16.msrb.mxu1 %v6991_v23  ;;  %v7060_v23 = vld [vmem:[%s9363_s1 + $0x570] sm:$0xff] }
  0x7c   :  { %3634 = vmatpush.bf16.msrb.mxu2 %v6999_v25  ;;  %v7076_v25 = vld [vmem:[%s9363_s1 + $0x5f0] sm:$0xff] }
  0x7d   :  { %3647 = vmatpush.bf16.msrb.mxu3 %v7007_v27  ;;  %v7059_v27 = vld [vmem:[%s9363_s1 + $0x568] sm:$0xff] }
  0x7e   :  { %3609 = vmatpush.bf16.msrb.mxu0 %v6982_v28  ;;  %v7067_v28 = vld [vmem:[%s9363_s1 + $0x5a8] sm:$0xff] }
  0x7f   :  { %3622 = vmatpush.bf16.msrb.mxu1 %v6990_v30  ;;  %v7075_v30 = vld [vmem:[%s9363_s1 + $0x5e8] sm:$0xff] }
  0x80   :  { %3635 = vmatpush.bf16.msrb.mxu2 %v6998_v34  ;;  %v7066_v34 = vld [vmem:[%s9363_s1 + $0x5a0] sm:$0xff] }
  0x81   :  { %3648 = vmatpush.bf16.msrb.mxu3 %v7006_v38  ;;  %3610 = vmatmul.bf16.vlgmr.msrb.gmra.mxu0 %v958_v39  ;;  %v7049_v39 = vld [vmem:[%s9363_s1 + $0x518] sm:$0xff] }
  0x82   :  { %3654 = vmatpush.bf16.msra.mxu0 %v7021_v31  ;;  %3623 = vmatmul.bf16.vlgmr.msrb.gmra.mxu1 %v959_v42  ;;  %v7050_v31 = vld [vmem:[%s9363_s1 + $0x520] sm:$0xff]  ;;  %v7073_v42 = vld [vmem:[%s9363_s1 + $0x5d8] sm:$0xff] }
  0x83   :  { %3667 = vmatpush.bf16.msra.mxu1 %v7029_v35  ;;  %3636 = vmatmul.bf16.vlgmr.msrb.gmra.mxu2 %v960_v41  ;;  %v7065_v41 = vld [vmem:[%s9363_s1 + $0x598] sm:$0xff] }
  0x84   :  { %3680 = vmatpush.bf16.msra.mxu2 %v7037_v37  ;;  %3649 = vmatmul.bf16.vlgmr.msrb.gmra.mxu3 %v961_v43  ;;  %v7074_v37 = vld [vmem:[%s9363_s1 + $0x5e0] sm:$0xff] }
  0x85   :  { %3693 = vmatpush.bf16.msra.mxu3 %v7045_v40  ;;  %v7057_v40 = vld [vmem:[%s9363_s1 + $0x558] sm:$0xff] }
  0x86   :  { %3655 = vmatpush.bf16.msra.mxu0 %v7020_v44  ;;  %v7048_v44 = vld [vmem:[%s9363_s1 + $0x510] sm:$0xff] }
  0x87   :  { %3668 = vmatpush.bf16.msra.mxu1 %v7028_v45 }
  0x88   :  { %3681 = vmatpush.bf16.msra.mxu2 %v7036_v46  ;;  %v7056_v46 = vld [vmem:[%s9363_s1 + $0x550] sm:$0xff] }
  0x89   :  { %3694 = vmatpush.bf16.msra.mxu3 %v7044_v47  ;;  %v7064_v47 = vld [vmem:[%s9363_s1 + $0x590] sm:$0xff] }
  0x8a   :  { %3656 = vmatpush.bf16.msra.mxu0 %v7019_v48 }
  0x8b   :  { %3669 = vmatpush.bf16.msra.mxu1 %v7027_v49 }
  0x8c   :  { %3682 = vmatpush.bf16.msra.mxu2 %v7035_v50  ;;  %v7072_v50 = vld [vmem:[%s9363_s1 + $0x5d0] sm:$0xff] }
  0x8d   :  { %3695 = vmatpush.bf16.msra.mxu3 %v7043_v51  ;;  %v7047_v51 = vld [vmem:[%s9363_s1 + $0x508] sm:$0xff] }
  0x8e   :  { %3657 = vmatpush.bf16.msra.mxu0 %v7018_v52  ;;  %v7055_v52 = vld [vmem:[%s9363_s1 + $0x548] sm:$0xff] }
  0x8f   :  { %3670 = vmatpush.bf16.msra.mxu1 %v7026_v53  ;;  %v7063_v53 = vld [vmem:[%s9363_s1 + $0x588] sm:$0xff] }
  0x90   :  { %3683 = vmatpush.bf16.msra.mxu2 %v7034_v54  ;;  %v52_v54 = vld [vmem:[%s9362_s0 + $0x50] sm:$0xff] }
  0x91   :  { %3696 = vmatpush.bf16.msra.mxu3 %v7042_v55  ;;  %v53_v55 = vld [vmem:[%s9362_s0 + $0x58] sm:$0xff] }
  0x92   :  { %3658 = vmatpush.bf16.msra.mxu0 %v7017_v56  ;;  %v7071_v56 = vld [vmem:[%s9363_s1 + $0x5c8] sm:$0xff] }
  0x93   :  { %3671 = vmatpush.bf16.msra.mxu1 %v7025_v57 }
  0x94   :  { %3684 = vmatpush.bf16.msra.mxu2 %v7033_v58  ;;  %v7046_v58 = vld [vmem:[%s9363_s1 + $0x500] sm:$0xff] }
  0x95   :  { %3697 = vmatpush.bf16.msra.mxu3 %v7041_v59  ;;  %v916_v59 = vunpack.c.l.b16 %v52_v54 }
  0x96   :  { %3659 = vmatpush.bf16.msra.mxu0 %v7016_v60  ;;  %v918_v60 = vunpack.c.l.b16 %v53_v55 }
  0x97   :  { %3672 = vmatpush.bf16.msra.mxu1 %v7024_v61  ;;  %v7054_v61 = vld [vmem:[%s9363_s1 + $0x540] sm:$0xff] }
  0x98   :  { %3685 = vmatpush.bf16.msra.mxu2 %v7032_v62  ;;  %v7062_v62 = vld [vmem:[%s9363_s1 + $0x580] sm:$0xff]  ;;  %v968_v7 = vpack.c.b16 %v918_v60, %v918_v60 }
  0x99   :  { %3698 = vmatpush.bf16.msra.mxu3 %v7040_v63  ;;  %v917_v63 = vunpack.c.h.b16 %v52_v54  ;;  %v7117_v54 = vld [vmem:[%s9363_s1 + $0x738] sm:$0xff] }
  0x9a   :  { %3660 = vmatpush.bf16.msra.mxu0 %v7015_v0  ;;  %v7085_v0 = vld [vmem:[%s9363_s1 + $0x638] sm:$0xff] }
  0x9b   :  { %3673 = vmatpush.bf16.msra.mxu1 %v7023_v1  ;;  %v7093_v1 = vld [vmem:[%s9363_s1 + $0x678] sm:$0xff] }
  0x9c   :  { %3686 = vmatpush.bf16.msra.mxu2 %v7031_v2  ;;  %v919_v2 = vunpack.c.h.b16 %v53_v55  ;;  %v7125_v55 = vld [vmem:[%s9363_s1 + $0x778] sm:$0xff] }
  0x9d   :  { %3699 = vmatpush.bf16.msra.mxu3 %v7039_v5  ;;  %v7070_v5 = vld [vmem:[%s9363_s1 + $0x5c0] sm:$0xff] }
  0x9e   :  { %3661 = vmatpush.bf16.msra.mxu0 %v7014_v6  ;;  %v3455_v32 = vpop.f32.mrf.mxu0  ;;  %v966_v6 = vpack.c.b16 %v916_v59, %v916_v59 }
  0x9f   :  { %3674 = vmatpush.bf16.msra.mxu1 %v7022_v9  ;;  %v3456_v35 = vadd.f32 %v7289_v29, %v3455_v32  ;;  %v3468_v36 = vpop.f32.mrf.mxu1  ;;  %v967_v9 = vpack.c.b16 %v917_v63, %v917_v63  ;;  %v7105_v29 = vld [vmem:[%s9363_s1 + $0x6d8] sm:$0xff]  ;;  %v7096_v32 = vld [vmem:[%s9363_s1 + $0x690] sm:$0xff] }
  0xa0   :  { %3687 = vmatpush.bf16.msra.mxu2 %v7030_v10  ;;  %v969_v10 = vpack.c.b16 %v919_v2, %v919_v2  ;;  %v7132_v2 = vld [vmem:[%s9363_s1 + $0x7b0] sm:$0xff] }
  0xa1   :  { %3700 = vmatpush.bf16.msra.mxu3 %v7038_v16  ;;  %3662 = vmatmul.bf16.vlgmr.msra.gmra.mxu0 %v962_v17  ;;  %v7986_v38 = vadd.f32 %v3468_v36, %v3456_v35  ;;  %v7091_v16 = vld [vmem:[%s9363_s1 + $0x668] sm:$0xff]  ;;  %v7104_v36 = vld [vmem:[%s9363_s1 + $0x6d0] sm:$0xff] }
  0xa2   :  { %3706 = vmatpush.bf16.msrb.mxu0 %v7053_v12  ;;  %3675 = vmatmul.bf16.vlgmr.msra.gmra.mxu1 %v963_v20  ;;  %v7092_v12 = vld [vmem:[%s9363_s1 + $0x670] sm:$0xff]  ;;  %v7099_v17 = vld [vmem:[%s9363_s1 + $0x6a8] sm:$0xff]  ;;  %v7090_v20 = vld [vmem:[%s9363_s1 + $0x660] sm:$0xff] }
  0xa3   :  { %3719 = vmatpush.bf16.msrb.mxu1 %v7061_v13  ;;  %3688 = vmatmul.bf16.vlgmr.msra.gmra.mxu2 %v964_v18  ;;  %v7100_v13 = vld [vmem:[%s9363_s1 + $0x6b0] sm:$0xff]  ;;  %v7107_v18 = vld [vmem:[%s9363_s1 + $0x6e8] sm:$0xff] }
  0xa4   :  { %3732 = vmatpush.bf16.msrb.mxu2 %v7069_v15  ;;  %3701 = vmatmul.bf16.vlgmr.msra.gmra.mxu3 %v965_v21  ;;  %v7083_v15 = vld [vmem:[%s9363_s1 + $0x628] sm:$0xff]  ;;  %v7098_v21 = vld [vmem:[%s9363_s1 + $0x6a0] sm:$0xff] }
  0xa5   :  { %3745 = vmatpush.bf16.msrb.mxu3 %v7077_v19  ;;  %v7082_v19 = vld [vmem:[%s9363_s1 + $0x620] sm:$0xff] }
  0xa6   :  { %3707 = vmatpush.bf16.msrb.mxu0 %v7052_v22  ;;  %v8000_v43 = vpop.f32.mrf.mxu2  ;;  %v3457_v45 = vpop.f32.mrf.mxu0 }
  0xa7   :  { %3720 = vmatpush.bf16.msrb.mxu1 %v7060_v23  ;;  %v8011_v48 = vpop.f32.mrf.mxu3  ;;  %v3470_v49 = vpop.f32.mrf.mxu1  ;;  %v7103_v45 = vld [vmem:[%s9363_s1 + $0x6c8] sm:$0xff] }
  0xa8   :  { %3733 = vmatpush.bf16.msrb.mxu2 %v7068_v24  ;;  %v7106_v24 = vld [vmem:[%s9363_s1 + $0x6e0] sm:$0xff] }
  0xa9   :  { %3746 = vmatpush.bf16.msrb.mxu3 %v7076_v25  ;;  %v7081_v25 = vld [vmem:[%s9363_s1 + $0x618] sm:$0xff] }
  0xaa   :  { %3708 = vmatpush.bf16.msrb.mxu0 %v7051_v26  ;;  %v7089_v26 = vld [vmem:[%s9363_s1 + $0x658] sm:$0xff] }
  0xab   :  { %3721 = vmatpush.bf16.msrb.mxu1 %v7059_v27  ;;  %v7097_v27 = vld [vmem:[%s9363_s1 + $0x698] sm:$0xff] }
  0xac   :  { %3734 = vmatpush.bf16.msrb.mxu2 %v7067_v28 }
  0xad   :  { %3747 = vmatpush.bf16.msrb.mxu3 %v7075_v30  ;;  %v7080_v30 = vld [vmem:[%s9363_s1 + $0x610] sm:$0xff] }
  0xae   :  { %3709 = vmatpush.bf16.msrb.mxu0 %v7050_v31  ;;  %v3483_v57 = vpop.f32.mrf.mxu2  ;;  %v7088_v31 = vld [vmem:[%s9363_s1 + $0x650] sm:$0xff] }
  0xaf   :  { %3722 = vmatpush.bf16.msrb.mxu1 %v7058_v33  ;;  %v3496_v3 = vpop.f32.mrf.mxu3  ;;  %v7133_v57 = vld [vmem:[%s9363_s1 + $0x7b8] sm:$0xff] }
  0xb0   :  { %3735 = vmatpush.bf16.msrb.mxu2 %v7066_v34  ;;  %v7140_v3 = vld [vmem:[%s9363_s1 + $0x7f0] sm:$0xff] }
  0xb1   :  { %3748 = vmatpush.bf16.msrb.mxu3 %v7074_v37  ;;  %v7079_v37 = vld [vmem:[%s9363_s1 + $0x608] sm:$0xff] }
  0xb2   :  { %3710 = vmatpush.bf16.msrb.mxu0 %v7049_v39  ;;  %v7087_v39 = vld [vmem:[%s9363_s1 + $0x648] sm:$0xff] }
  0xb3   :  { %3723 = vmatpush.bf16.msrb.mxu1 %v7057_v40  ;;  %v7095_v40 = vld [vmem:[%s9363_s1 + $0x688] sm:$0xff] }
  0xb4   :  { %3736 = vmatpush.bf16.msrb.mxu2 %v7065_v41  ;;  %v54_v41 = vld [vmem:[%s9362_s0 + $0x60] sm:$0xff] }
  0xb5   :  { %3749 = vmatpush.bf16.msrb.mxu3 %v7073_v42  ;;  %v55_v42 = vld [vmem:[%s9362_s0 + $0x68] sm:$0xff] }
  0xb6   :  { %3711 = vmatpush.bf16.msrb.mxu0 %v7048_v44  ;;  %v922_v49 = vunpack.c.l.b16 %v55_v42 }
  0xb7   :  { %3724 = vmatpush.bf16.msrb.mxu1 %v7056_v46  ;;  %v7078_v46 = vld [vmem:[%s9363_s1 + $0x600] sm:$0xff] }
  0xb8   :  { %3737 = vmatpush.bf16.msrb.mxu2 %v7064_v47  ;;  %v920_v47 = vunpack.c.l.b16 %v54_v41  ;;  %v972_v60 = vpack.c.b16 %v922_v49, %v922_v49 }
  0xb9   :  { %3750 = vmatpush.bf16.msrb.mxu3 %v7072_v50  ;;  %v7086_v50 = vld [vmem:[%s9363_s1 + $0x640] sm:$0xff] }
  0xba   :  { %3712 = vmatpush.bf16.msrb.mxu0 %v7047_v51  ;;  %v7094_v51 = vld [vmem:[%s9363_s1 + $0x680] sm:$0xff]  ;;  %v970_v59 = vpack.c.b16 %v920_v47, %v920_v47  ;;  %v7157_v47 = vld [vmem:[%s9363_s1 + $0x878] sm:$0xff] }
  0xbb   :  { %3725 = vmatpush.bf16.msrb.mxu1 %v7055_v52  ;;  %v921_v52 = vunpack.c.h.b16 %v54_v41 }
  0xbc   :  { %3738 = vmatpush.bf16.msrb.mxu2 %v7063_v53 }
  0xbd   :  { %3751 = vmatpush.bf16.msrb.mxu3 %v7071_v56  ;;  %v923_v56 = vunpack.c.h.b16 %v55_v42  ;;  %v7118_v42 = vld [vmem:[%s9363_s1 + $0x740] sm:$0xff] }
  0xbe   :  { %3713 = vmatpush.bf16.msrb.mxu0 %v7046_v58  ;;  %v8091_v22 = vpop.f32.mrf.mxu0  ;;  %v7102_v58 = vld [vmem:[%s9363_s1 + $0x6c0] sm:$0xff] }
  0xbf   :  { %3726 = vmatpush.bf16.msrb.mxu1 %v7054_v61  ;;  %v8093_v23 = vpop.f32.mrf.mxu1  ;;  %v7141_v61 = vld [vmem:[%s9363_s1 + $0x7f8] sm:$0xff]  ;;  %v973_v63 = vpack.c.b16 %v923_v56, %v923_v56 }
  0xc0   :  { %3739 = vmatpush.bf16.msrb.mxu2 %v7062_v62  ;;  %v971_v62 = vpack.c.b16 %v921_v52, %v921_v52 }
  0xc1   :  { %3752 = vmatpush.bf16.msrb.mxu3 %v7070_v5  ;;  %3714 = vmatmul.bf16.vlgmr.msrb.gmra.mxu0 %v966_v6  ;;  %v7115_v5 = vld [vmem:[%s9363_s1 + $0x728] sm:$0xff] }
  0xc2   :  { %3758 = vmatpush.bf16.msra.mxu0 %v7085_v0  ;;  %3727 = vmatmul.bf16.vlgmr.msrb.gmra.mxu1 %v967_v9  ;;  %v7116_v0 = vld [vmem:[%s9363_s1 + $0x730] sm:$0xff]  ;;  %v7123_v6 = vld [vmem:[%s9363_s1 + $0x768] sm:$0xff]  ;;  %v7114_v9 = vld [vmem:[%s9363_s1 + $0x720] sm:$0xff] }
  0xc3   :  { %3771 = vmatpush.bf16.msra.mxu1 %v7093_v1  ;;  %3740 = vmatmul.bf16.vlgmr.msrb.gmra.mxu2 %v968_v7  ;;  %v7124_v1 = vld [vmem:[%s9363_s1 + $0x770] sm:$0xff]  ;;  %v7131_v7 = vld [vmem:[%s9363_s1 + $0x7a8] sm:$0xff] }
  0xc4   :  { %3784 = vmatpush.bf16.msra.mxu2 %v7101_v4  ;;  %3753 = vmatmul.bf16.vlgmr.msrb.gmra.mxu3 %v969_v10  ;;  %v3482_v4 = vadd.f32 %v8000_v43, %v7986_v38  ;;  %v7139_v38 = vld [vmem:[%s9363_s1 + $0x7e8] sm:$0xff]  ;;  %v7122_v10 = vld [vmem:[%s9363_s1 + $0x760] sm:$0xff] }
  0xc5   :  { %3797 = vmatpush.bf16.msra.mxu3 %v7109_v8 }
  0xc6   :  { %3759 = vmatpush.bf16.msra.mxu0 %v7084_v11  ;;  %v8107_v28 = vpop.f32.mrf.mxu2  ;;  %v3509_v34 = vpop.f32.mrf.mxu0  ;;  %v3495_v8 = vadd.f32 %v8011_v48, %v3482_v4  ;;  %v7130_v11 = vld [vmem:[%s9363_s1 + $0x7a0] sm:$0xff] }
  0xc7   :  { %3772 = vmatpush.bf16.msra.mxu1 %v7092_v12  ;;  %v8121_v33 = vpop.f32.mrf.mxu3  ;;  %v3522_v35 = vpop.f32.mrf.mxu1  ;;  %v7138_v48 = vld [vmem:[%s9363_s1 + $0x7e0] sm:$0xff] }
  0xc8   :  { %3785 = vmatpush.bf16.msra.mxu2 %v7100_v13  ;;  %v3508_v13 = vadd.f32 %v8091_v22, %v3495_v8  ;;  %v7112_v22 = vld [vmem:[%s9363_s1 + $0x710] sm:$0xff]  ;;  %v7135_v35 = vld [vmem:[%s9363_s1 + $0x7c8] sm:$0xff] }
  0xc9   :  { %3798 = vmatpush.bf16.msra.mxu3 %v7108_v14  ;;  %v7113_v14 = vld [vmem:[%s9363_s1 + $0x718] sm:$0xff] }
  0xca   :  { %3760 = vmatpush.bf16.msra.mxu0 %v7083_v15  ;;  %v7121_v15 = vld [vmem:[%s9363_s1 + $0x758] sm:$0xff] }
  0xcb   :  { %3773 = vmatpush.bf16.msra.mxu1 %v7091_v16  ;;  %v7129_v16 = vld [vmem:[%s9363_s1 + $0x798] sm:$0xff] }
  0xcc   :  { %3786 = vmatpush.bf16.msra.mxu2 %v7099_v17 }
  0xcd   :  { %3799 = vmatpush.bf16.msra.mxu3 %v7107_v18  ;;  %v7137_v18 = vld [vmem:[%s9363_s1 + $0x7d8] sm:$0xff] }
  0xce   :  { %3761 = vmatpush.bf16.msra.mxu0 %v7082_v19  ;;  %v3535_v44 = vpop.f32.mrf.mxu2 }
  0xcf   :  { %3774 = vmatpush.bf16.msra.mxu1 %v7090_v20  ;;  %v3548_v53 = vpop.f32.mrf.mxu3  ;;  %v3521_v20 = vadd.f32 %v8093_v23, %v3508_v13  ;;  %v7136_v23 = vld [vmem:[%s9363_s1 + $0x7d0] sm:$0xff]  ;;  %v7126_v44 = vld [vmem:[%s9363_s1 + $0x780] sm:$0xff] }
  0xd0   :  { %3787 = vmatpush.bf16.msra.mxu2 %v7098_v21 }
  0xd1   :  { %3800 = vmatpush.bf16.msra.mxu3 %v7106_v24  ;;  %v7120_v24 = vld [vmem:[%s9363_s1 + $0x750] sm:$0xff] }
  0xd2   :  { %3762 = vmatpush.bf16.msra.mxu0 %v7081_v25  ;;  %v7128_v25 = vld [vmem:[%s9363_s1 + $0x790] sm:$0xff] }
  0xd3   :  { %3775 = vmatpush.bf16.msra.mxu1 %v7089_v26 }
  0xd4   :  { %3788 = vmatpush.bf16.msra.mxu2 %v7097_v27  ;;  %v3534_v27 = vadd.f32 %v8107_v28, %v3521_v20  ;;  %v57_v28 = vld [vmem:[%s9362_s0 + $0x78] sm:$0xff]  ;;  %v7152_v20 = vld [vmem:[%s9363_s1 + $0x850] sm:$0xff] }
  0xd5   :  { %3801 = vmatpush.bf16.msra.mxu3 %v7105_v29  ;;  %v7111_v29 = vld [vmem:[%s9363_s1 + $0x708] sm:$0xff]  ;;  %v927_v49 = vunpack.c.h.b16 %v57_v28 }
  0xd6   :  { %3763 = vmatpush.bf16.msra.mxu0 %v7080_v30  ;;  %v7119_v30 = vld [vmem:[%s9363_s1 + $0x748] sm:$0xff] }
  0xd7   :  { %3776 = vmatpush.bf16.msra.mxu1 %v7088_v31  ;;  %v7127_v31 = vld [vmem:[%s9363_s1 + $0x788] sm:$0xff] }
  0xd8   :  { %3789 = vmatpush.bf16.msra.mxu2 %v7096_v32  ;;  %v56_v32 = vld [vmem:[%s9362_s0 + $0x70] sm:$0xff] }
  0xd9   :  { %3802 = vmatpush.bf16.msra.mxu3 %v7104_v36  ;;  %v3547_v36 = vadd.f32 %v8121_v33, %v3534_v27  ;;  %v59_v27 = vld [vmem:[%s9362_s0 + $0x88] sm:$0xff] }
  0xda   :  { %3764 = vmatpush.bf16.msra.mxu0 %v7079_v37  ;;  %v7110_v37 = vld [vmem:[%s9363_s1 + $0x700] sm:$0xff] }
  0xdb   :  { %3777 = vmatpush.bf16.msra.mxu1 %v7087_v39  ;;  %v924_v39 = vunpack.c.l.b16 %v56_v32 }
  0xdc   :  { %3790 = vmatpush.bf16.msra.mxu2 %v7095_v40  ;;  %v926_v40 = vunpack.c.l.b16 %v57_v28 }
  0xdd   :  { %3803 = vmatpush.bf16.msra.mxu3 %v7103_v45  ;;  %v925_v45 = vunpack.c.h.b16 %v56_v32  ;;  %v974_v52 = vpack.c.b16 %v924_v39, %v924_v39  ;;  %v7142_v32 = vld [vmem:[%s9363_s1 + $0x800] sm:$0xff]  ;;  %v7181_v39 = vld [vmem:[%s9363_s1 + $0x938] sm:$0xff] }
  0xde   :  { %3765 = vmatpush.bf16.msra.mxu0 %v7078_v46  ;;  %v3559_v43 = vpop.f32.mrf.mxu0  ;;  %v7149_v46 = vld [vmem:[%s9363_s1 + $0x838] sm:$0xff]  ;;  %v976_v53 = vpack.c.b16 %v926_v40, %v926_v40 }
  0xdf   :  { %3778 = vmatpush.bf16.msra.mxu1 %v7086_v50  ;;  %v3572_v12 = vpop.f32.mrf.mxu1  ;;  %v3560_v33 = vadd.f32 %v3559_v43, %v3547_v36  ;;  %v7165_v50 = vld [vmem:[%s9363_s1 + $0x8b8] sm:$0xff]  ;;  %v7162_v43 = vld [vmem:[%s9363_s1 + $0x8a0] sm:$0xff] }
  0xe0   :  { %3791 = vmatpush.bf16.msra.mxu2 %v7094_v51  ;;  %v7134_v51 = vld [vmem:[%s9363_s1 + $0x7c0] sm:$0xff]  ;;  %v7189_v40 = vld [vmem:[%s9363_s1 + $0x978] sm:$0xff] }
  0xe1   :  { %3804 = vmatpush.bf16.msra.mxu3 %v7102_v58  ;;  %3766 = vmatmul.bf16.vlgmr.msra.gmra.mxu0 %v970_v59  ;;  %v3573_v56 = vadd.f32 %v3572_v12, %v3560_v33  ;;  %v7148_v58 = vld [vmem:[%s9363_s1 + $0x830] sm:$0xff]  ;;  %v7161_v12 = vld [vmem:[%s9363_s1 + $0x898] sm:$0xff]  ;;  %v7158_v36 = vld [vmem:[%s9363_s1 + $0x880] sm:$0xff] }
  0xe2   :  { %3810 = vmatpush.bf16.msrb.mxu0 %v7117_v54  ;;  %3779 = vmatmul.bf16.vlgmr.msra.gmra.mxu1 %v971_v62  ;;  %v7173_v54 = vld [vmem:[%s9363_s1 + $0x8f8] sm:$0xff]  ;;  %v7156_v59 = vld [vmem:[%s9363_s1 + $0x870] sm:$0xff] }
  0xe3   :  { %3823 = vmatpush.bf16.msrb.mxu1 %v7125_v55  ;;  %3792 = vmatmul.bf16.vlgmr.msra.gmra.mxu2 %v972_v60  ;;  %v975_v55 = vpack.c.b16 %v925_v45, %v925_v45  ;;  %v7164_v60 = vld [vmem:[%s9363_s1 + $0x8b0] sm:$0xff] }
  0xe4   :  { %3836 = vmatpush.bf16.msrb.mxu2 %v7133_v57  ;;  %3805 = vmatmul.bf16.vlgmr.msra.gmra.mxu3 %v973_v63  ;;  %v977_v57 = vpack.c.b16 %v927_v49, %v927_v49  ;;  %v7172_v62 = vld [vmem:[%s9363_s1 + $0x8f0] sm:$0xff]  ;;  %v7147_v63 = vld [vmem:[%s9363_s1 + $0x828] sm:$0xff] }
  0xe5   :  { %3849 = vmatpush.bf16.msrb.mxu3 %v7141_v61 }
  0xe6   :  { %3811 = vmatpush.bf16.msrb.mxu0 %v7116_v0  ;;  %v3585_v17 = vpop.f32.mrf.mxu2  ;;  %v3561_v19 = vpop.f32.mrf.mxu0  ;;  %v7155_v0 = vld [vmem:[%s9363_s1 + $0x868] sm:$0xff] }
  0xe7   :  { %3824 = vmatpush.bf16.msrb.mxu1 %v7124_v1  ;;  %v8221_v21 = vpop.f32.mrf.mxu3  ;;  %v3574_v26 = vpop.f32.mrf.mxu1  ;;  %v3586_v61 = vadd.f32 %v3585_v17, %v3573_v56  ;;  %v7163_v1 = vld [vmem:[%s9363_s1 + $0x8a8] sm:$0xff]  ;;  %v7144_v17 = vld [vmem:[%s9363_s1 + $0x810] sm:$0xff] }
  0xe8   :  { %3837 = vmatpush.bf16.msrb.mxu2 %v7132_v2  ;;  %v7159_v26 = vld [vmem:[%s9363_s1 + $0x888] sm:$0xff] }
  0xe9   :  { %3850 = vmatpush.bf16.msrb.mxu3 %v7140_v3  ;;  %v3599_v2 = vadd.f32 %v8221_v21, %v3586_v61  ;;  %v7171_v3 = vld [vmem:[%s9363_s1 + $0x8e8] sm:$0xff]  ;;  %v7160_v21 = vld [vmem:[%s9363_s1 + $0x890] sm:$0xff] }
  0xea   :  { %3812 = vmatpush.bf16.msrb.mxu0 %v7115_v5  ;;  %v7195_v56 = vld [vmem:[%s9363_s1 + $0x9a8] sm:$0xff] }
  0xeb   :  { %3825 = vmatpush.bf16.msrb.mxu1 %v7123_v6  ;;  %v7146_v6 = vld [vmem:[%s9363_s1 + $0x820] sm:$0xff] }
  0xec   :  { %3838 = vmatpush.bf16.msrb.mxu2 %v7131_v7 }
  0xed   :  { %3851 = vmatpush.bf16.msrb.mxu3 %v7139_v38  ;;  %v7154_v38 = vld [vmem:[%s9363_s1 + $0x860] sm:$0xff] }
  0xee   :  { %3813 = vmatpush.bf16.msrb.mxu0 %v7114_v9  ;;  %v3587_v34 = vpop.f32.mrf.mxu2  ;;  %v7170_v9 = vld [vmem:[%s9363_s1 + $0x8e0] sm:$0xff] }
  0xef   :  { %3826 = vmatpush.bf16.msrb.mxu1 %v7122_v10  ;;  %v3600_v41 = vpop.f32.mrf.mxu3  ;;  %v7145_v10 = vld [vmem:[%s9363_s1 + $0x818] sm:$0xff]  ;;  %v930_v34 = vunpack.c.l.b16 %v59_v27 }
  0xf0   :  { %3839 = vmatpush.bf16.msrb.mxu2 %v7130_v11  ;;  %v7153_v11 = vld [vmem:[%s9363_s1 + $0x858] sm:$0xff]  ;;  %v931_v41 = vunpack.c.h.b16 %v59_v27 }
  0xf1   :  { %3852 = vmatpush.bf16.msrb.mxu3 %v7138_v48  ;;  %v980_v33 = vpack.c.b16 %v930_v34, %v930_v34  ;;  %v7213_v27 = vld [vmem:[%s9363_s1 + $0xa38] sm:$0xff] }
  0xf2   :  { %3814 = vmatpush.bf16.msrb.mxu0 %v7113_v14  ;;  %v7169_v14 = vld [vmem:[%s9363_s1 + $0x8d8] sm:$0xff]  ;;  %v981_v49 = vpack.c.b16 %v931_v41, %v931_v41  ;;  %v7228_v41 = vld [vmem:[%s9363_s1 + $0xab0] sm:$0xff] }
  0xf3   :  { %3827 = vmatpush.bf16.msrb.mxu1 %v7121_v15 }
  0xf4   :  { %3840 = vmatpush.bf16.msrb.mxu2 %v7129_v16 }
  0xf5   :  { %3853 = vmatpush.bf16.msrb.mxu3 %v7137_v18 }
  0xf6   :  { %3815 = vmatpush.bf16.msrb.mxu0 %v7112_v22  ;;  %v7168_v22 = vld [vmem:[%s9363_s1 + $0x8d0] sm:$0xff] }
  0xf7   :  { %3828 = vmatpush.bf16.msrb.mxu1 %v7120_v24  ;;  %v7143_v24 = vld [vmem:[%s9363_s1 + $0x808] sm:$0xff] }
  0xf8   :  { %3841 = vmatpush.bf16.msrb.mxu2 %v7128_v25  ;;  %v7151_v25 = vld [vmem:[%s9363_s1 + $0x848] sm:$0xff] }
  0xf9   :  { %3854 = vmatpush.bf16.msrb.mxu3 %v7136_v23  ;;  %v58_v23 = vld [vmem:[%s9362_s0 + $0x80] sm:$0xff] }
  0xfa   :  { %3816 = vmatpush.bf16.msrb.mxu0 %v7111_v29  ;;  %v928_v28 = vunpack.c.l.b16 %v58_v23 }
  0xfb   :  { %3829 = vmatpush.bf16.msrb.mxu1 %v7119_v30  ;;  %v7167_v30 = vld [vmem:[%s9363_s1 + $0x8c8] sm:$0xff] }
  0xfc   :  { %3842 = vmatpush.bf16.msrb.mxu2 %v7127_v31  ;;  %v978_v45 = vpack.c.b16 %v928_v28, %v928_v28 }
  0xfd   :  { %3855 = vmatpush.bf16.msrb.mxu3 %v7135_v35  ;;  %v7150_v35 = vld [vmem:[%s9363_s1 + $0x840] sm:$0xff] }
  0xfe   :  { %3817 = vmatpush.bf16.msrb.mxu0 %v7110_v37  ;;  %v3611_v4 = vpop.f32.mrf.mxu0  ;;  %v929_v37 = vunpack.c.h.b16 %v58_v23 }
  0xff   :  { %3830 = vmatpush.bf16.msrb.mxu1 %v7118_v42  ;;  %v3612_v5 = vadd.f32 %v3611_v4, %v3599_v2  ;;  %v3624_v7 = vpop.f32.mrf.mxu1  ;;  %v7197_v42 = vld [vmem:[%s9363_s1 + $0x9b8] sm:$0xff] }
 0x100   :  { %3843 = vmatpush.bf16.msrb.mxu2 %v7126_v44  ;;  %v7166_v44 = vld [vmem:[%s9363_s1 + $0x8c0] sm:$0xff]  ;;  %v7177_v2 = vld [vmem:[%s9363_s1 + $0x918] sm:$0xff] }
 0x101   :  { %3856 = vmatpush.bf16.msrb.mxu3 %v7134_v51  ;;  %3818 = vmatmul.bf16.vlgmr.msrb.gmra.mxu0 %v974_v52  ;;  %v3625_v8 = vadd.f32 %v3624_v7, %v3612_v5  ;;  %v7188_v51 = vld [vmem:[%s9363_s1 + $0x970] sm:$0xff]  ;;  %v7193_v4 = vld [vmem:[%s9363_s1 + $0x998] sm:$0xff] }
 0x102   :  { %3862 = vmatpush.bf16.msra.mxu0 %v7149_v46  ;;  %3831 = vmatmul.bf16.vlgmr.msrb.gmra.mxu1 %v975_v55  ;;  %v7205_v46 = vld [vmem:[%s9363_s1 + $0x9f8] sm:$0xff]  ;;  %v7196_v52 = vld [vmem:[%s9363_s1 + $0x9b0] sm:$0xff]  ;;  %v7187_v55 = vld [vmem:[%s9363_s1 + $0x968] sm:$0xff] }
 0x103   :  { %3875 = vmatpush.bf16.msra.mxu1 %v7157_v47  ;;  %3844 = vmatmul.bf16.vlgmr.msrb.gmra.mxu2 %v976_v53  ;;  %v979_v47 = vpack.c.b16 %v929_v37, %v929_v37  ;;  %v7204_v53 = vld [vmem:[%s9363_s1 + $0x9f0] sm:$0xff]  ;;  %v7201_v7 = vld [vmem:[%s9363_s1 + $0x9d8] sm:$0xff] }
 0x104   :  { %3888 = vmatpush.bf16.msra.mxu2 %v7165_v50  ;;  %3857 = vmatmul.bf16.vlgmr.msrb.gmra.mxu3 %v977_v57  ;;  %v7180_v50 = vld [vmem:[%s9363_s1 + $0x930] sm:$0xff]  ;;  %v7203_v57 = vld [vmem:[%s9363_s1 + $0x9e8] sm:$0xff] }
 0x105   :  { %3901 = vmatpush.bf16.msra.mxu3 %v7173_v54  ;;  %v7179_v54 = vld [vmem:[%s9363_s1 + $0x928] sm:$0xff] }
 0x106   :  { %3863 = vmatpush.bf16.msra.mxu0 %v7148_v58  ;;  %v3637_v48 = vpop.f32.mrf.mxu2  ;;  %v3613_v16 = vpop.f32.mrf.mxu0 }
 0x107   :  { %3876 = vmatpush.bf16.msra.mxu1 %v7156_v59  ;;  %v3638_v13 = vadd.f32 %v3637_v48, %v3625_v8  ;;  %v3650_v15 = vpop.f32.mrf.mxu3  ;;  %v3626_v18 = vpop.f32.mrf.mxu1  ;;  %v7200_v48 = vld [vmem:[%s9363_s1 + $0x9d0] sm:$0xff] }
 0x108   :  { %3889 = vmatpush.bf16.msra.mxu2 %v7164_v60  ;;  %v7178_v60 = vld [vmem:[%s9363_s1 + $0x920] sm:$0xff]  ;;  %v60_v16 = vld [vmem:[%s9362_s0 + $0x90] sm:$0xff] }
 0x109   :  { %3902 = vmatpush.bf16.msra.mxu3 %v7172_v62  ;;  %v8331_v19 = vadd.f32 %v3650_v15, %v3638_v13  ;;  %v7186_v62 = vld [vmem:[%s9363_s1 + $0x960] sm:$0xff]  ;;  %v7175_v13 = vld [vmem:[%s9363_s1 + $0x908] sm:$0xff]  ;;  %v933_v23 = vunpack.c.h.b16 %v60_v16 }
 0x10a   :  { %3864 = vmatpush.bf16.msra.mxu0 %v7147_v63  ;;  %v7194_v63 = vld [vmem:[%s9363_s1 + $0x9a0] sm:$0xff]  ;;  %v7191_v15 = vld [vmem:[%s9363_s1 + $0x988] sm:$0xff] }
 0x10b   :  { %3877 = vmatpush.bf16.msra.mxu1 %v7155_v0 }
 0x10c   :  { %3890 = vmatpush.bf16.msra.mxu2 %v7163_v1  ;;  %v7202_v1 = vld [vmem:[%s9363_s1 + $0x9e0] sm:$0xff] }
 0x10d   :  { %3903 = vmatpush.bf16.msra.mxu3 %v7171_v3  ;;  %v7185_v3 = vld [vmem:[%s9363_s1 + $0x958] sm:$0xff] }
 0x10e   :  { %3865 = vmatpush.bf16.msra.mxu0 %v7146_v6  ;;  %v3639_v29 = vpop.f32.mrf.mxu2 }
 0x10f   :  { %3878 = vmatpush.bf16.msra.mxu1 %v7154_v38  ;;  %v3652_v31 = vpop.f32.mrf.mxu3  ;;  %v7221_v29 = vld [vmem:[%s9363_s1 + $0xa78] sm:$0xff] }
 0x110   :  { %3891 = vmatpush.bf16.msra.mxu2 %v7162_v43  ;;  %v7229_v31 = vld [vmem:[%s9363_s1 + $0xab8] sm:$0xff] }
 0x111   :  { %3904 = vmatpush.bf16.msra.mxu3 %v7170_v9  ;;  %v7176_v9 = vld [vmem:[%s9363_s1 + $0x910] sm:$0xff] }
 0x112   :  { %3866 = vmatpush.bf16.msra.mxu0 %v7145_v10 }
 0x113   :  { %3879 = vmatpush.bf16.msra.mxu1 %v7153_v11  ;;  %v7184_v11 = vld [vmem:[%s9363_s1 + $0x950] sm:$0xff] }
 0x114   :  { %3892 = vmatpush.bf16.msra.mxu2 %v7161_v12  ;;  %v7192_v12 = vld [vmem:[%s9363_s1 + $0x990] sm:$0xff] }
 0x115   :  { %3905 = vmatpush.bf16.msra.mxu3 %v7169_v14  ;;  %v7183_v14 = vld [vmem:[%s9363_s1 + $0x948] sm:$0xff] }
 0x116   :  { %3867 = vmatpush.bf16.msra.mxu0 %v7144_v17  ;;  %v61_v17 = vld [vmem:[%s9362_s0 + $0x98] sm:$0xff] }
 0x117   :  { %3880 = vmatpush.bf16.msra.mxu1 %v7152_v20 }
 0x118   :  { %3893 = vmatpush.bf16.msra.mxu2 %v7160_v21  ;;  %v7174_v21 = vld [vmem:[%s9363_s1 + $0x900] sm:$0xff] }
 0x119   :  { %3906 = vmatpush.bf16.msra.mxu3 %v7168_v22  ;;  %v932_v22 = vunpack.c.l.b16 %v60_v16 }
 0x11a   :  { %3868 = vmatpush.bf16.msra.mxu0 %v7143_v24  ;;  %v934_v24 = vunpack.c.l.b16 %v61_v17 }
 0x11b   :  { %3881 = vmatpush.bf16.msra.mxu1 %v7151_v25  ;;  %v7182_v25 = vld [vmem:[%s9363_s1 + $0x940] sm:$0xff]  ;;  %v982_v28 = vpack.c.b16 %v932_v22, %v932_v22 }
 0x11c   :  { %3894 = vmatpush.bf16.msra.mxu2 %v7159_v26  ;;  %v7190_v26 = vld [vmem:[%s9363_s1 + $0x980] sm:$0xff]  ;;  %v984_v34 = vpack.c.b16 %v934_v24, %v934_v24 }
 0x11d   :  { %3907 = vmatpush.bf16.msra.mxu3 %v7167_v30  ;;  %v935_v30 = vunpack.c.h.b16 %v61_v17  ;;  %v7245_v17 = vld [vmem:[%s9363_s1 + $0xb38] sm:$0xff] }
 0x11e   :  { %3869 = vmatpush.bf16.msra.mxu0 %v7142_v32  ;;  %v3663_v58 = vpop.f32.mrf.mxu0  ;;  %v7198_v32 = vld [vmem:[%s9363_s1 + $0x9c0] sm:$0xff] }
 0x11f   :  { %3882 = vmatpush.bf16.msra.mxu1 %v7150_v35  ;;  %v3664_v59 = vadd.f32 %v3663_v58, %v8331_v19  ;;  %v3676_v61 = vpop.f32.mrf.mxu1  ;;  %v7199_v19 = vld [vmem:[%s9363_s1 + $0x9c8] sm:$0xff]  ;;  %v7237_v35 = vld [vmem:[%s9363_s1 + $0xaf8] sm:$0xff]  ;;  %v985_v37 = vpack.c.b16 %v935_v30, %v935_v30  ;;  %v7260_v30 = vld [vmem:[%s9363_s1 + $0xbb0] sm:$0xff] }
 0x120   :  { %3895 = vmatpush.bf16.msra.mxu2 %v7158_v36  ;;  %v983_v36 = vpack.c.b16 %v933_v23, %v933_v23  ;;  %v7225_v58 = vld [vmem:[%s9363_s1 + $0xa98] sm:$0xff] }
 0x121   :  { %3908 = vmatpush.bf16.msra.mxu3 %v7166_v44  ;;  %3870 = vmatmul.bf16.vlgmr.msra.gmra.mxu0 %v978_v45  ;;  %v3677_v0 = vadd.f32 %v3676_v61, %v3664_v59  ;;  %v7211_v44 = vld [vmem:[%s9363_s1 + $0xa28] sm:$0xff]  ;;  %v7233_v61 = vld [vmem:[%s9363_s1 + $0xad8] sm:$0xff] }
 0x122   :  { %3914 = vmatpush.bf16.msrb.mxu0 %v7181_v39  ;;  %3883 = vmatmul.bf16.vlgmr.msra.gmra.mxu1 %v979_v47  ;;  %v7212_v39 = vld [vmem:[%s9363_s1 + $0xa30] sm:$0xff]  ;;  %v7219_v45 = vld [vmem:[%s9363_s1 + $0xa68] sm:$0xff] }
 0x123   :  { %3927 = vmatpush.bf16.msrb.mxu1 %v7189_v40  ;;  %3896 = vmatmul.bf16.vlgmr.msra.gmra.mxu2 %v980_v33  ;;  %v7220_v40 = vld [vmem:[%s9363_s1 + $0xa70] sm:$0xff]  ;;  %v7227_v33 = vld [vmem:[%s9363_s1 + $0xaa8] sm:$0xff] }
 0x124   :  { %3940 = vmatpush.bf16.msrb.mxu2 %v7197_v42  ;;  %3909 = vmatmul.bf16.vlgmr.msra.gmra.mxu3 %v981_v49  ;;  %v7236_v42 = vld [vmem:[%s9363_s1 + $0xaf0] sm:$0xff] }
 0x125   :  { %3953 = vmatpush.bf16.msrb.mxu3 %v7205_v46  ;;  %v7235_v46 = vld [vmem:[%s9363_s1 + $0xae8] sm:$0xff] }
 0x126   :  { %3915 = vmatpush.bf16.msrb.mxu0 %v7180_v50  ;;  %v3689_v5 = vpop.f32.mrf.mxu2  ;;  %v3665_v43 = vpop.f32.mrf.mxu0  ;;  %v7210_v50 = vld [vmem:[%s9363_s1 + $0xa20] sm:$0xff] }
 0x127   :  { %3928 = vmatpush.bf16.msrb.mxu1 %v7188_v51  ;;  %v3690_v6 = vadd.f32 %v3689_v5, %v3677_v0  ;;  %v3702_v38 = vpop.f32.mrf.mxu3  ;;  %v3678_v10 = vpop.f32.mrf.mxu1  ;;  %v7232_v5 = vld [vmem:[%s9363_s1 + $0xad0] sm:$0xff]  ;;  %v62_v43 = vld [vmem:[%s9362_s0 + $0xa0] sm:$0xff] }
 0x128   :  { %3941 = vmatpush.bf16.msrb.mxu2 %v7196_v52  ;;  %v7218_v52 = vld [vmem:[%s9363_s1 + $0xa60] sm:$0xff]  ;;  %v7231_v10 = vld [vmem:[%s9363_s1 + $0xac8] sm:$0xff]  ;;  %v937_v16 = vunpack.c.h.b16 %v62_v43 }
 0x129   :  { %3954 = vmatpush.bf16.msrb.mxu3 %v7204_v53  ;;  %v8433_v8 = vadd.f32 %v3702_v38, %v3690_v6  ;;  %v7226_v53 = vld [vmem:[%s9363_s1 + $0xaa0] sm:$0xff]  ;;  %v7207_v6 = vld [vmem:[%s9363_s1 + $0xa08] sm:$0xff] }
 0x12a   :  { %3916 = vmatpush.bf16.msrb.mxu0 %v7179_v54  ;;  %v7223_v38 = vld [vmem:[%s9363_s1 + $0xa88] sm:$0xff] }
 0x12b   :  { %3929 = vmatpush.bf16.msrb.mxu1 %v7187_v55  ;;  %v7234_v55 = vld [vmem:[%s9363_s1 + $0xae0] sm:$0xff] }
 0x12c   :  { %3942 = vmatpush.bf16.msrb.mxu2 %v7195_v56  ;;  %v7209_v56 = vld [vmem:[%s9363_s1 + $0xa18] sm:$0xff] }
 0x12d   :  { %3955 = vmatpush.bf16.msrb.mxu3 %v7203_v57  ;;  %v7217_v57 = vld [vmem:[%s9363_s1 + $0xa58] sm:$0xff] }
 0x12e   :  { %3917 = vmatpush.bf16.msrb.mxu0 %v7178_v60  ;;  %v3691_v18 = vpop.f32.mrf.mxu2 }
 0x12f   :  { %3930 = vmatpush.bf16.msrb.mxu1 %v7186_v62  ;;  %v3704_v20 = vpop.f32.mrf.mxu3  ;;  %v7253_v18 = vld [vmem:[%s9363_s1 + $0xb78] sm:$0xff] }
 0x130   :  { %3943 = vmatpush.bf16.msrb.mxu2 %v7194_v63  ;;  %v7261_v20 = vld [vmem:[%s9363_s1 + $0xbb8] sm:$0xff] }
 0x131   :  { %3956 = vmatpush.bf16.msrb.mxu3 %v7202_v1  ;;  %v7208_v1 = vld [vmem:[%s9363_s1 + $0xa10] sm:$0xff] }
 0x132   :  { %3918 = vmatpush.bf16.msrb.mxu0 %v7177_v2 }
 0x133   :  { %3931 = vmatpush.bf16.msrb.mxu1 %v7185_v3  ;;  %v7216_v3 = vld [vmem:[%s9363_s1 + $0xa50] sm:$0xff] }
 0x134   :  { %3944 = vmatpush.bf16.msrb.mxu2 %v7193_v4  ;;  %v7224_v4 = vld [vmem:[%s9363_s1 + $0xa90] sm:$0xff] }
 0x135   :  { %3957 = vmatpush.bf16.msrb.mxu3 %v7201_v7  ;;  %v7215_v7 = vld [vmem:[%s9363_s1 + $0xa48] sm:$0xff] }
 0x136   :  { %3919 = vmatpush.bf16.msrb.mxu0 %v7176_v9 }
 0x137   :  { %3932 = vmatpush.bf16.msrb.mxu1 %v7184_v11 }
 0x138   :  { %3945 = vmatpush.bf16.msrb.mxu2 %v7192_v12  ;;  %v7206_v12 = vld [vmem:[%s9363_s1 + $0xa00] sm:$0xff] }
 0x139   :  { %3958 = vmatpush.bf16.msrb.mxu3 %v7200_v48  ;;  %v936_v48 = vunpack.c.l.b16 %v62_v43  ;;  %v7254_v43 = vld [vmem:[%s9363_s1 + $0xb80] sm:$0xff] }
 0x13a   :  { %3920 = vmatpush.bf16.msrb.mxu0 %v7175_v13 }
 0x13b   :  { %3933 = vmatpush.bf16.msrb.mxu1 %v7183_v14  ;;  %v7214_v14 = vld [vmem:[%s9363_s1 + $0xa40] sm:$0xff]  ;;  %v986_v22 = vpack.c.b16 %v936_v48, %v936_v48 }
 0x13c   :  { %3946 = vmatpush.bf16.msrb.mxu2 %v7191_v15  ;;  %v7222_v15 = vld [vmem:[%s9363_s1 + $0xa80] sm:$0xff] }
 0x13d   :  { %3959 = vmatpush.bf16.msrb.mxu3 %v7199_v19 }
 0x13e   :  { %3921 = vmatpush.bf16.msrb.mxu0 %v7174_v21  ;;  %v3715_v47 = vpop.f32.mrf.mxu0  ;;  %v7230_v21 = vld [vmem:[%s9363_s1 + $0xac0] sm:$0xff] }
 0x13f   :  { %3934 = vmatpush.bf16.msrb.mxu1 %v7182_v25  ;;  %v3716_v49 = vadd.f32 %v3715_v47, %v8433_v8  ;;  %v3728_v51 = vpop.f32.mrf.mxu1  ;;  %v63_v8 = vld [vmem:[%s9362_s0 + $0xa8] sm:$0xff]  ;;  %v7269_v25 = vld [vmem:[%s9363_s1 + $0xbf8] sm:$0xff] }
 0x140   :  { %3947 = vmatpush.bf16.msrb.mxu2 %v7190_v26  ;;  %v938_v13 = vunpack.c.l.b16 %v63_v8  ;;  %v939_v19 = vunpack.c.h.b16 %v63_v8  ;;  %v987_v26 = vpack.c.b16 %v937_v16, %v937_v16  ;;  %v7257_v47 = vld [vmem:[%s9363_s1 + $0xb98] sm:$0xff]  ;;  %v7284_v16 = vld [vmem:[%s9363_s1 + $0xc70] sm:$0xff] }
 0x141   :  { %3960 = vmatpush.bf16.msrb.mxu3 %v7198_v32  ;;  %3922 = vmatmul.bf16.vlgmr.msrb.gmra.mxu0 %v982_v28  ;;  %v3729_v54 = vadd.f32 %v3728_v51, %v3716_v49  ;;  %v7243_v32 = vld [vmem:[%s9363_s1 + $0xb28] sm:$0xff]  ;;  %v7265_v51 = vld [vmem:[%s9363_s1 + $0xbd8] sm:$0xff] }
 0x142   :  { %3966 = vmatpush.bf16.msra.mxu0 %v7213_v27  ;;  %3935 = vmatmul.bf16.vlgmr.msrb.gmra.mxu1 %v983_v36  ;;  %v988_v24 = vpack.c.b16 %v938_v13, %v938_v13  ;;  %v989_v23 = vpack.c.b16 %v939_v19, %v939_v19  ;;  %v7244_v27 = vld [vmem:[%s9363_s1 + $0xb30] sm:$0xff]  ;;  %v7251_v28 = vld [vmem:[%s9363_s1 + $0xb68] sm:$0xff]  ;;  %v7277_v8 = vld [vmem:[%s9363_s1 + $0xc38] sm:$0xff] }
 0x143   :  { %3979 = vmatpush.bf16.msra.mxu1 %v7221_v29  ;;  %3948 = vmatmul.bf16.vlgmr.msrb.gmra.mxu2 %v984_v34  ;;  %v7252_v29 = vld [vmem:[%s9363_s1 + $0xb70] sm:$0xff]  ;;  %v7259_v34 = vld [vmem:[%s9363_s1 + $0xba8] sm:$0xff] }
 0x144   :  { %3992 = vmatpush.bf16.msra.mxu2 %v7229_v31  ;;  %3961 = vmatmul.bf16.vlgmr.msrb.gmra.mxu3 %v985_v37  ;;  %v7268_v31 = vld [vmem:[%s9363_s1 + $0xbf0] sm:$0xff] }
 0x145   :  { %4005 = vmatpush.bf16.msra.mxu3 %v7237_v35  ;;  %v7267_v35 = vld [vmem:[%s9363_s1 + $0xbe8] sm:$0xff] }
 0x146   :  { %3967 = vmatpush.bf16.msra.mxu0 %v7212_v39  ;;  %v3741_v59 = vpop.f32.mrf.mxu2  ;;  %v3717_v63 = vpop.f32.mrf.mxu0  ;;  %v7242_v39 = vld [vmem:[%s9363_s1 + $0xb20] sm:$0xff] }
 0x147   :  { %3980 = vmatpush.bf16.msra.mxu1 %v7220_v40  ;;  %v3742_v60 = vadd.f32 %v3741_v59, %v3729_v54  ;;  %v3754_v62 = vpop.f32.mrf.mxu3  ;;  %v3730_v2 = vpop.f32.mrf.mxu1  ;;  %v7264_v59 = vld [vmem:[%s9363_s1 + $0xbd0] sm:$0xff]  ;;  %v7255_v63 = vld [vmem:[%s9363_s1 + $0xb88] sm:$0xff] }
 0x148   :  { %3993 = vmatpush.bf16.msra.mxu2 %v7228_v41  ;;  %v7250_v41 = vld [vmem:[%s9363_s1 + $0xb60] sm:$0xff]  ;;  %v7263_v2 = vld [vmem:[%s9363_s1 + $0xbc8] sm:$0xff] }
 0x149   :  { %4006 = vmatpush.bf16.msra.mxu3 %v7236_v42  ;;  %v8538_v0 = vadd.f32 %v3754_v62, %v3742_v60  ;;  %v7258_v42 = vld [vmem:[%s9363_s1 + $0xba0] sm:$0xff]  ;;  %v7239_v60 = vld [vmem:[%s9363_s1 + $0xb08] sm:$0xff] }
 0x14a   :  { %3968 = vmatpush.bf16.msra.mxu0 %v7211_v44  ;;  %v7247_v62 = vld [vmem:[%s9363_s1 + $0xb48] sm:$0xff] }
 0x14b   :  { %3981 = vmatpush.bf16.msra.mxu1 %v7219_v45  ;;  %v7266_v45 = vld [vmem:[%s9363_s1 + $0xbe0] sm:$0xff] }
 0x14c   :  { %3994 = vmatpush.bf16.msra.mxu2 %v7227_v33  ;;  %v7241_v33 = vld [vmem:[%s9363_s1 + $0xb18] sm:$0xff] }
 0x14d   :  { %4007 = vmatpush.bf16.msra.mxu3 %v7235_v46  ;;  %v7249_v46 = vld [vmem:[%s9363_s1 + $0xb58] sm:$0xff] }
 0x14e   :  { %3969 = vmatpush.bf16.msra.mxu0 %v7210_v50  ;;  %v3743_v9 = vpop.f32.mrf.mxu2 }
 0x14f   :  { %3982 = vmatpush.bf16.msra.mxu1 %v7218_v52  ;;  %v3756_v11 = vpop.f32.mrf.mxu3  ;;  %v7285_v9 = vld [vmem:[%s9363_s1 + $0xc78] sm:$0xff] }
 0x150   :  { %3995 = vmatpush.bf16.msra.mxu2 %v7226_v53  ;;  %v7262_v11 = vld [vmem:[%s9363_s1 + $0xbc0] sm:$0xff] }
 0x151   :  { %4008 = vmatpush.bf16.msra.mxu3 %v7234_v55  ;;  %v7240_v55 = vld [vmem:[%s9363_s1 + $0xb10] sm:$0xff] }
 0x152   :  { %3970 = vmatpush.bf16.msra.mxu0 %v7209_v56 }
 0x153   :  { %3983 = vmatpush.bf16.msra.mxu1 %v7217_v57  ;;  %v7248_v57 = vld [vmem:[%s9363_s1 + $0xb50] sm:$0xff] }
 0x154   :  { %3996 = vmatpush.bf16.msra.mxu2 %v7225_v58  ;;  %v7256_v58 = vld [vmem:[%s9363_s1 + $0xb90] sm:$0xff] }
 0x155   :  { %4009 = vmatpush.bf16.msra.mxu3 %v7233_v61  ;;  %v64_v61 = vld [vmem:[%s9362_s0 + $0xb0] sm:$0xff] }
 0x156   :  { %3971 = vmatpush.bf16.msra.mxu0 %v7208_v1 }
 0x157   :  { %3984 = vmatpush.bf16.msra.mxu1 %v7216_v3  ;;  %v940_v3 = vunpack.c.l.b16 %v64_v61 }
 0x158   :  { %3997 = vmatpush.bf16.msra.mxu2 %v7224_v4 }
 0x159   :  { %4010 = vmatpush.bf16.msra.mxu3 %v7232_v5  ;;  %v7238_v5 = vld [vmem:[%s9363_s1 + $0xb00] sm:$0xff] }
 0x15a   :  { %3972 = vmatpush.bf16.msra.mxu0 %v7207_v6 }
 0x15b   :  { %3985 = vmatpush.bf16.msra.mxu1 %v7215_v7  ;;  %v941_v7 = vunpack.c.h.b16 %v64_v61 }
 0x15c   :  { %3998 = vmatpush.bf16.msra.mxu2 %v7223_v38  ;;  %v7246_v38 = vld [vmem:[%s9363_s1 + $0xb40] sm:$0xff] }
 0x15d   :  { %4011 = vmatpush.bf16.msra.mxu3 %v7231_v10  ;;  %v991_v13 = vpack.c.b16 %v941_v7, %v941_v7 }
 0x15e   :  { %3973 = vmatpush.bf16.msra.mxu0 %v7206_v12  ;;  %v3767_v36 = vpop.f32.mrf.mxu0  ;;  %v990_v12 = vpack.c.b16 %v940_v3, %v940_v3 }
 0x15f   :  { %3986 = vmatpush.bf16.msra.mxu1 %v7214_v14  ;;  %v3768_v37 = vadd.f32 %v3767_v36, %v8538_v0  ;;  %v3780_v40 = vpop.f32.mrf.mxu1  ;;  %v65_v0 = vld [vmem:[%s9362_s0 + $0xb8] sm:$0xff]  ;;  %v7271_v36 = vld [vmem:[%s9363_s1 + $0xc08] sm:$0xff] }
 0x160   :  { %3999 = vmatpush.bf16.msra.mxu2 %v7222_v15  ;;  %v942_v6 = vunpack.c.l.b16 %v65_v0  ;;  %v943_v10 = vunpack.c.h.b16 %v65_v0  ;;  %v7276_v15 = vld [vmem:[%s9363_s1 + $0xc30] sm:$0xff] }
 0x161   :  { %4012 = vmatpush.bf16.msra.mxu3 %v7230_v21  ;;  %3974 = vmatmul.bf16.vlgmr.msra.gmra.mxu0 %v986_v22  ;;  %v3781_v44 = vadd.f32 %v3780_v40, %v3768_v37  ;;  %v7274_v21 = vld [vmem:[%s9363_s1 + $0xc20] sm:$0xff] }
 0x162   :  { %4018 = vmatpush.bf16.msrb.mxu0 %v7245_v17  ;;  %3987 = vmatmul.bf16.vlgmr.msra.gmra.mxu1 %v987_v26  ;;  %v992_v48 = vpack.c.b16 %v942_v6, %v942_v6  ;;  %v993_v14 = vpack.c.b16 %v943_v10, %v943_v10  ;;  %v7275_v17 = vld [vmem:[%s9363_s1 + $0xc28] sm:$0xff]  ;;  %v7273_v26 = vld [vmem:[%s9363_s1 + $0xc18] sm:$0xff]  ;;  %v66_v37 = vld [vmem:[%s9362_s0 + $0xc0] sm:$0xff] }
 0x163   :  { %4031 = vmatpush.bf16.msrb.mxu1 %v7253_v18  ;;  %4000 = vmatmul.bf16.vlgmr.msra.gmra.mxu2 %v988_v24  ;;  %v7283_v18 = vld [vmem:[%s9363_s1 + $0xc68] sm:$0xff]  ;;  %v7282_v24 = vld [vmem:[%s9363_s1 + $0xc60] sm:$0xff] }
 0x164   :  { %4044 = vmatpush.bf16.msrb.mxu2 %v7261_v20  ;;  %4013 = vmatmul.bf16.vlgmr.msra.gmra.mxu3 %v989_v23  ;;  %v7281_v23 = vld [vmem:[%s9363_s1 + $0xc58] sm:$0xff] }
 0x165   :  { %4057 = vmatpush.bf16.msrb.mxu3 %v7269_v25 }
 0x166   :  { %4019 = vmatpush.bf16.msrb.mxu0 %v7244_v27  ;;  %v3793_v49 = vpop.f32.mrf.mxu2  ;;  %v3769_v53 = vpop.f32.mrf.mxu0 }
 0x167   :  { %4032 = vmatpush.bf16.msrb.mxu1 %v7252_v29  ;;  %v3794_v50 = vadd.f32 %v3793_v49, %v3781_v44  ;;  %v3806_v52 = vpop.f32.mrf.mxu3  ;;  %v3782_v56 = vpop.f32.mrf.mxu1  ;;  %v7270_v44 = vld [vmem:[%s9363_s1 + $0xc00] sm:$0xff] }
 0x168   :  { %4045 = vmatpush.bf16.msrb.mxu2 %v7260_v30 }
 0x169   :  { %4058 = vmatpush.bf16.msrb.mxu3 %v7268_v31  ;;  %v3807_v54 = vadd.f32 %v3806_v52, %v3794_v50 }
 0x16a   :  { %4020 = vmatpush.bf16.msrb.mxu0 %v7243_v32 }
 0x16b   :  { %4033 = vmatpush.bf16.msrb.mxu1 %v7251_v28  ;;  %v7272_v28 = vld [vmem:[%s9363_s1 + $0xc10] sm:$0xff] }
 0x16c   :  { %4046 = vmatpush.bf16.msrb.mxu2 %v7259_v34 }
 0x16d   :  { %4059 = vmatpush.bf16.msrb.mxu3 %v7267_v35  ;;  %v7280_v35 = vld [vmem:[%s9363_s1 + $0xc50] sm:$0xff] }
 0x16e   :  { %4021 = vmatpush.bf16.msrb.mxu0 %v7242_v39  ;;  %v3795_v1 = vpop.f32.mrf.mxu2  ;;  %v7279_v39 = vld [vmem:[%s9363_s1 + $0xc48] sm:$0xff] }
 0x16f   :  { %4034 = vmatpush.bf16.msrb.mxu1 %v7250_v41  ;;  %v3808_v4 = vpop.f32.mrf.mxu3  ;;  %v944_v41 = vunpack.c.l.b16 %v66_v37 }
 0x170   :  { %4047 = vmatpush.bf16.msrb.mxu2 %v7258_v42 }
 0x171   :  { %4060 = vmatpush.bf16.msrb.mxu3 %v7266_v45  ;;  %v945_v45 = vunpack.c.h.b16 %v66_v37 }
 0x172   :  { %4022 = vmatpush.bf16.msrb.mxu0 %v7241_v33  ;;  %v7278_v33 = vld [vmem:[%s9363_s1 + $0xc40] sm:$0xff] }
 0x173   :  { %4035 = vmatpush.bf16.msrb.mxu1 %v7249_v46  ;;  %v994_v46 = vpack.c.b16 %v944_v41, %v944_v41  ;;  %v4167_v41 = vld [vmem:[%s9370_s8 + $0x38] sm:$0xff] }
 0x174   :  { %4048 = vmatpush.bf16.msrb.mxu2 %v7257_v47  ;;  %v995_v47 = vpack.c.b16 %v945_v45, %v945_v45  ;;  %v4191_v45 = vld [vmem:[%s9370_s8 + $0xf8] sm:$0xff] }
 0x175   :  { %4061 = vmatpush.bf16.msrb.mxu3 %v7265_v51 }
 0x176   :  { %4023 = vmatpush.bf16.msrb.mxu0 %v7240_v55 }
 0x177   :  { %4036 = vmatpush.bf16.msrb.mxu1 %v7248_v57 }
 0x178   :  { %4049 = vmatpush.bf16.msrb.mxu2 %v7256_v58 }
 0x179   :  { %4062 = vmatpush.bf16.msrb.mxu3 %v7264_v59 }
 0x17a   :  { %4024 = vmatpush.bf16.msrb.mxu0 %v7239_v60 }
 0x17b   :  { %4037 = vmatpush.bf16.msrb.mxu1 %v7247_v62 }
 0x17c   :  { %4050 = vmatpush.bf16.msrb.mxu2 %v7255_v63 }
 0x17d   :  { %4063 = vmatpush.bf16.msrb.mxu3 %v7263_v2 }
 0x17e   :  { %4025 = vmatpush.bf16.msrb.mxu0 %v7238_v5  ;;  %v3819_v19 = vpop.f32.mrf.mxu0 }
 0x17f   :  { %4038 = vmatpush.bf16.msrb.mxu1 %v7246_v38  ;;  %v3820_v20 = vadd.f32 %v3819_v19, %v3807_v54  ;;  %v3832_v22 = vpop.f32.mrf.mxu1  ;;  %v4119_v19 = vld [vmem:[%s9367_s5 + $0x40] sm:$0xff] }
 0x180   :  { %4051 = vmatpush.bf16.msrb.mxu2 %v7254_v43 }
 0x181   :  { %4064 = vmatpush.bf16.msrb.mxu3 %v7262_v11  ;;  %4026 = vmatmul.bf16.vlgmr.msrb.gmra.mxu0 %v990_v12  ;;  %v3833_v25 = vadd.f32 %v3832_v22, %v3820_v20  ;;  %v4118_v20 = vld [vmem:[%s9367_s5 + $0x38] sm:$0xff]  ;;  %v4117_v22 = vld [vmem:[%s9367_s5 + $0x30] sm:$0xff] }
 0x182   :  { %4070 = vmatpush.bf16.msra.mxu0 %v7277_v8  ;;  %4039 = vmatmul.bf16.vlgmr.msrb.gmra.mxu1 %v991_v13  ;;  %v4126_v8 = vld [vmem:[%s9367_s5 + $0x78] sm:$0xff]  ;;  %v4123_v13 = vld [vmem:[%s9367_s5 + $0x60] sm:$0xff] }
 0x183   :  { %4083 = vmatpush.bf16.msra.mxu1 %v7285_v9  ;;  %4052 = vmatmul.bf16.vlgmr.msrb.gmra.mxu2 %v992_v48  ;;  %v4125_v9 = vld [vmem:[%s9367_s5 + $0x70] sm:$0xff]  ;;  %v4124_v48 = vld [vmem:[%s9367_s5 + $0x68] sm:$0xff] }
 0x184   :  { %4065 = vmatmul.bf16.vlgmr.msrb.gmra.mxu3 %v993_v14  ;;  %4131 = vmatpush.msra.mxu2 %v4126_v8  ;;  %v4122_v14 = vld [vmem:[%s9367_s5 + $0x58] sm:$0xff]  ;;  %v4161_v8 = vld [vmem:[%s9370_s8 + $0x8] sm:$0xff] }
 0x185   :  { %4466 = vmatpush.msra.mxu3 %v4167_v41  ;;  %v4192_v41 = vld [vmem:[%s9370_s8 + $0x100] sm:$0xff] }
 0x186   :  { %4071 = vmatpush.bf16.msra.mxu0 %v7276_v15  ;;  %v3845_v27 = vpop.f32.mrf.mxu2  ;;  %v3821_v31 = vpop.f32.mrf.mxu0  ;;  %4132 = vmatpush.msra.mxu2 %v4125_v9  ;;  %v4180_v9 = vld [vmem:[%s9370_s8 + $0xa0] sm:$0xff] }
 0x187   :  { %4084 = vmatpush.bf16.msra.mxu1 %v7284_v16  ;;  %v3846_v29 = vadd.f32 %v3845_v27, %v3833_v25  ;;  %v3858_v30 = vpop.f32.mrf.mxu3  ;;  %v3834_v34 = vpop.f32.mrf.mxu1  ;;  %v4121_v16 = vld [vmem:[%s9367_s5 + $0x50] sm:$0xff] }
 0x188   :  { %4133 = vmatpush.msra.mxu2 %v4124_v48  ;;  %v4175_v48 = vld [vmem:[%s9370_s8 + $0x78] sm:$0xff] }
 0x189   :  { %v3859_v32 = vadd.f32 %v3858_v30, %v3846_v29  ;;  %v4114_v29 = vld [vmem:[%s9367_s5 + $0x18] sm:$0xff] }
 0x18a   :  { %4072 = vmatpush.bf16.msra.mxu0 %v7275_v17  ;;  %4134 = vmatpush.msra.mxu2 %v4123_v13  ;;  %v4179_v13 = vld [vmem:[%s9370_s8 + $0x98] sm:$0xff] }
 0x18b   :  { %4085 = vmatpush.bf16.msra.mxu1 %v7283_v18  ;;  %v4120_v18 = vld [vmem:[%s9367_s5 + $0x48] sm:$0xff] }
 0x18c   :  { %4135 = vmatpush.msra.mxu2 %v4122_v14  ;;  %v4187_v14 = vld [vmem:[%s9370_s8 + $0xd8] sm:$0xff] }
 0x18e   :  { %4073 = vmatpush.bf16.msra.mxu0 %v7274_v21  ;;  %v3847_v40 = vpop.f32.mrf.mxu2  ;;  %4136 = vmatpush.msra.mxu2 %v4121_v16  ;;  %v4174_v16 = vld [vmem:[%s9370_s8 + $0x70] sm:$0xff] }
 0x18f   :  { %4086 = vmatpush.bf16.msra.mxu1 %v7282_v24  ;;  %v3860_v42 = vpop.f32.mrf.mxu3 }
 0x190   :  { %4137 = vmatpush.msra.mxu2 %v4120_v18  ;;  %v4166_v42 = vld [vmem:[%s9370_s8 + $0x30] sm:$0xff] }
 0x191   :  { %4467 = vmatpush.msra.mxu3 %v4166_v42  ;;  %v4186_v18 = vld [vmem:[%s9370_s8 + $0xd0] sm:$0xff]  ;;  %v4212_v42 = vld [vmem:[%s9370_s8 + $0x1a0] sm:$0xff] }
 0x192   :  { %4074 = vmatpush.bf16.msra.mxu0 %v7273_v26  ;;  %4138 = vmatpush.msra.mxu2 %v4119_v19  ;;  %v4116_v26 = vld [vmem:[%s9367_s5 + $0x28] sm:$0xff] }
 0x193   :  { %4087 = vmatpush.bf16.msra.mxu1 %v7281_v23  ;;  %v4115_v23 = vld [vmem:[%s9367_s5 + $0x20] sm:$0xff]  ;;  %v4197_v19 = vld [vmem:[%s9370_s8 + $0x128] sm:$0xff] }
 0x194   :  { %4139 = vmatpush.msra.mxu2 %v4118_v20  ;;  %v4173_v20 = vld [vmem:[%s9370_s8 + $0x68] sm:$0xff] }
 0x196   :  { %4075 = vmatpush.bf16.msra.mxu0 %v7272_v28  ;;  %4140 = vmatpush.msra.mxu2 %v4117_v22  ;;  %v4113_v28 = vld [vmem:[%s9367_s5 + $0x10] sm:$0xff]  ;;  %v4185_v22 = vld [vmem:[%s9370_s8 + $0xc8] sm:$0xff] }
 0x197   :  { %4088 = vmatpush.bf16.msra.mxu1 %v7280_v35 }
 0x198   :  { %4141 = vmatpush.msra.mxu2 %v4116_v26  ;;  %v4176_v26 = vld [vmem:[%s9370_s8 + $0x80] sm:$0xff] }
 0x19a   :  { %4076 = vmatpush.bf16.msra.mxu0 %v7271_v36  ;;  %4142 = vmatpush.msra.mxu2 %v4115_v23  ;;  %v4112_v36 = vld [vmem:[%s9367_s5 + $0x8] sm:$0xff]  ;;  %v4184_v23 = vld [vmem:[%s9370_s8 + $0xc0] sm:$0xff] }
 0x19b   :  { %4089 = vmatpush.bf16.msra.mxu1 %v7279_v39  ;;  %v4111_v39 = vld [vmem:[%s9367_s5] sm:$0xff] }
 0x19c   :  { %4143 = vmatpush.msra.mxu2 %v4114_v29  ;;  %v4215_v29 = vld [vmem:[%s9370_s8 + $0x1b8] sm:$0xff] }
 0x19e   :  { %4077 = vmatpush.bf16.msra.mxu0 %v7270_v44  ;;  %v3871_v49 = vpop.f32.mrf.mxu0  ;;  %4144 = vmatpush.msra.mxu2 %v4113_v28  ;;  %v4183_v44 = vld [vmem:[%s9370_s8 + $0xb8] sm:$0xff]  ;;  %v4214_v28 = vld [vmem:[%s9370_s8 + $0x1b0] sm:$0xff] }
 0x19f   :  { %4090 = vmatpush.bf16.msra.mxu1 %v7278_v33  ;;  %v3872_v50 = vadd.f32 %v3871_v49, %v3859_v32  ;;  %v3884_v51 = vpop.f32.mrf.mxu1 }
 0x1a0   :  { %4145 = vmatpush.msra.mxu2 %v4112_v36  ;;  %v4193_v36 = vld [vmem:[%s9370_s8 + $0x108] sm:$0xff] }
 0x1a1   :  { %4078 = vmatmul.bf16.vlgmr.msra.gmra.mxu0 %v994_v46  ;;  %v3885_v52 = vadd.f32 %v3884_v51, %v3872_v50  ;;  %v4165_v46 = vld [vmem:[%s9370_s8 + $0x28] sm:$0xff]  ;;  %v4164_v50 = vld [vmem:[%s9370_s8 + $0x20] sm:$0xff] }
 0x1a2   :  { %4091 = vmatmul.bf16.vlgmr.msra.gmra.mxu1 %v995_v47  ;;  %4146 = vmatpush.msra.mxu2 %v4111_v39  ;;  %v4221_v39 = vld [vmem:[%s9370_s8 + $0x1e8] sm:$0xff] }
 0x1a3   :  { %4512 = vmatpush.msrb.mxu0 %v4183_v44  ;;  %4535 = vmatpush.msrb.mxu1 %v4191_v45  ;;  %v4220_v44 = vld [vmem:[%s9370_s8 + $0x1e0] sm:$0xff] }
 0x1a4   :  { %4468 = vmatpush.msra.mxu3 %v4165_v46  ;;  %v4168_v45 = vld [vmem:[%s9370_s8 + $0x40] sm:$0xff] }
 0x1a6   :  { %v3897_v53 = vpop.f32.mrf.mxu2  ;;  %v3873_v56 = vpop.f32.mrf.mxu0  ;;  %4469 = vmatpush.msra.mxu3 %v4164_v50  ;;  %v7357_v50 = vmov 0.0  }
 0x1a7   :  { %v3898_v54 = vadd.f32 %v3897_v53, %v3885_v52  ;;  %v3910_v55 = vpop.f32.mrf.mxu3  ;;  %v3886_v58 = vpop.f32.mrf.mxu1 }
 0x1a9   :  { %v3911_v57 = vadd.f32 %v3910_v55, %v3898_v54 }
 0x1ae   :  { %v3899_v59 = vpop.f32.mrf.mxu2 }
 0x1af   :  { %v3912_v60 = vpop.f32.mrf.mxu3 }
 0x1be   :  { %v3923_v61 = vpop.f32.mrf.mxu0 }
 0x1bf   :  { %v3924_v62 = vadd.f32 %v3923_v61, %v3911_v57  ;;  %v3936_v63 = vpop.f32.mrf.mxu1  ;;  %v7290_v61 = vld [vmem:[%s9365_s3] ss:$0 sm:$0xff]  ;;  %s7358_s3 = smov [#allocation2]  }
 0x1c0   :  { %s5199_s26 = sshll.u32 %s7358_s3, 4  ;;  %s5200_s26 = int_to_ptr.vmem [resolvable:$true] %s5199_s26 }
 0x1c1   :  { %v3937_v0 = vadd.f32 %v3936_v63, %v3924_v62 }
 0x1c6   :  { %v3949_v1 = vpop.f32.mrf.mxu2  ;;  %v3925_v3 = vpop.f32.mrf.mxu0 }
 0x1c7   :  { %v3962_v2 = vpop.f32.mrf.mxu3  ;;  %v3938_v4 = vpop.f32.mrf.mxu1  ;;  %v3950_v24 = vadd.f32 %v3949_v1, %v3937_v0  ;;  %v7291_v0 = vld [vmem:[%s9366_s4] ss:$0 sm:$0xff]  ;;  %s7359_s4 = smov [#allocation4]  }
 0x1c8   :  { %v4163_v4 = vld [vmem:[%s9370_s8 + $0x18] sm:$0xff]  ;;  %s5210_s11 = sshll.u32 %s7359_s4, 4  ;;  %s5211_s11 = int_to_ptr.vmem [resolvable:$true] %s5210_s11 }
 0x1c9   :  { %v3963_v27 = vadd.f32 %v3962_v2, %v3950_v24  ;;  %4470 = vmatpush.msra.mxu3 %v4163_v4  ;;  %v4196_v24 = vld [vmem:[%s9370_s8 + $0x120] sm:$0xff] }
 0x1ce   :  { %v3951_v5 = vpop.f32.mrf.mxu2 }
 0x1cf   :  { %v3964_v6 = vpop.f32.mrf.mxu3  ;;  %v4182_v5 = vld [vmem:[%s9370_s8 + $0xb0] sm:$0xff] }
 0x1d0   :  { %v4190_v6 = vld [vmem:[%s9370_s8 + $0xf0] sm:$0xff]  ;;  %4513 = vmatpush.msrb.mxu0 %v4182_v5 }
 0x1d1   :  { %4536 = vmatpush.msrb.mxu1 %v4190_v6 }
 0x1de   :  { %v3975_v7 = vpop.f32.mrf.mxu0 }
 0x1df   :  { %v3988_v38 = vpop.f32.mrf.mxu1  ;;  %v3976_v30 = vadd.f32 %v3975_v7, %v3963_v27  ;;  %v4162_v7 = vld [vmem:[%s9370_s8 + $0x10] sm:$0xff]  ;;  %v4195_v27 = vld [vmem:[%s9370_s8 + $0x118] sm:$0xff] }
 0x1e0   :  { %4471 = vmatpush.msra.mxu3 %v4162_v7 }
 0x1e1   :  { %v3989_v37 = vadd.f32 %v3988_v38, %v3976_v30  ;;  %v4181_v38 = vld [vmem:[%s9370_s8 + $0xa8] sm:$0xff]  ;;  %v4223_v30 = vld [vmem:[%s9370_s8 + $0x1f8] sm:$0xff] }
 0x1e2   :  { %4514 = vmatpush.msrb.mxu0 %v4181_v38  ;;  %4472 = vmatpush.msra.mxu3 %v4161_v8 }
 0x1e4   :  { %4515 = vmatpush.msrb.mxu0 %v4180_v9 }
 0x1e6   :  { %v4001_v43 = vpop.f32.mrf.mxu2  ;;  %v3977_v11 = vpop.f32.mrf.mxu0  ;;  %4516 = vmatpush.msrb.mxu0 %v4179_v13 }
 0x1e7   :  { %v4014_v10 = vpop.f32.mrf.mxu3  ;;  %v3990_v12 = vpop.f32.mrf.mxu1  ;;  %v4002_v40 = vadd.f32 %v4001_v43, %v3989_v37  ;;  %v4189_v43 = vld [vmem:[%s9370_s8 + $0xe8] sm:$0xff]  ;;  %v4160_v11 = vld [vmem:[%s9370_s8] sm:$0xff] }
 0x1e8   :  { %4537 = vmatpush.msrb.mxu1 %v4189_v43  ;;  %v4199_v12 = vld [vmem:[%s9370_s8 + $0x138] sm:$0xff]  ;;  %4473 = vmatpush.msra.mxu3 %v4160_v11  ;;  %v4213_v37 = vld [vmem:[%s9370_s8 + $0x1a8] sm:$0xff] }
 0x1e9   :  { %v4015_v47 = vadd.f32 %v4014_v10, %v4002_v40  ;;  %v4188_v10 = vld [vmem:[%s9370_s8 + $0xe0] sm:$0xff]  ;;  %4558 = vmatpush.msrb.mxu2 %v4199_v12  ;;  %v4169_v40 = vld [vmem:[%s9370_s8 + $0x48] sm:$0xff] }
 0x1ea   :  { %4538 = vmatpush.msrb.mxu1 %v4188_v10  ;;  %4489 = vmatpush.msrb.mxu3 %v4175_v48 }
 0x1ec   :  { %4539 = vmatpush.msrb.mxu1 %v4187_v14  ;;  %4490 = vmatpush.msrb.mxu3 %v4174_v16  ;;  %v4219_v16 = vld [vmem:[%s9370_s8 + $0x1d8] sm:$0xff] }
 0x1ee   :  { %v4003_v15 = vpop.f32.mrf.mxu2  ;;  %4540 = vmatpush.msrb.mxu1 %v4186_v18  ;;  %4491 = vmatpush.msrb.mxu3 %v4173_v20 }
 0x1ef   :  { %v4016_v17 = vpop.f32.mrf.mxu3  ;;  %v4198_v15 = vld [vmem:[%s9370_s8 + $0x130] sm:$0xff] }
 0x1f0   :  { %v4178_v17 = vld [vmem:[%s9370_s8 + $0x90] sm:$0xff]  ;;  %4559 = vmatpush.msrb.mxu2 %v4198_v15  ;;  %4541 = vmatpush.msrb.mxu1 %v4185_v22  ;;  %v4211_v15 = vld [vmem:[%s9370_s8 + $0x198] sm:$0xff] }
 0x1f1   :  { %4517 = vmatpush.msrb.mxu0 %v4178_v17 }
 0x1f2   :  { %4560 = vmatpush.msrb.mxu2 %v4197_v19  ;;  %4542 = vmatpush.msrb.mxu1 %v4184_v23 }
 0x1f4   :  { %4561 = vmatpush.msrb.mxu2 %v4196_v24  ;;  %4627 = vmatpush.msra.mxu1 %v4223_v30  ;;  %v4210_v30 = vld [vmem:[%s9370_s8 + $0x190] sm:$0xff] }
 0x1f6   :  { %4562 = vmatpush.msrb.mxu2 %v4195_v27 }
 0x1fe   :  { %v4027_v21 = vpop.f32.mrf.mxu0 }
 0x1ff   :  { %v4040_v25 = vpop.f32.mrf.mxu1  ;;  %v4028_v51 = vadd.f32 %v4027_v21, %v4015_v47  ;;  %v4177_v21 = vld [vmem:[%s9370_s8 + $0x88] sm:$0xff] }
 0x200   :  { %4518 = vmatpush.msrb.mxu0 %v4177_v21  ;;  %v4159_v21 = vld [vmem:[%s9369_s7 + $0x38] sm:$0xff] }
 0x201   :  { %v4041_v52 = vadd.f32 %v4040_v25, %v4028_v51  ;;  %v4172_v25 = vld [vmem:[%s9370_s8 + $0x60] sm:$0xff] }
 0x202   :  { %4492 = vmatpush.msrb.mxu3 %v4172_v25  ;;  %4519 = vmatpush.msrb.mxu0 %v4176_v26 }
 0x204   :  { %4604 = vmatpush.msra.mxu0 %v4215_v29 }
 0x206   :  { %v4053_v31 = vpop.f32.mrf.mxu2  ;;  %v4029_v32 = vpop.f32.mrf.mxu0  ;;  %4605 = vmatpush.msra.mxu0 %v4214_v28 }
 0x207   :  { %v4066_v34 = vpop.f32.mrf.mxu3  ;;  %v4042_v35 = vpop.f32.mrf.mxu1  ;;  %v4054_v53 = vadd.f32 %v4053_v31, %v4041_v52  ;;  %v4171_v31 = vld [vmem:[%s9370_s8 + $0x58] sm:$0xff]  ;;  %v4194_v32 = vld [vmem:[%s9370_s8 + $0x110] sm:$0xff] }
 0x208   :  { %v4170_v35 = vld [vmem:[%s9370_s8 + $0x50] sm:$0xff]  ;;  %4493 = vmatpush.msrb.mxu3 %v4171_v31  ;;  %4563 = vmatpush.msrb.mxu2 %v4194_v32 }
 0x209   :  { %v4067_v54 = vadd.f32 %v4066_v34, %v4054_v53  ;;  %v4222_v34 = vld [vmem:[%s9370_s8 + $0x1f0] sm:$0xff]  ;;  %4606 = vmatpush.msra.mxu0 %v4213_v37  ;;  %v4209_v37 = vld [vmem:[%s9370_s8 + $0x188] sm:$0xff] }
 0x20a   :  { %4628 = vmatpush.msra.mxu1 %v4222_v34  ;;  %4494 = vmatpush.msrb.mxu3 %v4170_v35  ;;  %v4218_v31 = vld [vmem:[%s9370_s8 + $0x1d0] sm:$0xff] }
 0x20b   :  { %4564 = vmatpush.msrb.mxu2 %v4193_v36  ;;  %4607 = vmatpush.msra.mxu0 %v4212_v42  ;;  %v4158_v36 = vld [vmem:[%s9369_s7 + $0x30] sm:$0xff] }
 0x20c   :  { %4629 = vmatpush.msra.mxu1 %v4221_v39  ;;  %4495 = vmatpush.msrb.mxu3 %v4169_v40 }
 0x20d   :  { %4565 = vmatpush.msrb.mxu2 %v4192_v41  ;;  %4608 = vmatpush.msra.mxu0 %v4211_v15 }
 0x20e   :  { %v4055_v33 = vpop.f32.mrf.mxu2  ;;  %4630 = vmatpush.msra.mxu1 %v4220_v44  ;;  %4496 = vmatpush.msrb.mxu3 %v4168_v45  ;;  %v4217_v44 = vld [vmem:[%s9370_s8 + $0x1c8] sm:$0xff] }
 0x20f   :  { %v4068_v49 = vpop.f32.mrf.mxu3  ;;  %v7292_v33 = vld [vmem:[%s9368_s6] ss:$0 sm:$0xff]  ;;  %4609 = vmatpush.msra.mxu0 %v4210_v30  ;;  %v4157_v45 = vld [vmem:[%s9369_s7 + $0x28] sm:$0xff] }
 0x210   :  { %4631 = vmatpush.msra.mxu1 %v4219_v16  ;;  %v4205_v16 = vld [vmem:[%s9370_s8 + $0x168] sm:$0xff] }
 0x211   :  { %4610 = vmatpush.msra.mxu0 %v4209_v37 }
 0x212   :  { %4632 = vmatpush.msra.mxu1 %v4218_v31 }
 0x214   :  { %4633 = vmatpush.msra.mxu1 %v4217_v44 }
 0x21e   :  { %v4079_v55 = vpop.f32.mrf.mxu0 }
 0x21f   :  { %v4080_v56 = vadd.f32 %v4079_v55, %v4067_v54  ;;  %v4092_v57 = vpop.f32.mrf.mxu1 }
 0x221   :  { %v4093_v58 = vadd.f32 %v4092_v57, %v4080_v56 }
 0x223   :  { %v4097_v59 = vrot.slane %v4093_v58, 4 }
 0x225   :  { %v4099_v60 = vmax.f32 %v4093_v58, %v4097_v59 }
 0x226   :  { %v4081_v62 = vpop.f32.mrf.mxu0 }
 0x227   :  { %v4100_v63 = vmax.f32 %v4099_v60, 0.0  ;;  %v4094_v1 = vpop.f32.mrf.mxu1 }
 0x229   :  { %v4105_v2 = vmul.f32 %v7290_v61, %v4100_v63 }
 0x22b   :  { %v4110_v3 = vadd.f32 %v7291_v0, %v4105_v2 }
 0x22d   :  { %4147 = vmatmul.f32.vlgmr.msra.gmra.mxu2 %v4110_v3 }
 0x22e   :  { %4666 = vmatpush.msra.mxu2 %v4159_v21 }
 0x230   :  { %4667 = vmatpush.msra.mxu2 %v4158_v36 }
 0x232   :  { %4668 = vmatpush.msra.mxu2 %v4157_v45 }
 0x2b0   :  { %v4148_v46 = vpop.f32.mrf.mxu2 }
 0x2b1   :  { %v4149_v47 = vadd.f32 %v7292_v33, %v4148_v46 }
 0x2b3   :  { %v8937_v49 = vmax.f32 %v4149_v47, 0.0 }
 0x2b5   :  { %vm4244_vm0 = vcmp.ge.f32.partialorder %v8937_v49, -2.2  ;;  %vm4245_vm1 = vcmp.lt.f32.partialorder %v8937_v49, -1.8  ;;  %vm4249_vm2 = vcmp.ge.f32.partialorder %v8937_v49, -1.8 }
 0x2b6   :  { %vm4246_vm3 = vmand %vm4244_vm0, %vm4245_vm1  ;;  %vm4250_vm4 = vcmp.lt.f32.partialorder %v8937_v49, -1.4  ;;  %vm4254_vm5 = vcmp.ge.f32.partialorder %v8937_v49, -1.4  ;;  %vm4255_vm6 = vcmp.lt.f32.partialorder %v8937_v49, -1.0  ;;  %vm4259_vm7 = vcmp.ge.f32.partialorder %v8937_v49, -1.0 }
 0x2b7   :  { %v6826_v51 = vsel %vm4246_vm3, 1.0, %v7357_v50  ;;  %vm4251_vm8 = vmand %vm4249_vm2, %vm4250_vm4  ;;  %vm4260_vm9 = vcmp.lt.f32.partialorder %v8937_v49, -0.6  ;;  %v6837_v52 = vadd.f32 2.2, %v8937_v49  ;;  %v4309_v53 = vsub.f32 -1.0, %v8937_v49 }
 0x2b8   :  { %v6827_v54 = vsel %vm4251_vm8, 1.0, %v7357_v50  ;;  %vm4256_vm10 = vmand %vm4254_vm5, %vm4255_vm6  ;;  %v4302_v55 = vsub.f32 -1.4, %v8937_v49  ;;  %v8953_v56 = vadd.f32 1.8, %v8937_v49  ;;  %v8956_v57 = vadd.f32 1.0, %v8937_v49 }
 0x2b9   :  { %v6828_v58 = vsel %vm4256_vm10, 1.0, %v7357_v50  ;;  %vm4261_vm11 = vmand %vm4259_vm7, %vm4260_vm9  ;;  %v4300_v59 = vmul.f32 2.5, %v6837_v52  ;;  %v4310_v60 = vmul.f32 2.5, %v4309_v53  ;;  %v8960_v61 = vadd.f32 1.4, %v8937_v49 }
 0x2ba   :  { %v6829_v62 = vsel %vm4261_vm11, 1.0, %v7357_v50  ;;  %v4303_v63 = vmul.f32 2.5, %v4302_v55  ;;  %v4307_v0 = vmul.f32 2.5, %v8953_v56  ;;  %v4316_v1 = vsub.f32 -0.6, %v8937_v49 }
 0x2bb   :  { %v4301_v2 = vmul.f32 %v6826_v51, %v4300_v59  ;;  %v4311_v3 = vmul.f32 %v6828_v58, %v4310_v60  ;;  %v4314_v4 = vmul.f32 2.5, %v8960_v61  ;;  %v4369_v5 = vmul.f32 1.25, %v6837_v52  ;;  %v4208_v51 = vld [vmem:[%s9370_s8 + $0x180] sm:$0xff] }
 0x2bc   :  { %v4304_v6 = vmul.f32 %v6827_v54, %v4303_v63  ;;  %v4308_v7 = vmul.f32 %v6827_v54, %v4307_v0  ;;  %v4317_v38 = vmul.f32 2.5, %v4316_v1  ;;  %v4371_v43 = vmul.f32 1.25, %v4309_v53  ;;  %v4156_v53 = vld [vmem:[%s9369_s7 + $0x20] sm:$0xff]  ;;  %4611 = vmatpush.msra.mxu0 %v4208_v51 }
 0x2bd   :  { %v4315_v8 = vmul.f32 %v6828_v58, %v4314_v4  ;;  %v4374_v9 = vmul.f32 1.25, %v8953_v56  ;;  %v4376_v10 = vmul.f32 1.25, %v4316_v1  ;;  %v4414_v11 = vmul.f32 0.8333333, %v6837_v52  ;;  %v4216_v52 = vld [vmem:[%s9370_s8 + $0x1c0] sm:$0xff]  ;;  %4669 = vmatpush.msra.mxu2 %v4156_v53 }
 0x2be   :  { %v4305_v12 = vadd.f32 %v4304_v6, %v4301_v2  ;;  %v4312_v48 = vadd.f32 %v4311_v3, %v4308_v7  ;;  %v4318_v13 = vmul.f32 %v6829_v62, %v4317_v38  ;;  %v4416_v14 = vmul.f32 0.8333333, %v4316_v1  ;;  %4634 = vmatpush.msra.mxu1 %v4216_v52  ;;  %v4207_v3 = vld [vmem:[%s9370_s8 + $0x178] sm:$0xff] }
 0x2bf   :  { %vm4264_vm12 = vcmp.ge.f32.partialorder %v8937_v49, -0.6  ;;  %vm4265_vm13 = vcmp.lt.f32.partialorder %v8937_v49, -0.2  ;;  %vm4269_vm14 = vcmp.ge.f32.partialorder %v8937_v49, -0.2 }
 0x2c0   :  { %v4319_v17 = vadd.f32 %v4318_v13, %v4315_v8  ;;  %v4370_v18 = vmul.f32 %v4369_v5, %v4305_v12  ;;  %v4372_v19 = vmul.f32 %v4371_v43, %v4312_v48  ;;  %v4375_v20 = vmul.f32 %v4374_v9, %v4312_v48  ;;  %vm4266_vm15 = vmand %vm4264_vm12, %vm4265_vm13  ;;  %v4206_v9 = vld [vmem:[%s9370_s8 + $0x170] sm:$0xff] }
 0x2c1   :  { %v6830_v22 = vsel %vm4266_vm15, 1.0, %v7357_v50  ;;  %vm4270_vm0 = vcmp.lt.f32.partialorder %v8937_v49, 0.2  ;;  %v4321_v24 = vmul.f32 2.5, %v8956_v57  ;;  %v8983_v25 = vsub.f32 -0.2, %v8937_v49 }
 0x2c2   :  { %v4373_v26 = vadd.f32 %v4372_v19, %v4370_v18  ;;  %v4377_v23 = vmul.f32 %v4376_v10, %v4319_v17  ;;  %vm4271_vm1 = vmand %vm4269_vm14, %vm4270_vm0  ;;  %v8988_v27 = vadd.f32 0.6, %v8937_v49  ;;  %v4330_v29 = vsub.f32 0.2, %v8937_v49 }
 0x2c3   :  { %v6831_v32 = vsel %vm4271_vm1, 1.0, %v7357_v50  ;;  %v4322_v28 = vmul.f32 %v6829_v62, %v4321_v24  ;;  %v4324_v34 = vmul.f32 2.5, %v8983_v25  ;;  %v4379_v35 = vmul.f32 1.25, %v8960_v61 }
 0x2c4   :  { %v9006_v39 = vadd.f32 %v4377_v23, %v4375_v20  ;;  %v4415_v40 = vmul.f32 %v4414_v11, %v4373_v26  ;;  %v4328_v41 = vmul.f32 2.5, %v8988_v27  ;;  %v4331_v42 = vmul.f32 2.5, %v4330_v29  ;;  %v4154_v20 = vld [vmem:[%s9369_s7 + $0x10] sm:$0xff]  ;;  %v4204_v23 = vld [vmem:[%s9370_s8 + $0x160] sm:$0xff] }
 0x2c5   :  { %vm4454_vm2 = vcmask 523264   ;;  %v4325_v33 = vmul.f32 %v6830_v22, %v4324_v34  ;;  %v4380_v46 = vmul.f32 %v4379_v35, %v4319_v17  ;;  %v4381_v47 = vmul.f32 1.25, %v8983_v25  ;;  %v4155_v17 = vld [vmem:[%s9369_s7 + $0x18] sm:$0xff] }
 0x2c6   :  { %v4417_v54 = vmul.f32 %v4416_v14, %v9006_v39  ;;  %v4329_v55 = vmul.f32 %v6830_v22, %v4328_v41  ;;  %v4332_v58 = vmul.f32 %v6831_v32, %v4331_v42  ;;  %v4384_v59 = vmul.f32 1.25, %v8956_v57  ;;  %4670 = vmatpush.msra.mxu2 %v4155_v17  ;;  %v4152_v41 = vld [vmem:[%s9369_s7] sm:$0xff] }
 0x2c7   :  { %v4326_v60 = vadd.f32 %v4325_v33, %v4322_v28  ;;  %v4386_v62 = vmul.f32 1.25, %v4330_v29  ;;  %v4424_v63 = vmul.f32 0.8333333, %v8960_v61  ;;  %vm4274_vm3 = vcmp.ge.f32.partialorder %v8937_v49, 0.2 }
 0x2c8   :  { %v4418_v0 = vadd.f32 %v4417_v54, %v4415_v40  ;;  %v4333_v1 = vadd.f32 %v4332_v58, %v4329_v55  ;;  %vm4275_vm4 = vcmp.lt.f32.partialorder %v8937_v49, 0.6  ;;  %v9031_v2 = vadd.f32 0.2, %v8937_v49  ;;  %4671 = vmatpush.msra.mxu2 %v4154_v20  ;;  %v4203_v40 = vld [vmem:[%s9370_s8 + $0x158] sm:$0xff]  ;;  %v4201_v55 = vld [vmem:[%s9370_s8 + $0x148] sm:$0xff] }
 0x2c9   :  { %v4382_v4 = vmul.f32 %v4381_v47, %v4326_v60  ;;  %v4385_v5 = vmul.f32 %v4384_v59, %v4326_v60  ;;  %vm4276_vm5 = vmand %vm4274_vm3, %vm4275_vm4  ;;  %v4337_v61 = vsub.f32 0.6, %v8937_v49  ;;  %v4389_v6 = vmul.f32 1.25, %v8988_v27  ;;  %v4202_v47 = vld [vmem:[%s9370_s8 + $0x150] sm:$0xff] }
 0x2ca   :  { %6847 = vmatmul.msk.f32.vlgmr.msra.gmra.mxu3 %vm4454_vm2, %v4418_v0  ;;  %v4387_v7 = vmul.f32 %v4386_v62, %v4333_v1  ;;  %v4426_v38 = vmul.f32 0.8333333, %v4330_v29  ;;  %v6832_v43 = vsel %vm4276_vm5, 1.0, %v7357_v50  ;;  %v4335_v8 = vmul.f32 2.5, %v9031_v2  ;;  %v4153_v29 = vld [vmem:[%s9369_s7 + $0x8] sm:$0xff] }
 0x2cb   :  { %v4383_v10 = vadd.f32 %v4382_v4, %v4380_v46  ;;  %v4338_v11 = vmul.f32 2.5, %v4337_v61  ;;  %v4390_v12 = vmul.f32 %v4389_v6, %v4333_v1  ;;  %v4429_v48 = vmul.f32 0.8333333, %v8956_v57  ;;  %4581 = vmatpush.msra.mxu3 %v4207_v3  ;;  %4672 = vmatpush.msra.mxu2 %v4153_v29  ;;  %v4200_v3 = vld [vmem:[%s9370_s8 + $0x140] sm:$0xff] }
 0x2cc   :  { %v4388_v13 = vadd.f32 %v4387_v7, %v4385_v5  ;;  %v4336_v14 = vmul.f32 %v6831_v32, %v4335_v8  ;;  %v4391_v15 = vmul.f32 1.25, %v4337_v61  ;;  %vm4279_vm6 = vcmp.ge.f32.partialorder %v8937_v49, 0.6 }
 0x2cd   :  { %v4425_v18 = vmul.f32 %v4424_v63, %v4383_v10  ;;  %v4339_v19 = vmul.f32 %v6832_v43, %v4338_v11  ;;  %vm4280_vm7 = vcmp.lt.f32.partialorder %v8937_v49, 1.0  ;;  %v9054_v57 = vadd.f32 -0.2, %v8937_v49  ;;  %4582 = vmatpush.msra.mxu3 %v4206_v9  ;;  %4673 = vmatpush.msra.mxu2 %v4152_v41 }
 0x2ce   :  { %v4427_v21 = vmul.f32 %v4426_v38, %v4388_v13  ;;  %v4430_v22 = vmul.f32 %v4429_v48, %v4388_v13  ;;  %v4431_v24 = vmul.f32 0.8333333, %v4337_v61  ;;  %vm4281_vm8 = vmand %vm4279_vm6, %vm4280_vm7  ;;  %v4344_v26 = vsub.f32 1.0, %v8937_v49 }
 0x2cf   :  { %v4340_v30 = vadd.f32 %v4339_v19, %v4336_v14  ;;  %v6833_v31 = vsel %vm4281_vm8, 1.0, %v7357_v50  ;;  %v4342_v32 = vmul.f32 2.5, %v9054_v57  ;;  %v4394_v28 = vmul.f32 1.25, %v9031_v2  ;;  %4583 = vmatpush.msra.mxu3 %v4205_v16 }
 0x2d0   :  { %v4428_v34 = vadd.f32 %v4427_v21, %v4425_v18  ;;  %v4345_v35 = vmul.f32 2.5, %v4344_v26  ;;  %v4396_v36 = vmul.f32 1.25, %v4344_v26  ;;  %v4434_v37 = vmul.f32 0.8333333, %v8988_v27 }
 0x2d1   :  { %v4392_v42 = vmul.f32 %v4391_v15, %v4340_v30  ;;  %v4343_v44 = vmul.f32 %v6832_v43, %v4342_v32  ;;  %v4436_v45 = vmul.f32 0.8333333, %v4344_v26  ;;  %4584 = vmatpush.msra.mxu3 %v4204_v23  ;;  %v4419_v33 = vmul.f32 0.8333333, %v8953_v56 }
 0x2d2   :  { %6849 = vmatmul.msk.f32.vlgmr.msrb.gmra.mxu0 %vm4454_vm2, %v4428_v34  ;;  %v4346_v46 = vmul.f32 %v6833_v31, %v4345_v35  ;;  %v4421_v27 = vmul.f32 0.8333333, %v8983_v25  ;;  %vm4284_vm9 = vcmp.ge.f32.partialorder %v8937_v49, 1.0  ;;  %vm4285_vm10 = vcmp.lt.f32.partialorder %v8937_v49, 1.4 }
 0x2d3   :  { %v4393_v51 = vadd.f32 %v4392_v42, %v4390_v12  ;;  %v4420_v52 = vmul.f32 %v4419_v33, %v9006_v39  ;;  %vm4286_vm11 = vmand %vm4284_vm9, %vm4285_vm10  ;;  %vm4289_vm12 = vcmp.ge.f32.partialorder %v8937_v49, 1.4  ;;  %vm4290_vm13 = vcmp.lt.f32.partialorder %v8937_v49, 1.8  ;;  %4585 = vmatpush.msra.mxu3 %v4203_v40 }
 0x2d4   :  { %v4347_v56 = vadd.f32 %v4346_v46, %v4343_v44  ;;  %v4395_v25 = vmul.f32 %v4394_v28, %v4340_v30  ;;  %v4422_v53 = vmul.f32 %v4421_v27, %v4383_v10  ;;  %vm4291_vm14 = vmand %vm4289_vm12, %vm4290_vm13  ;;  %v9088_v54 = vadd.f32 -0.6, %v8937_v49 }
 0x2d5   :  { %v4432_v58 = vmul.f32 %v4431_v24, %v4393_v51  ;;  %v4435_v39 = vmul.f32 %v4434_v37, %v4393_v51  ;;  %v6834_v59 = vsel %vm4286_vm11, 1.0, %v7357_v50  ;;  %v4351_v60 = vsub.f32 1.4, %v8937_v49  ;;  %4586 = vmatpush.msra.mxu3 %v4202_v47 }
 0x2d6   :  { %v4397_v62 = vmul.f32 %v4396_v36, %v4347_v56  ;;  %v4423_v63 = vadd.f32 %v4422_v53, %v4420_v52  ;;  %v4349_v0 = vmul.f32 2.5, %v9088_v54  ;;  %v6845_v1 = vadd.f32 -1.0, %v8937_v49 }
 0x2d7   :  { %v4433_v4 = vadd.f32 %v4432_v58, %v4430_v22  ;;  %v6835_v5 = vsel %vm4291_vm14, 1.0, %v7357_v50  ;;  %v4352_v61 = vmul.f32 2.5, %v4351_v60  ;;  %v4358_v6 = vsub.f32 1.8, %v8937_v49  ;;  %4587 = vmatpush.msra.mxu3 %v4201_v55 }
 0x2d8   :  { %v4398_v7 = vadd.f32 %v4397_v62, %v4395_v25  ;;  %6848 = vmatmul.msk.f32.vlgmr.msrb.gmra.mxu3 %vm4454_vm2, %v4423_v63  ;;  %v4350_v38 = vmul.f32 %v6833_v31, %v4349_v0  ;;  %v4356_v43 = vmul.f32 2.5, %v6845_v1  ;;  %v4399_v8 = vmul.f32 1.25, %v9054_v57 }
 0x2d9   :  { %6850 = vmatmul.msk.f32.vlgmr.msrb.gmra.mxu1 %vm4454_vm2, %v4433_v4  ;;  %v4353_v9 = vmul.f32 %v6834_v59, %v4352_v61  ;;  %v4359_v10 = vmul.f32 2.5, %v4358_v6  ;;  %4588 = vmatpush.msra.mxu3 %v4200_v3  ;;  %v4401_v13 = vmul.f32 1.25, %v4351_v60  ;;  %v4404_v16 = vmul.f32 1.25, %v9088_v54 }
 0x2da   :  { %v4437_v11 = vmul.f32 %v4436_v45, %v4398_v7  ;;  %v4357_v12 = vmul.f32 %v6834_v59, %v4356_v43  ;;  %v4400_v48 = vmul.f32 %v4399_v8, %v4347_v56  ;;  %vm4294_vm15 = vcmp.ge.f32.partialorder %v8937_v49, 1.8 }
 0x2db   :  { %v4354_v14 = vadd.f32 %v4353_v9, %v4350_v38  ;;  %v4360_v15 = vmul.f32 %v6835_v5, %v4359_v10  ;;  %vm4295_vm0 = vcmp.lt.f32.partialorder %v8937_v49, 2.2  ;;  %v6846_v18 = vadd.f32 -1.4, %v8937_v49  ;;  %v4685_v9 = vld [vmem:[%s9372_s10 + $0x18] sm:$0xff] }
 0x2dc   :  { %v4438_v17 = vadd.f32 %v4437_v11, %v4435_v39  ;;  %v4365_v19 = vsub.f32 2.2, %v8937_v49  ;;  %v4406_v24 = vmul.f32 1.25, %v4358_v6  ;;  %vm4296_vm1 = vmand %vm4294_vm15, %vm4295_vm0  ;;  %v4444_v32 = vmul.f32 0.8333333, %v9054_v57  ;;  %v4693_v10 = vld [vmem:[%s9372_s10 + $0x58] sm:$0xff]  ;;  %4960 = vmatpush.msrb.mxu3 %v4685_v9 }
 0x2dd   :  { %v4361_v20 = vadd.f32 %v4360_v15, %v4357_v12  ;;  %v4402_v21 = vmul.f32 %v4401_v13, %v4354_v14  ;;  %v4405_v22 = vmul.f32 %v4404_v16, %v4354_v14  ;;  %v6836_v26 = vsel %vm4296_vm1, 1.0, %v7357_v50  ;;  %v4697_v11 = vld [vmem:[%s9372_s10 + $0x78] sm:$0xff]  ;;  %5006 = vmatpush.msrb.mxu0 %v4693_v10  ;;  %v4692_v13 = vld [vmem:[%s9372_s10 + $0x50] sm:$0xff]  ;;  %v4683_v16 = vld [vmem:[%s9372_s10 + $0x8] sm:$0xff] }
 0x2de   :  { %6851 = vmatmul.msk.f32.vlgmr.msrb.gmra.mxu2 %vm4454_vm2, %v4438_v17  ;;  %v4363_v23 = vmul.f32 2.5, %v6846_v18  ;;  %v4366_v29 = vmul.f32 2.5, %v4365_v19  ;;  %v4446_v28 = vmul.f32 0.8333333, %v4358_v6  ;;  %v4409_v36 = vmul.f32 1.25, %v6845_v1  ;;  %5029 = vmatpush.msrb.mxu1 %v4697_v11  ;;  %v4696_v14 = vld [vmem:[%s9372_s10 + $0x70] sm:$0xff] }
 0x2df   :  { %v4403_v30 = vadd.f32 %v4402_v21, %v4400_v48  ;;  %v4407_v31 = vmul.f32 %v4406_v24, %v4361_v20  ;;  %v4439_v37 = vmul.f32 0.8333333, %v9031_v2  ;;  %v4441_v42 = vmul.f32 0.8333333, %v4351_v60  ;;  %v4684_v48 = vld [vmem:[%s9372_s10 + $0x10] sm:$0xff]  ;;  %5007 = vmatpush.msrb.mxu0 %v4692_v13  ;;  %v4691_v18 = vld [vmem:[%s9372_s10 + $0x48] sm:$0xff] }
 0x2e0   :  { %v4364_v34 = vmul.f32 %v6835_v5, %v4363_v23  ;;  %v4367_v35 = vmul.f32 %v6836_v26, %v4366_v29  ;;  %v4224_v44 = vsub.f32 0.0, %v8937_v49  ;;  %v4410_v33 = vmul.f32 %v4409_v36, %v4361_v20  ;;  %v4700_v15 = vld [vmem:[%s9372_s10 + $0x90] sm:$0xff]  ;;  %4961 = vmatpush.msrb.mxu3 %v4684_v48  ;;  %v4699_v20 = vld [vmem:[%s9372_s10 + $0x88] sm:$0xff]  ;;  %5030 = vmatpush.msrb.mxu1 %v4696_v14  ;;  %v4682_v24 = vld [vmem:[%s9372_s10] sm:$0xff] }
 0x2e1   :  { %v4408_v40 = vadd.f32 %v4407_v31, %v4405_v22  ;;  %v4445_v41 = vmul.f32 %v4444_v32, %v4403_v30  ;;  %v4411_v46 = vmul.f32 1.25, %v4365_v19  ;;  %v4440_v27 = vmul.f32 %v4439_v37, %v4398_v7  ;;  %v4690_v26 = vld [vmem:[%s9372_s10 + $0x40] sm:$0xff]  ;;  %5008 = vmatpush.msrb.mxu0 %v4691_v18 }
 0x2e2   :  { %v4368_v45 = vadd.f32 %v4367_v35, %v4364_v34  ;;  %v4442_v51 = vmul.f32 %v4441_v42, %v4403_v30  ;;  %v4225_v52 = vmul.f32 1.442695, %v4224_v44  ;;  %v4449_v57 = vmul.f32 0.8333333, %v9088_v54  ;;  %4962 = vmatpush.msrb.mxu3 %v4683_v16  ;;  %v4694_v23 = vld [vmem:[%s9372_s10 + $0x60] sm:$0xff]  ;;  %v4713_v16 = vld [vmem:[%s9372_s10 + $0xf8] sm:$0xff] }
 0x2e3   :  { %v4447_v47 = vmul.f32 %v4446_v28, %v4408_v40  ;;  %v4451_v58 = vmul.f32 0.8333333, %v4365_v19  ;;  %vm4639_vm7 = vcmask 257024   ;;  %v4695_v19 = vld [vmem:[%s9372_s10 + $0x68] sm:$0xff]  ;;  %v4698_v29 = vld [vmem:[%s9372_s10 + $0x80] sm:$0xff]  ;;  %5009 = vmatpush.msrb.mxu0 %v4690_v26 }
 0x2e4   :  { %v4412_v56 = vmul.f32 %v4411_v46, %v4368_v45  ;;  %v4443_v53 = vadd.f32 %v4442_v51, %v4440_v27  ;;  %7293 = vpow2.f32 %v4225_v52  ;;  %v4450_v2 = vmul.f32 %v4449_v57, %v4408_v40  ;;  %5031 = vmatpush.msrb.mxu1 %v4695_v19  ;;  %4963 = vmatpush.msrb.mxu3 %v4682_v24  ;;  %v4712_v24 = vld [vmem:[%s9372_s10 + $0xf0] sm:$0xff] }
 0x2e5   :  { %v4448_v25 = vadd.f32 %v4447_v47, %v4445_v41 }
 0x2e6   :  { %v4413_v55 = vadd.f32 %v4412_v56, %v4410_v33  ;;  %6852 = vmatmul.msk.f32.vlgmr.msra.gmra.mxu3 %vm4454_vm2, %v4443_v53  ;;  %5032 = vmatpush.msrb.mxu1 %v4694_v23  ;;  %v4689_v33 = vld [vmem:[%s9372_s10 + $0x38] sm:$0xff] }
 0x2e7   :  { %6853 = vmatmul.msk.f32.vlgmr.msra.gmra.mxu0 %vm4454_vm2, %v4448_v25  ;;  %4983 = vmatpush.msra.mxu3 %v4689_v33 }
 0x2e8   :  { %v4452_v39 = vmul.f32 %v4451_v58, %v4413_v55 }
 0x2ea   :  { %v4453_v59 = vadd.f32 %v4452_v39, %v4450_v2  ;;  %v7294_v60 = vpop.eup %7293 }
 0x2eb   :  { %v4227_v62 = vadd.f32 1.0, %v7294_v60 }
 0x2ec   :  { %6854 = vmatmul.msk.f32.vlgmr.msra.gmra.mxu1 %vm4454_vm2, %v4453_v59 }
 0x2ed   :  { %7295 = vrcp.f32 %v4227_v62  ;;  %v4239_v1 = vand.u32 2147483648, %v4227_v62  ;;  %v4237_v4 = vand.u32 2147483647, %v4227_v62  ;;  %vm4233_vm4 = vweird.f32 %v4227_v62  ;;  %5121 = vmatpush.msra.mxu1 %v4713_v16 }
 0x2ef   :  { %v4240_v61 = vor.u32 1.1754944e-38, %v4239_v1  ;;  %vm4238_vm6 = vcmp.eq.f32.partialorder %v4237_v4, 8.507059e+37  ;;  %5122 = vmatpush.msra.mxu1 %v4712_v24 }
 0x2f3   :  { %v7296_v63 = vpop.eup %7295 }
 0x2f4   :  { %v4229_v0 = vmul.f32 %v7296_v63, %v4227_v62  ;;  %vm4234_vm3 = vweird.f32 %v7296_v63 }
 0x2f5   :  { %vm4235_vm5 = vmor %vm4233_vm4, %vm4234_vm3 }
 0x2f6   :  { %v4230_v54 = vsub.f32 1.0, %v4229_v0 }
 0x2f8   :  { %v4231_v3 = vmul.f32 %v7296_v63, %v4230_v54 }
 0x2fa   :  { %v4232_v5 = vadd.f32 %v7296_v63, %v4231_v3 }
 0x2fc   :  { %v4236_v6 = vsel %vm4235_vm5, %v7296_v63, %v4232_v5 }
 0x2fd   :  { %v4241_v7 = vsel %vm4238_vm6, %v4240_v61, %v4236_v6 }
 0x2fe   :  { %v4243_v38 = vmul.f32 %v4241_v7, %v8937_v49  ;;  %v4701_v49 = vld [vmem:[%s9372_s10 + $0x98] sm:$0xff] }
 0x2ff   :  { %5052 = vmatpush.msrb.mxu2 %v4701_v49 }
 0x300   :  { %6855 = vmatmul.msk.f32.vlgmr.msra.gmra.mxu2 %vm4454_vm2, %v4243_v38 }
 0x301   :  { %5053 = vmatpush.msrb.mxu2 %v4700_v15  ;;  %v4709_v15 = vld [vmem:[%s9372_s10 + $0xd8] sm:$0xff] }
 0x302   :  { %5098 = vmatpush.msra.mxu0 %v4709_v15  ;;  %v4704_v15 = vld [vmem:[%s9372_s10 + $0xb0] sm:$0xff] }
 0x303   :  { %5054 = vmatpush.msrb.mxu2 %v4699_v20 }
 0x305   :  { %5055 = vmatpush.msrb.mxu2 %v4698_v29 }
 0x34d   :  { %v4475_v43 = vpop.f32.mrf.mxu3 }
 0x34e   :  { %v4640_v17 = vsel %vm4639_vm7, %v4475_v43, 0.0 }
 0x34f   :  { %v4521_v21 = vpop.f32.mrf.mxu0 }
 0x350   :  { %v4643_v30 = vsel %vm4639_vm7, %v4521_v21, 0.0 }
 0x356   :  { %v4544_v31 = vpop.f32.mrf.mxu1 }
 0x357   :  { %v4645_v28 = vsel %vm4639_vm7, %v4544_v31, 0.0 }
 0x35b   :  { %v4498_v8 = vpop.f32.mrf.mxu3 }
 0x35c   :  { %v4641_v12 = vsel %vm4639_vm7, %v4498_v8, 0.0 }
 0x35d   :  { %v4642_v22 = vadd.f32 %v4641_v12, %v4640_v17  ;;  %v4688_v17 = vld [vmem:[%s9372_s10 + $0x30] sm:$0xff] }
 0x35e   :  { %4984 = vmatpush.msra.mxu3 %v4688_v17 }
 0x35f   :  { %v4644_v32 = vadd.f32 %v4643_v30, %v4642_v22  ;;  %v4708_v22 = vld [vmem:[%s9372_s10 + $0xd0] sm:$0xff] }
 0x360   :  { %5099 = vmatpush.msra.mxu0 %v4708_v22 }
 0x361   :  { %v4567_v34 = vpop.f32.mrf.mxu2  ;;  %v4646_v35 = vadd.f32 %v4645_v28, %v4644_v32 }
 0x362   :  { %v4647_v37 = vsel %vm4639_vm7, %v4567_v34, 0.0  ;;  %v4687_v34 = vld [vmem:[%s9372_s10 + $0x28] sm:$0xff] }
 0x363   :  { %v4648_v40 = vadd.f32 %v4647_v37, %v4646_v35  ;;  %v4707_v35 = vld [vmem:[%s9372_s10 + $0xc8] sm:$0xff]  ;;  %4985 = vmatpush.msra.mxu3 %v4687_v34 }
 0x364   :  { %v4613_v42 = vpop.f32.mrf.mxu0  ;;  %5100 = vmatpush.msra.mxu0 %v4707_v35 }
 0x365   :  { %v4651_v45 = vsel %vm4639_vm7, %v4613_v42, 0.0  ;;  %v4711_v42 = vld [vmem:[%s9372_s10 + $0xe8] sm:$0xff] }
 0x366   :  { %5123 = vmatpush.msra.mxu1 %v4711_v42 }
 0x369   :  { %v4590_v36 = vpop.f32.mrf.mxu3  ;;  %v4636_v46 = vpop.f32.mrf.mxu1 }
 0x36a   :  { %v4649_v41 = vsel %vm4639_vm7, %v4590_v36, 0.0  ;;  %v4653_v47 = vsel %vm4639_vm7, %v4636_v46, 0.0 }
 0x36b   :  { %v4650_v44 = vadd.f32 %v4649_v41, %v4648_v40 }
 0x36d   :  { %v4652_v27 = vadd.f32 %v4651_v45, %v4650_v44  ;;  %v4686_v44 = vld [vmem:[%s9372_s10 + $0x20] sm:$0xff] }
 0x36e   :  { %v4706_v45 = vld [vmem:[%s9372_s10 + $0xc0] sm:$0xff]  ;;  %4986 = vmatpush.msra.mxu3 %v4686_v44 }
 0x36f   :  { %v4654_v51 = vadd.f32 %v4653_v47, %v4652_v27  ;;  %5101 = vmatpush.msra.mxu0 %v4706_v45 }
 0x383   :  { %v4675_v52 = vpop.f32.mrf.mxu2 }
 0x384   :  { %v9180_v56 = vadd.f32 %v4675_v52, %v4654_v51  ;;  %v4710_v51 = vld [vmem:[%s9372_s10 + $0xe0] sm:$0xff] }
 0x385   :  { %5124 = vmatpush.msra.mxu1 %v4710_v51 }
 0x386   :  { %vm4734_vm2 = vcmp.ge.f32.partialorder %v9180_v56, -2.2  ;;  %vm4735_vm8 = vcmp.lt.f32.partialorder %v9180_v56, -1.8  ;;  %vm4739_vm9 = vcmp.ge.f32.partialorder %v9180_v56, -1.8 }
 0x387   :  { %vm4736_vm10 = vmand %vm4734_vm2, %vm4735_vm8  ;;  %vm4740_vm11 = vcmp.lt.f32.partialorder %v9180_v56, -1.4  ;;  %vm4744_vm12 = vcmp.ge.f32.partialorder %v9180_v56, -1.4  ;;  %vm4745_vm13 = vcmp.lt.f32.partialorder %v9180_v56, -1.0  ;;  %vm4749_vm14 = vcmp.ge.f32.partialorder %v9180_v56, -1.0 }
 0x388   :  { %v6856_v57 = vsel %vm4736_vm10, 1.0, %v7357_v50  ;;  %vm4741_vm15 = vmand %vm4739_vm9, %vm4740_vm11  ;;  %vm4750_vm0 = vcmp.lt.f32.partialorder %v9180_v56, -0.6  ;;  %v6867_v25 = vadd.f32 2.2, %v9180_v56  ;;  %v4799_v53 = vsub.f32 -1.0, %v9180_v56 }
 0x389   :  { %v6857_v55 = vsel %vm4741_vm15, 1.0, %v7357_v50  ;;  %vm4746_vm1 = vmand %vm4744_vm12, %vm4745_vm13  ;;  %v4792_v2 = vsub.f32 -1.4, %v9180_v56  ;;  %v9196_v58 = vadd.f32 1.8, %v9180_v56  ;;  %v9199_v39 = vadd.f32 1.0, %v9180_v56 }
 0x38a   :  { %v6858_v59 = vsel %vm4746_vm1, 1.0, %v7357_v50  ;;  %vm4751_vm3 = vmand %vm4749_vm14, %vm4750_vm0  ;;  %v4790_v60 = vmul.f32 2.5, %v6867_v25  ;;  %v4800_v62 = vmul.f32 2.5, %v4799_v53  ;;  %v9203_v63 = vadd.f32 1.4, %v9180_v56 }
 0x38b   :  { %v6859_v0 = vsel %vm4751_vm3, 1.0, %v7357_v50  ;;  %v4793_v54 = vmul.f32 2.5, %v4792_v2  ;;  %v4797_v1 = vmul.f32 2.5, %v9196_v58  ;;  %v4806_v3 = vsub.f32 -0.6, %v9180_v56 }
 0x38c   :  { %v4791_v4 = vmul.f32 %v6856_v57, %v4790_v60  ;;  %v4801_v5 = vmul.f32 %v6858_v59, %v4800_v62  ;;  %v4804_v61 = vmul.f32 2.5, %v9203_v63  ;;  %v4859_v6 = vmul.f32 1.25, %v6867_v25 }
 0x38d   :  { %v4794_v7 = vmul.f32 %v6857_v55, %v4793_v54  ;;  %v4798_v38 = vmul.f32 %v6857_v55, %v4797_v1  ;;  %v4807_v43 = vmul.f32 2.5, %v4806_v3  ;;  %v4861_v8 = vmul.f32 1.25, %v4799_v53 }
 0x38e   :  { %v4805_v9 = vmul.f32 %v6858_v59, %v4804_v61  ;;  %v4864_v10 = vmul.f32 1.25, %v9196_v58  ;;  %v4866_v11 = vmul.f32 1.25, %v4806_v3  ;;  %v4904_v12 = vmul.f32 0.8333333, %v6867_v25 }
 0x38f   :  { %v4795_v49 = vadd.f32 %v4794_v7, %v4791_v4  ;;  %v4802_v48 = vadd.f32 %v4801_v5, %v4798_v38  ;;  %v4808_v13 = vmul.f32 %v6859_v0, %v4807_v43  ;;  %v4906_v14 = vmul.f32 0.8333333, %v4806_v3  ;;  %v4705_v4 = vld [vmem:[%s9372_s10 + $0xb8] sm:$0xff] }
 0x390   :  { %vm4754_vm4 = vcmp.ge.f32.partialorder %v9180_v56, -0.6  ;;  %vm4755_vm5 = vcmp.lt.f32.partialorder %v9180_v56, -0.2  ;;  %vm4759_vm6 = vcmp.ge.f32.partialorder %v9180_v56, -0.2 }
 0x391   :  { %v4809_v18 = vadd.f32 %v4808_v13, %v4805_v9  ;;  %v4860_v19 = vmul.f32 %v4859_v6, %v4795_v49  ;;  %v4862_v20 = vmul.f32 %v4861_v8, %v4802_v48  ;;  %v4865_v21 = vmul.f32 %v4864_v10, %v4802_v48  ;;  %vm4756_vm7 = vmand %vm4754_vm4, %vm4755_vm5 }
 0x392   :  { %v6860_v26 = vsel %vm4756_vm7, 1.0, %v7357_v50  ;;  %vm4760_vm2 = vcmp.lt.f32.partialorder %v9180_v56, 0.2  ;;  %v4811_v23 = vmul.f32 2.5, %v9199_v39  ;;  %v9232_v29 = vsub.f32 -0.2, %v9180_v56 }
 0x393   :  { %v4863_v30 = vadd.f32 %v4862_v20, %v4860_v19  ;;  %v4867_v31 = vmul.f32 %v4866_v11, %v4809_v18  ;;  %vm4761_vm8 = vmand %vm4759_vm6, %vm4760_vm2  ;;  %v9237_v32 = vadd.f32 0.6, %v9180_v56  ;;  %v4820_v28 = vsub.f32 0.2, %v9180_v56  ;;  %v4703_v19 = vld [vmem:[%s9372_s10 + $0xa8] sm:$0xff] }
 0x394   :  { %v6861_v36 = vsel %vm4761_vm8, 1.0, %v7357_v50  ;;  %v4812_v37 = vmul.f32 %v6859_v0, %v4811_v23  ;;  %v4814_v40 = vmul.f32 2.5, %v9232_v29  ;;  %v4869_v41 = vmul.f32 1.25, %v9203_v63  ;;  %v4702_v23 = vld [vmem:[%s9372_s10 + $0xa0] sm:$0xff] }
 0x395   :  { %v9258_v33 = vadd.f32 %v4867_v31, %v4865_v21  ;;  %v4905_v46 = vmul.f32 %v4904_v12, %v4863_v30  ;;  %v4818_v27 = vmul.f32 2.5, %v9237_v32  ;;  %v4821_v47 = vmul.f32 2.5, %v4820_v28 }
 0x396   :  { %vm4944_vm9 = vcmask 261120   ;;  %v4815_v52 = vmul.f32 %v6860_v26, %v4814_v40  ;;  %v4870_v57 = vmul.f32 %v4869_v41, %v4809_v18  ;;  %v4871_v25 = vmul.f32 1.25, %v9232_v29  ;;  %v4680_v18 = vld [vmem:[%s9371_s9 + $0x10] sm:$0xff]  ;;  %v4678_v41 = vld [vmem:[%s9371_s9] sm:$0xff] }
 0x397   :  { %v4907_v53 = vmul.f32 %v4906_v14, %v9258_v33  ;;  %v4819_v55 = vmul.f32 %v6860_v26, %v4818_v27  ;;  %v4822_v2 = vmul.f32 %v6861_v36, %v4821_v47  ;;  %v4874_v59 = vmul.f32 1.25, %v9199_v39  ;;  %v4681_v14 = vld [vmem:[%s9371_s9 + $0x18] sm:$0xff]  ;;  %v4679_v26 = vld [vmem:[%s9371_s9 + $0x8] sm:$0xff] }
 0x398   :  { %v4816_v60 = vadd.f32 %v4815_v52, %v4812_v37  ;;  %v4876_v62 = vmul.f32 1.25, %v4820_v28  ;;  %v4914_v0 = vmul.f32 0.8333333, %v9203_v63  ;;  %vm4764_vm10 = vcmp.ge.f32.partialorder %v9180_v56, 0.2  ;;  %5160 = vmatpush.msra.mxu2 %v4681_v14 }
 0x399   :  { %v4908_v54 = vadd.f32 %v4907_v53, %v4905_v46  ;;  %v4823_v1 = vadd.f32 %v4822_v2, %v4819_v55  ;;  %vm4765_vm11 = vcmp.lt.f32.partialorder %v9180_v56, 0.6  ;;  %v9271_v3 = vadd.f32 0.2, %v9180_v56 }
 0x39a   :  { %v4872_v5 = vmul.f32 %v4871_v25, %v4816_v60  ;;  %v4875_v61 = vmul.f32 %v4874_v59, %v4816_v60  ;;  %vm4766_vm12 = vmand %vm4764_vm10, %vm4765_vm11  ;;  %v4827_v6 = vsub.f32 0.6, %v9180_v56  ;;  %v4879_v63 = vmul.f32 1.25, %v9237_v32  ;;  %5161 = vmatpush.msra.mxu2 %v4680_v18 }
 0x39b   :  { %6877 = vmatmul.msk.f32.vlgmr.msrb.gmra.mxu3 %vm4944_vm9, %v4908_v54  ;;  %v4877_v7 = vmul.f32 %v4876_v62, %v4823_v1  ;;  %v4916_v38 = vmul.f32 0.8333333, %v4820_v28  ;;  %v6862_v43 = vsel %vm4766_vm12, 1.0, %v7357_v50  ;;  %v4825_v8 = vmul.f32 2.5, %v9271_v3 }
 0x39c   :  { %v4873_v9 = vadd.f32 %v4872_v5, %v4870_v57  ;;  %v4828_v10 = vmul.f32 2.5, %v4827_v6  ;;  %v4880_v11 = vmul.f32 %v4879_v63, %v4823_v1  ;;  %v4919_v12 = vmul.f32 0.8333333, %v9199_v39  ;;  %5075 = vmatpush.msrb.mxu3 %v4705_v4  ;;  %5162 = vmatpush.msra.mxu2 %v4679_v26 }
 0x39d   :  { %v4878_v49 = vadd.f32 %v4877_v7, %v4875_v61  ;;  %v4826_v48 = vmul.f32 %v6861_v36, %v4825_v8  ;;  %v4881_v13 = vmul.f32 1.25, %v4827_v6  ;;  %vm4769_vm13 = vcmp.ge.f32.partialorder %v9180_v56, 0.6 }
 0x39e   :  { %v4915_v16 = vmul.f32 %v4914_v0, %v4873_v9  ;;  %v4829_v17 = vmul.f32 %v6862_v43, %v4828_v10  ;;  %vm4770_vm14 = vcmp.lt.f32.partialorder %v9180_v56, 1.0  ;;  %v9291_v39 = vadd.f32 -0.2, %v9180_v56  ;;  %5076 = vmatpush.msrb.mxu3 %v4704_v15  ;;  %5163 = vmatpush.msra.mxu2 %v4678_v41 }
 0x39f   :  { %v4917_v20 = vmul.f32 %v4916_v38, %v4878_v49  ;;  %v4920_v21 = vmul.f32 %v4919_v12, %v4878_v49  ;;  %v4921_v22 = vmul.f32 0.8333333, %v4827_v6  ;;  %vm4771_vm15 = vmand %vm4769_vm13, %vm4770_vm14  ;;  %v4834_v24 = vsub.f32 1.0, %v9180_v56 }
 0x3a0   :  { %v4830_v30 = vadd.f32 %v4829_v17, %v4826_v48  ;;  %v6863_v31 = vsel %vm4771_vm15, 1.0, %v7357_v50  ;;  %v4832_v28 = vmul.f32 2.5, %v9291_v39  ;;  %v4884_v34 = vmul.f32 1.25, %v9271_v3  ;;  %5077 = vmatpush.msrb.mxu3 %v4703_v19 }
 0x3a1   :  { %v4918_v35 = vadd.f32 %v4917_v20, %v4915_v16  ;;  %v4835_v36 = vmul.f32 2.5, %v4834_v24  ;;  %v4886_v37 = vmul.f32 1.25, %v4834_v24  ;;  %v4924_v40 = vmul.f32 0.8333333, %v9237_v32 }
 0x3a2   :  { %v4882_v42 = vmul.f32 %v4881_v13, %v4830_v30  ;;  %v4833_v44 = vmul.f32 %v6862_v43, %v4832_v28  ;;  %v4926_v45 = vmul.f32 0.8333333, %v4834_v24  ;;  %v4909_v46 = vmul.f32 0.8333333, %v9196_v58  ;;  %5078 = vmatpush.msrb.mxu3 %v4702_v23 }
 0x3a3   :  { %6879 = vmatmul.msk.f32.vlgmr.msrb.gmra.mxu0 %vm4944_vm9, %v4918_v35  ;;  %v4836_v27 = vmul.f32 %v6863_v31, %v4835_v36  ;;  %v4911_v47 = vmul.f32 0.8333333, %v9232_v29  ;;  %vm4774_vm0 = vcmp.ge.f32.partialorder %v9180_v56, 1.0  ;;  %vm4775_vm1 = vcmp.lt.f32.partialorder %v9180_v56, 1.4 }
 0x3a4   :  { %v4883_v32 = vadd.f32 %v4882_v42, %v4880_v11  ;;  %v4910_v51 = vmul.f32 %v4909_v46, %v9258_v33  ;;  %vm4776_vm3 = vmand %vm4774_vm0, %vm4775_vm1  ;;  %vm4779_vm4 = vcmp.ge.f32.partialorder %v9180_v56, 1.4  ;;  %vm4780_vm5 = vcmp.lt.f32.partialorder %v9180_v56, 1.8 }
 0x3a5   :  { %v4837_v58 = vadd.f32 %v4836_v27, %v4833_v44  ;;  %v4885_v52 = vmul.f32 %v4884_v34, %v4830_v30  ;;  %v4912_v57 = vmul.f32 %v4911_v47, %v4873_v9  ;;  %vm4781_vm6 = vmand %vm4779_vm4, %vm4780_vm5  ;;  %v6874_v25 = vadd.f32 -0.6, %v9180_v56 }
 0x3a6   :  { %v4922_v29 = vmul.f32 %v4921_v22, %v4883_v32  ;;  %v4925_v53 = vmul.f32 %v4924_v40, %v4883_v32  ;;  %v6864_v55 = vsel %vm4776_vm3, 1.0, %v7357_v50  ;;  %v4841_v2 = vsub.f32 1.4, %v9180_v56 }
 0x3a7   :  { %v4887_v59 = vmul.f32 %v4886_v37, %v4837_v58  ;;  %v4913_v33 = vadd.f32 %v4912_v57, %v4910_v51  ;;  %v4839_v60 = vmul.f32 2.5, %v6874_v25  ;;  %v6875_v62 = vadd.f32 -1.0, %v9180_v56 }
 0x3a8   :  { %v4923_v0 = vadd.f32 %v4922_v29, %v4920_v21  ;;  %v6865_v54 = vsel %vm4781_vm6, 1.0, %v7357_v50  ;;  %v4842_v1 = vmul.f32 2.5, %v4841_v2  ;;  %v4848_v4 = vsub.f32 1.8, %v9180_v56 }
 0x3a9   :  { %v4888_v5 = vadd.f32 %v4887_v59, %v4885_v52  ;;  %6878 = vmatmul.msk.f32.vlgmr.msra.gmra.mxu3 %vm4944_vm9, %v4913_v33  ;;  %v4840_v61 = vmul.f32 %v6863_v31, %v4839_v60  ;;  %v4846_v6 = vmul.f32 2.5, %v6875_v62  ;;  %v4889_v63 = vmul.f32 1.25, %v9291_v39 }
 0x3aa   :  { %6880 = vmatmul.msk.f32.vlgmr.msrb.gmra.mxu1 %vm4944_vm9, %v4923_v0  ;;  %v4843_v7 = vmul.f32 %v6864_v55, %v4842_v1  ;;  %v4849_v38 = vmul.f32 2.5, %v4848_v4  ;;  %v4891_v10 = vmul.f32 1.25, %v4841_v2  ;;  %v4894_v49 = vmul.f32 1.25, %v6874_v25 }
 0x3ab   :  { %v4927_v43 = vmul.f32 %v4926_v45, %v4888_v5  ;;  %v4847_v8 = vmul.f32 %v6864_v55, %v4846_v6  ;;  %v4890_v9 = vmul.f32 %v4889_v63, %v4837_v58  ;;  %vm4784_vm7 = vcmp.ge.f32.partialorder %v9180_v56, 1.8 }
 0x3ac   :  { %v4844_v11 = vadd.f32 %v4843_v7, %v4840_v61  ;;  %v4850_v12 = vmul.f32 %v6865_v54, %v4849_v38  ;;  %vm4785_vm2 = vcmp.lt.f32.partialorder %v9180_v56, 2.2  ;;  %v6876_v13 = vadd.f32 -1.4, %v9180_v56 }
 0x3ad   :  { %v4928_v48 = vadd.f32 %v4927_v43, %v4925_v53  ;;  %v4855_v14 = vsub.f32 2.2, %v9180_v56  ;;  %v4896_v18 = vmul.f32 1.25, %v4848_v4  ;;  %vm4786_vm8 = vmand %vm4784_vm7, %vm4785_vm2  ;;  %v4934_v26 = vmul.f32 0.8333333, %v9291_v39 }
 0x3ae   :  { %v4851_v15 = vadd.f32 %v4850_v12, %v4847_v8  ;;  %v4892_v16 = vmul.f32 %v4891_v10, %v4844_v11  ;;  %v4895_v17 = vmul.f32 %v4894_v49, %v4844_v11  ;;  %v6866_v19 = vsel %vm4786_vm8, 1.0, %v7357_v50 }
 0x3af   :  { %6881 = vmatmul.msk.f32.vlgmr.msrb.gmra.mxu2 %vm4944_vm9, %v4928_v48  ;;  %v4853_v20 = vmul.f32 2.5, %v6876_v13  ;;  %v4856_v21 = vmul.f32 2.5, %v4855_v14  ;;  %v4936_v23 = vmul.f32 0.8333333, %v4848_v4  ;;  %v4899_v28 = vmul.f32 1.25, %v6875_v62 }
 0x3b0   :  { %v4893_v22 = vadd.f32 %v4892_v16, %v4890_v9  ;;  %v4897_v24 = vmul.f32 %v4896_v18, %v4851_v15  ;;  %v4929_v34 = vmul.f32 0.8333333, %v9271_v3  ;;  %v4931_v37 = vmul.f32 0.8333333, %v4841_v2 }
 0x3b1   :  { %v4854_v30 = vmul.f32 %v6865_v54, %v4853_v20  ;;  %v4857_v31 = vmul.f32 %v6866_v19, %v4856_v21  ;;  %v4714_v40 = vsub.f32 0.0, %v9180_v56  ;;  %v4900_v42 = vmul.f32 %v4899_v28, %v4851_v15 }
 0x3b2   :  { %v4898_v35 = vadd.f32 %v4897_v24, %v4895_v17  ;;  %v4935_v36 = vmul.f32 %v4934_v26, %v4893_v22  ;;  %v4901_v50 = vmul.f32 1.25, %v4855_v14  ;;  %v4930_v44 = vmul.f32 %v4929_v34, %v4888_v5 }
 0x3b3   :  { %v4858_v41 = vadd.f32 %v4857_v31, %v4854_v30  ;;  %v4932_v46 = vmul.f32 %v4931_v37, %v4893_v22  ;;  %v4715_v27 = vmul.f32 1.442695, %v4714_v40  ;;  %v4939_v39 = vmul.f32 0.8333333, %v6874_v25 }
 0x3b4   :  { %v4937_v45 = vmul.f32 %v4936_v23, %v4898_v35  ;;  %v4941_v3 = vmul.f32 0.8333333, %v4855_v14  ;;  %vm5129_vm14 = vcmask 60416  }
 0x3b5   :  { %v4902_v47 = vmul.f32 %v4901_v50, %v4858_v41  ;;  %v4933_v51 = vadd.f32 %v4932_v46, %v4930_v44  ;;  %7297 = vpow2.f32 %v4715_v27  ;;  %v4940_v52 = vmul.f32 %v4939_v39, %v4898_v35 }
 0x3b6   :  { %v4938_v32 = vadd.f32 %v4937_v45, %v4935_v36 }
 0x3b7   :  { %v4903_v58 = vadd.f32 %v4902_v47, %v4900_v42  ;;  %6882 = vmatmul.msk.f32.vlgmr.msrb.gmra.mxu3 %vm4944_vm9, %v4933_v51 }
 0x3b8   :  { %6883 = vmatmul.msk.f32.vlgmr.msra.gmra.mxu0 %vm4944_vm9, %v4938_v32 }
 0x3b9   :  { %v4942_v57 = vmul.f32 %v4941_v3, %v4903_v58 }
 0x3bb   :  { %v4943_v29 = vadd.f32 %v4942_v57, %v4940_v52  ;;  %v7298_v53 = vpop.eup %7297 }
 0x3bc   :  { %v4717_v55 = vadd.f32 1.0, %v7298_v53 }
 0x3bd   :  { %6884 = vmatmul.msk.f32.vlgmr.msra.gmra.mxu1 %vm4944_vm9, %v4943_v29 }
 0x3be   :  { %7299 = vrcp.f32 %v4717_v55  ;;  %v4729_v33 = vand.u32 2147483648, %v4717_v55  ;;  %v4727_v62 = vand.u32 2147483647, %v4717_v55  ;;  %vm4723_vm11 = vweird.f32 %v4717_v55 }
 0x3c0   :  { %v4730_v54 = vor.u32 1.1754944e-38, %v4729_v33  ;;  %vm4728_vm13 = vcmp.eq.f32.partialorder %v4727_v62, 8.507059e+37 }
 0x3c4   :  { %v7300_v2 = vpop.eup %7299 }
 0x3c5   :  { %v4719_v59 = vmul.f32 %v7300_v2, %v4717_v55  ;;  %vm4724_vm10 = vweird.f32 %v7300_v2 }
 0x3c6   :  { %vm4725_vm12 = vmor %vm4723_vm11, %vm4724_vm10 }
 0x3c7   :  { %v4720_v25 = vsub.f32 1.0, %v4719_v59 }
 0x3c9   :  { %v4721_v60 = vmul.f32 %v7300_v2, %v4720_v25 }
 0x3cb   :  { %v4722_v0 = vadd.f32 %v7300_v2, %v4721_v60 }
 0x3cd   :  { %v4726_v1 = vsel %vm4725_vm12, %v7300_v2, %v4722_v0 }
 0x3ce   :  { %v4731_v4 = vsel %vm4728_vm13, %v4730_v54, %v4726_v1 }
 0x3cf   :  { %v4733_v5 = vmul.f32 %v4731_v4, %v9180_v56 }
 0x3d1   :  { %6885 = vmatmul.msk.f32.vlgmr.msra.gmra.mxu2 %vm4944_vm9, %v4733_v5 }
 0x41e   :  { %v4965_v61 = vpop.f32.mrf.mxu3 }
 0x41f   :  { %v5130_v7 = vsel %vm5129_vm14, %v4965_v61, 0.0 }
 0x420   :  { %v5011_v38 = vpop.f32.mrf.mxu0 }
 0x421   :  { %v5133_v8 = vsel %vm5129_vm14, %v5011_v38, 0.0 }
 0x427   :  { %v5034_v9 = vpop.f32.mrf.mxu1 }
 0x428   :  { %v5135_v11 = vsel %vm5129_vm14, %v5034_v9, 0.0 }
 0x42c   :  { %v4988_v6 = vpop.f32.mrf.mxu3 }
 0x42d   :  { %v5131_v63 = vsel %vm5129_vm14, %v4988_v6, 0.0 }
 0x42e   :  { %v5132_v43 = vadd.f32 %v5131_v63, %v5130_v7 }
 0x430   :  { %v5134_v10 = vadd.f32 %v5133_v8, %v5132_v43 }
 0x432   :  { %v5057_v12 = vpop.f32.mrf.mxu2  ;;  %v5136_v49 = vadd.f32 %v5135_v11, %v5134_v10 }
 0x433   :  { %v5137_v48 = vsel %vm5129_vm14, %v5057_v12, 0.0 }
 0x434   :  { %v5138_v13 = vadd.f32 %v5137_v48, %v5136_v49 }
 0x435   :  { %v5103_v15 = vpop.f32.mrf.mxu0 }
 0x436   :  { %v5141_v17 = vsel %vm5129_vm14, %v5103_v15, 0.0 }
 0x43a   :  { %v5080_v56 = vpop.f32.mrf.mxu3  ;;  %v5126_v18 = vpop.f32.mrf.mxu1 }
 0x43b   :  { %v5139_v14 = vsel %vm5129_vm14, %v5080_v56, 0.0  ;;  %v5143_v20 = vsel %vm5129_vm14, %v5126_v18, 0.0 }
 0x43c   :  { %v5140_v16 = vadd.f32 %v5139_v14, %v5138_v13 }
 0x43e   :  { %v5142_v19 = vadd.f32 %v5141_v17, %v5140_v16 }
 0x440   :  { %v5144_v21 = vadd.f32 %v5143_v20, %v5142_v19 }
 0x454   :  { %v5165_v22 = vpop.f32.mrf.mxu2 }
 0x455   :  { %v5166_v24 = vadd.f32 %v5165_v22, %v5144_v21 }
 0x457   :  { %5168 = vst.msk [vmem:[#allocation2] sm:$0xf] %vm5129_vm14, %v5166_v24  ;;  %v5169_v26 = vsel %vm5129_vm14, %v5166_v24, -inf }
 0x458   :  { %5170 = vmax.xlane.f32.xlu0 %v5169_v26  ;;  %5204 = dma.vmem_to_hbm [thread:$0]  %s5200_s26, 64, %s5202_s25, [#allocation3]  }
 0x4cb   :  { %v5171_v23 = vpop.xlane.xlu0 %5170 }
 0x4cc   :  { %v5172_v30 = vsub.f32 %v5166_v24, %v5171_v23 }
 0x4ce   :  { %v5173_v31 = vmul.f32 1.442695, %v5172_v30 }
 0x4d0   :  { %7301 = vpow2.f32 %v5173_v31 }
 0x4d6   :  { %v7302_v28 = vpop.eup %7301 }
 0x4d7   :  { %v5175_v34 = vsel %vm5129_vm14, %v7302_v28, 0.0 }
 0x4d8   :  { %5176 = vadd.xlane.f32.xlu0 %v5175_v34 }
 0x54b   :  { %v5177_v35 = vpop.xlane.xlu0 %5176 }
 0x54c   :  { %7303 = vrcp.f32 %v5177_v35  ;;  %v5189_v41 = vand.u32 2147483648, %v5177_v35  ;;  %v5187_v50 = vand.u32 2147483647, %v5177_v35  ;;  %vm5183_vm15 = vweird.f32 %v5177_v35 }
 0x54e   :  { %v5190_v45 = vor.u32 1.1754944e-38, %v5189_v41  ;;  %vm5188_vm1 = vcmp.eq.f32.partialorder %v5187_v50, 8.507059e+37 }
 0x552   :  { %v7304_v36 = vpop.eup %7303 }
 0x553   :  { %v5179_v37 = vmul.f32 %v7304_v36, %v5177_v35  ;;  %vm5184_vm9 = vweird.f32 %v7304_v36 }
 0x554   :  { %vm5185_vm0 = vmor %vm5183_vm15, %vm5184_vm9 }
 0x555   :  { %v5180_v40 = vsub.f32 1.0, %v5179_v37 }
 0x557   :  { %v5181_v42 = vmul.f32 %v7304_v36, %v5180_v40 }
 0x559   :  { %v5182_v44 = vadd.f32 %v7304_v36, %v5181_v42 }
 0x55b   :  { %v5186_v46 = vsel %vm5185_vm0, %v7304_v36, %v5182_v44 }
 0x55c   :  { %v5191_v27 = vsel %vm5188_vm1, %v5190_v45, %v5186_v46 }
 0x55d   :  { %v5192_v47 = vmul.f32 %v7302_v28, %v5191_v27 }
 0x55f   :  { %5193 = vst.msk [vmem:[#allocation4] sm:$0xf] %vm5129_vm14, %v5192_v47 }
 0x560   :  { %5215 = dma.vmem_to_hbm [thread:$0]  %s5211_s11, 64, %s5213_s28, [#allocation5]  }
 0x561   :  { %7353 = dma.done.wait [#allocation3], 64  }
 0x562   :  { %7354 = vsyncadd [#allocation3], 4294967232 }
 0x563   :  { %7355 = dma.done.wait [#allocation5], 64  }
 0x564   :  { %7356 = vsyncadd [#allocation5], 4294967232 }
 0x565   :  { %5224 = vsyncpa [#allocation3], 1 }
 0x566   :  { %5225 = vsyncpa [#allocation5], 1 }

</bundles_post_ra>
